<compile_context>
chip_gen: v7x
topology: tpu7x:2x2x1
jax: 0.10.0
libtpu: 0.0.40
codegen_flags: <defaults>
</compile_context>

<pallas_src>
import jax
import jax.numpy as jnp
from jax.experimental import pallas as pl
from jax.experimental.pallas import tpu as pltpu


class CFG:
    image_embedding = 256
    text_embedding = 128
    audio_embedding = 128
    projection_dim = 128
    processor_hidden_dims = [256]
    processor_dropout = 0.1
    classifier_hidden_dims = [256]
    classifier_num_classes = 7
    dropout = 0.1


BN_EPS = 1e-5
LN_EPS = 1e-5
NEG_SLOPE = 0.01          # nn.LeakyReLU(negative_slope=0.01)
PROC_OUT = 384            # processor MLP output dim (hard-coded in the module)
OUT_PAD = 128             # lane-dense padded logits width (real classes = 7)
BIAS_W = 384              # packed bias tile width (max of all bias widths)

MAX_RESIDENT_K = 16384    # wf fully resident (<= 8 MiB bf16) -> single grid step
TK_STREAM = 8192          # K tile when streaming wf (double-buffered: 8 MiB)


def _k_tiling(k):
    """Adaptive K tiling: resident single step for small K, else 8K stream."""
    if k <= MAX_RESIDENT_K:
        k_pad = pl.cdiv(k, 128) * 128      # lane-align; at most 127 pad columns
        return k_pad, k_pad, 1
    k_pad = pl.cdiv(k, TK_STREAM) * TK_STREAM
    return k_pad, TK_STREAM, k_pad // TK_STREAM


# --------------------------- fused Pallas kernel -----------------------------

def _fused_kernel(
    # activations
    frames_ref, merge_ref, text_ref, audio_ref,
    # processor MLP (BN folded into p1w / packed bias)
    p1w_ref, p2w_ref,
    # VSC stand-in weights
    wf_ref, wc_ref,
    # packed projection heads: W1 rows [video|text|audio], W2 rows likewise,
    # vec rows [v:b1,b2,g,bt | t:b1,b2,g,bt | a:b1,b2,g,bt]
    pw1_ref, pw2_ref, pvec_ref,
    # classifier (BN folded; output padded to OUT_PAD lanes)
    chw_ref, cow_ref,
    # packed small biases: rows [proc_h, proc_o, vsc, cls_h, cls_o, 0, 0, 0]
    bias_ref,
    # outputs
    vproj_ref, tproj_ref, aproj_ref, logits_ref,
    # scratch
    vsc_acc,
):
    k = pl.program_id(0)
    nk = pl.num_programs(0)

    E_v, E_t, E_a = CFG.image_embedding, CFG.text_embedding, CFG.audio_embedding
    P = CFG.projection_dim
    H_p = CFG.processor_hidden_dims[0]
    H_c = CFG.classifier_hidden_dims[0]

    def dot_bf16(x, w):
        # bf16 MXU matmul with f32 accumulation.
        return jnp.dot(x.astype(jnp.bfloat16), w,
                       preferred_element_type=jnp.float32)

    def leaky(y):
        return jnp.where(y >= 0, y, NEG_SLOPE * y)

    def gelu_tanh(x):
        # TODO(synk): PyTorch nn.GELU defaults to exact erf; tanh approximation
        # (EUP-friendly) deviates by ~1e-3 — acceptable for inference.
        c = jnp.float32(0.7978845608028654)  # sqrt(2/pi)
        return 0.5 * x * (1.0 + jnp.tanh(c * (x + 0.044715 * x * x * x)))

    def proj_head(x, w1, w2, b1, b2, g, bt):
        projected = dot_bf16(x, w1) + b1
        h = gelu_tanh(projected)
        h = dot_bf16(h, w2) + b2
        h = h + projected                       # dropout = identity (eval)
        mean = jnp.mean(h, axis=-1, keepdims=True)
        var = jnp.mean((h - mean) ** 2, axis=-1, keepdims=True)
        h = (h - mean) * jax.lax.rsqrt(var + LN_EPS)
        return h * g + bt

    # ---- first K step: processor MLP, init VSC accumulator, and the text /
    # ---- audio heads (hoisted so they hide under the wf DMA stream) --------
    @pl.when(k == 0)
    def _init():
        h = leaky(dot_bf16(merge_ref[...], p1w_ref[...]) + bias_ref[0:1, 0:H_p])
        merge_cls = dot_bf16(h, p2w_ref[...]) + bias_ref[1:2, 0:PROC_OUT]
        # TODO(synk): VideoEncoder_VSC source not provided; linear-fusion
        # stand-in: frames @ Wf + merge_cls @ Wc + b, then LeakyReLU.
        vsc_acc[...] = dot_bf16(merge_cls, wc_ref[...]) + bias_ref[2:3, 0:E_v]

        tproj_ref[...] = proj_head(
            text_ref[...],
            pw1_ref[E_v:E_v + E_t, :], pw2_ref[P:2 * P, :],
            pvec_ref[4:5, :], pvec_ref[5:6, :], pvec_ref[6:7, :], pvec_ref[7:8, :])
        aproj_ref[...] = proj_head(
            audio_ref[...],
            pw1_ref[E_v + E_t:E_v + E_t + E_a, :], pw2_ref[2 * P:3 * P, :],
            pvec_ref[8:9, :], pvec_ref[9:10, :], pvec_ref[10:11, :],
            pvec_ref[11:12, :])

    # ---- every K step: accumulate one frame-feature tile (frames already
    # ---- bf16 from the wrapper, so no in-kernel cast) -----------------------
    vsc_acc[...] += jnp.dot(frames_ref[...], wf_ref[...],
                            preferred_element_type=jnp.float32)

    # ---- last K step: video head + classifier, write remaining outputs ------
    @pl.when(k == nk - 1)
    def _finalize():
        video_features = leaky(vsc_acc[...])
        vp = proj_head(
            video_features,
            pw1_ref[0:E_v, :], pw2_ref[0:P, :],
            pvec_ref[0:1, :], pvec_ref[1:2, :], pvec_ref[2:3, :], pvec_ref[3:4, :])
        vproj_ref[...] = vp
        tp = tproj_ref[...]        # resident output blocks written at k == 0
        ap = aproj_ref[...]

        # Classifier on concat([vp, tp, ap]) realised as three partial dots
        # (avoids an in-kernel lane concatenate).
        hc = (dot_bf16(vp, chw_ref[0:P, :])
              + dot_bf16(tp, chw_ref[P:2 * P, :])
              + dot_bf16(ap, chw_ref[2 * P:3 * P, :])
              + bias_ref[3:4, 0:H_c])
        hc = leaky(hc)
        logits_ref[...] = dot_bf16(hc, cow_ref[...]) + bias_ref[4:5, 0:OUT_PAD]


# --------------------------- parameter init ----------------------------------

def _init_linear(key, in_dim, out_dim, scale=0.02):
    kw, kb = jax.random.split(key)
    w = scale * jax.random.normal(kw, (in_dim, out_dim), jnp.float32)
    b = scale * jax.random.normal(kb, (1, out_dim), jnp.float32)
    return w, b


def _fold_bn(w, b, gamma, beta, running_mean, running_var, eps=BN_EPS):
    """Per-channel fold of eval-mode BatchNorm1d into the preceding Linear."""
    scale = gamma / jnp.sqrt(running_var + eps)                       # (out,)
    w_f = w * scale[None, :]
    b_f = (b - running_mean[None, :]) * scale[None, :] + beta[None, :]
    return w_f, b_f


def _bias_row(b):
    return jnp.pad(b, ((0, 0), (0, BIAS_W - b.shape[-1])))


def init_params(key, frame_flat_dim):
    assert len(CFG.processor_hidden_dims) == 1
    assert len(CFG.classifier_hidden_dims) == 1
    E_v, E_t, E_a = CFG.image_embedding, CFG.text_embedding, CFG.audio_embedding
    P = CFG.projection_dim
    H_p = CFG.processor_hidden_dims[0]
    H_c = CFG.classifier_hidden_dims[0]
    keys = jax.random.split(key, 10)
    params = {}

    ones, zeros = jnp.ones, jnp.zeros

    # Processor MLP: Linear(256->256)+BN+LeakyReLU(+Dropout=id), Linear(256->384).
    w, b = _init_linear(keys[0], E_t + E_a, H_p)
    w, proc_h_b = _fold_bn(w, b, ones(H_p), zeros(H_p), zeros(H_p), ones(H_p))
    params["proc_h_w"] = w.astype(jnp.bfloat16)
    w, proc_o_b = _init_linear(keys[1], H_p, PROC_OUT)
    params["proc_o_w"] = w.astype(jnp.bfloat16)

    # VSC stand-in weights; frame-feature axis padded to the adaptive K tiling.
    k_pad, _, _ = _k_tiling(frame_flat_dim)
    wf, vsc_b = _init_linear(keys[2], frame_flat_dim, E_v)
    params["vsc_wf"] = jnp.pad(
        wf, ((0, k_pad - frame_flat_dim), (0, 0))).astype(jnp.bfloat16)
    wc, _ = _init_linear(keys[3], PROC_OUT, E_v)
    params["vsc_wc"] = wc.astype(jnp.bfloat16)

    # Projection heads, packed.
    def head(hkey, e_dim):
        k1, k2 = jax.random.split(hkey)
        w1, b1 = _init_linear(k1, e_dim, P)
        w2, b2 = _init_linear(k2, P, P)
        gamma = jnp.ones((1, P), jnp.float32)
        beta = jnp.zeros((1, P), jnp.float32)
        return w1, w2, b1, b2, gamma, beta

    vh = head(keys[4], E_v)
    th = head(keys[5], E_t)
    ah = head(keys[6], E_a)
    params["head_w1"] = jnp.concatenate(
        [vh[0], th[0], ah[0]], axis=0).astype(jnp.bfloat16)          # (512, P)
    params["head_w2"] = jnp.concatenate(
        [vh[1], th[1], ah[1]], axis=0).astype(jnp.bfloat16)          # (384, P)
    params["head_vec"] = jnp.concatenate(
        [vh[2], vh[3], vh[4], vh[5],
         th[2], th[3], th[4], th[5],
         ah[2], ah[3], ah[4], ah[5]], axis=0)                        # (12, P)

    # Classifier: Linear(384->256)+BN+LeakyReLU(+Dropout=id), Linear(256->7) padded.
    w, b = _init_linear(keys[7], 3 * P, H_c)
    w, cls_h_b = _fold_bn(w, b, ones(H_c), zeros(H_c), zeros(H_c), ones(H_c))
    params["cls_h_w"] = w.astype(jnp.bfloat16)
    w, b = _init_linear(keys[8], H_c, CFG.classifier_num_classes)
    pad = OUT_PAD - CFG.classifier_num_classes
    params["cls_o_w"] = jnp.pad(w, ((0, 0), (0, pad))).astype(jnp.bfloat16)
    cls_o_b = jnp.pad(b, ((0, 0), (0, pad)))

    # All small bias rows packed into one (8, 384) tile -> one DMA.
    params["bias_pack"] = jnp.concatenate(
        [_bias_row(proc_h_b), _bias_row(proc_o_b), _bias_row(vsc_b),
         _bias_row(cls_h_b), _bias_row(cls_o_b),
         jnp.zeros((3, BIAS_W), jnp.float32)], axis=0)
    return params


# --------------------------- forward pass ------------------------------------

def multimodel_forward(params, frames, text_feature, audio_features):
    B = frames.shape[0]
    B_pad = max(8, pl.cdiv(B, 8) * 8)                  # sublane-aligned batch
    E_v, P = CFG.image_embedding, CFG.projection_dim

    # Frames cast to bf16 in the wrapper (half the HBM traffic, no in-kernel cast).
    frames_flat = frames.reshape(B, -1).astype(jnp.bfloat16)
    K = frames_flat.shape[1]
    k_pad, tk, nk = _k_tiling(K)
    assert params["vsc_wf"].shape[0] == k_pad, "params built for another frame size"

    def pad_b(x):
        return jnp.pad(x, ((0, B_pad - B), (0, 0)))

    merge_p = pad_b(jnp.concatenate([text_feature, audio_features], axis=-1))
    text_p = pad_b(text_feature)
    audio_p = pad_b(audio_features)
    # Single-step path (small K) needs no K padding; streaming path pads K to a
    # TK multiple.  TODO(synk): for the streaming path, pad only the last tile
    # instead of the whole frames array to avoid one extra HBM round trip.
    frames_p = jnp.pad(frames_flat, ((0, B_pad - B), (0, k_pad - K)))

    def fb(shape):
        # full-array resident block; constant index_map => DMA'd once,
        # stays in VMEM across the K grid.
        return pl.BlockSpec(shape, lambda k: (0,) * len(shape))

    operands = [
        frames_p, merge_p, text_p, audio_p,
        params["proc_h_w"], params["proc_o_w"],
        params["vsc_wf"], params["vsc_wc"],
        params["head_w1"], params["head_w2"], params["head_vec"],
        params["cls_h_w"], params["cls_o_w"],
        params["bias_pack"],
    ]

    in_specs = [
        pl.BlockSpec((B_pad, tk), lambda k: (0, k)),          # frames: K-tiled
        fb(merge_p.shape), fb(text_p.shape), fb(audio_p.shape),
        fb(params["proc_h_w"].shape), fb(params["proc_o_w"].shape),
        pl.BlockSpec((tk, E_v), lambda k: (k, 0)),            # wf: K-tiled
        fb(params["vsc_wc"].shape),
        fb(params["head_w1"].shape), fb(params["head_w2"].shape),
        fb(params["head_vec"].shape),
        fb(params["cls_h_w"].shape), fb(params["cls_o_w"].shape),
        fb(params["bias_pack"].shape),
    ]

    out_shape = (
        jax.ShapeDtypeStruct((B_pad, P), jnp.float32),
        jax.ShapeDtypeStruct((B_pad, P), jnp.float32),
        jax.ShapeDtypeStruct((B_pad, P), jnp.float32),
        jax.ShapeDtypeStruct((B_pad, OUT_PAD), jnp.float32),
    )
    out_specs = (fb((B_pad, P)), fb((B_pad, P)), fb((B_pad, P)),
                 fb((B_pad, OUT_PAD)))

    vp, tp, ap, logits_pad = pl.pallas_call(
        _fused_kernel,
        out_shape=out_shape,
        grid=(nk,),
        in_specs=in_specs,
        out_specs=out_specs,
        scratch_shapes=[pltpu.VMEM((B_pad, E_v), jnp.float32)],
        compiler_params=pltpu.CompilerParams(
            dimension_semantics=("arbitrary",),        # K is a reduction axis
            vmem_limit_bytes=32 * 1024 * 1024),
    )(*operands)

    return (vp[:B], tp[:B], ap[:B],
            logits_pad[:B, :CFG.classifier_num_classes])


# --------------------------- demo --------------------------------------------

if __name__ == "__main__":
    key = jax.random.PRNGKey(0)
    k_frames, k_text, k_audio, k_params = jax.random.split(key, 4)

    B, T, H, W = 2, 4, 16, 16
    frames = jax.random.normal(k_frames, (B, T, 3, H, W), jnp.float32)
    text_feature = jax.random.normal(k_text, (B, CFG.text_embedding), jnp.float32)
    audio_features = jax.random.normal(k_audio, (B, CFG.audio_embedding), jnp.float32)

    params = init_params(k_params, frame_flat_dim=T * 3 * H * W)

    fwd = jax.jit(multimodel_forward)
    video_p, text_p, audio_p, logits = fwd(params, frames, text_feature,
                                           audio_features)
    jax.block_until_ready((video_p, text_p, audio_p, logits))

    assert video_p.shape == (B, CFG.projection_dim)
    assert text_p.shape == (B, CFG.projection_dim)
    assert audio_p.shape == (B, CFG.projection_dim)
    assert logits.shape == (B, CFG.classifier_num_classes)
    assert all(bool(jnp.all(jnp.isfinite(t)))
               for t in (video_p, text_p, audio_p, logits))
    print("KERNEL_OK")
</pallas_src>

<mosaic_0001>
module attributes {stable_mosaic.version = 11 : i64} {
  func.func @_fused_kernel(%arg0: i32, %arg1: memref<8x3072xbf16, #tpu.memory_space<vmem>>, %arg2: memref<8x256xf32, #tpu.memory_space<vmem>>, %arg3: memref<8x128xf32, #tpu.memory_space<vmem>>, %arg4: memref<8x128xf32, #tpu.memory_space<vmem>>, %arg5: memref<256x256xbf16, #tpu.memory_space<vmem>>, %arg6: memref<256x384xbf16, #tpu.memory_space<vmem>>, %arg7: memref<3072x256xbf16, #tpu.memory_space<vmem>>, %arg8: memref<384x256xbf16, #tpu.memory_space<vmem>>, %arg9: memref<512x128xbf16, #tpu.memory_space<vmem>>, %arg10: memref<384x128xbf16, #tpu.memory_space<vmem>>, %arg11: memref<12x128xf32, #tpu.memory_space<vmem>>, %arg12: memref<384x256xbf16, #tpu.memory_space<vmem>>, %arg13: memref<256x128xbf16, #tpu.memory_space<vmem>>, %arg14: memref<8x384xf32, #tpu.memory_space<vmem>>, %arg15: memref<8x128xf32, #tpu.memory_space<vmem>>, %arg16: memref<8x128xf32, #tpu.memory_space<vmem>>, %arg17: memref<8x128xf32, #tpu.memory_space<vmem>>, %arg18: memref<8x128xf32, #tpu.memory_space<vmem>>, %arg19: memref<8x256xf32, #tpu.memory_space<vmem>>) attributes {dimension_semantics = [#tpu.dimension_semantics<arbitrary>], iteration_bounds = array<i64: 1>, scalar_prefetch = 0 : i64, scratch_operands = 1 : i64, tpu.core_type = #tpu.core_type<tc>, window_params = [{transform_indices = @transform_0, window_bounds = array<i64: 8, 3072>}, {pipeline_mode = #tpu.pipeline_mode<synchronous>, transform_indices = @transform_1, window_bounds = array<i64: 8, 256>}, {pipeline_mode = #tpu.pipeline_mode<synchronous>, transform_indices = @transform_2, window_bounds = array<i64: 8, 128>}, {pipeline_mode = #tpu.pipeline_mode<synchronous>, transform_indices = @transform_3, window_bounds = array<i64: 8, 128>}, {pipeline_mode = #tpu.pipeline_mode<synchronous>, transform_indices = @transform_4, window_bounds = array<i64: 256, 256>}, {pipeline_mode = #tpu.pipeline_mode<synchronous>, transform_indices = @transform_5, window_bounds = array<i64: 256, 384>}, {transform_indices = @transform_6, window_bounds = array<i64: 3072, 256>}, {pipeline_mode = #tpu.pipeline_mode<synchronous>, transform_indices = @transform_7, window_bounds = array<i64: 384, 256>}, {pipeline_mode = #tpu.pipeline_mode<synchronous>, transform_indices = @transform_8, window_bounds = array<i64: 512, 128>}, {pipeline_mode = #tpu.pipeline_mode<synchronous>, transform_indices = @transform_9, window_bounds = array<i64: 384, 128>}, {pipeline_mode = #tpu.pipeline_mode<synchronous>, transform_indices = @transform_10, window_bounds = array<i64: 12, 128>}, {pipeline_mode = #tpu.pipeline_mode<synchronous>, transform_indices = @transform_11, window_bounds = array<i64: 384, 256>}, {pipeline_mode = #tpu.pipeline_mode<synchronous>, transform_indices = @transform_12, window_bounds = array<i64: 256, 128>}, {pipeline_mode = #tpu.pipeline_mode<synchronous>, transform_indices = @transform_13, window_bounds = array<i64: 8, 384>}, {pipeline_mode = #tpu.pipeline_mode<synchronous>, transform_indices = @transform_14, window_bounds = array<i64: 8, 128>}, {pipeline_mode = #tpu.pipeline_mode<synchronous>, transform_indices = @transform_15, window_bounds = array<i64: 8, 128>}, {pipeline_mode = #tpu.pipeline_mode<synchronous>, transform_indices = @transform_16, window_bounds = array<i64: 8, 128>}, {pipeline_mode = #tpu.pipeline_mode<synchronous>, transform_indices = @transform_17, window_bounds = array<i64: 8, 128>}]} {
    %c0_i32 = arith.constant 0 : i32
    %0 = arith.cmpi eq, %arg0, %c0_i32 : i32
    %1 = arith.extui %0 : i1 to i32
    %c0_i32_0 = arith.constant 0 : i32
    %2 = arith.cmpi ne, %1, %c0_i32_0 : i32
    scf.if %2 {
      %c0_10 = arith.constant 0 : index
      %c0_11 = arith.constant 0 : index
      %12 = vector.load %arg2[%c0_10, %c0_11] : memref<8x256xf32, #tpu.memory_space<vmem>>, vector<8x256xf32>
      %c0_12 = arith.constant 0 : index
      %c0_13 = arith.constant 0 : index
      %13 = vector.load %arg5[%c0_12, %c0_13] : memref<256x256xbf16, #tpu.memory_space<vmem>>, vector<256x256xbf16>
      %14 = arith.truncf %12 : vector<8x256xf32> to vector<8x256xbf16>
      %cst_14 = arith.constant dense<0.000000e+00> : vector<8x256xf32>
      %15 = tpu.matmul %14, %13, %cst_14 {dimension_numbers = #tpu.dot_dimension_numbers<[1], [0], [0], [1], [0, 0, 1, 1], [], []>} : vector<8x256xbf16>, vector<256x256xbf16>, vector<8x256xf32> -> vector<8x256xf32>
      %c0_15 = arith.constant 0 : index
      %c0_16 = arith.constant 0 : index
      %16 = vector.load %arg14[%c0_15, %c0_16] : memref<8x384xf32, #tpu.memory_space<vmem>>, vector<1x256xf32>
      %17 = vector.broadcast %16 : vector<1x256xf32> to vector<8x256xf32>
      %18 = arith.addf %15, %17 : vector<8x256xf32>
      %cst_17 = arith.constant 0.000000e+00 : f32
      %19 = vector.broadcast %cst_17 : f32 to vector<8x256xf32>
      %20 = arith.cmpf oge, %18, %19 : vector<8x256xf32>
      %cst_18 = arith.constant 0.00999999977 : f32
      %21 = vector.broadcast %cst_18 : f32 to vector<8x256xf32>
      %22 = arith.mulf %21, %18 : vector<8x256xf32>
      %23 = arith.select %20, %18, %22 : vector<8x256xi1>, vector<8x256xf32>
      %c0_19 = arith.constant 0 : index
      %c0_20 = arith.constant 0 : index
      %24 = vector.load %arg6[%c0_19, %c0_20] : memref<256x384xbf16, #tpu.memory_space<vmem>>, vector<256x384xbf16>
      %25 = arith.truncf %23 : vector<8x256xf32> to vector<8x256xbf16>
      %cst_21 = arith.constant dense<0.000000e+00> : vector<8x384xf32>
      %26 = tpu.matmul %25, %24, %cst_21 {dimension_numbers = #tpu.dot_dimension_numbers<[1], [0], [0], [1], [0, 0, 1, 1], [], []>} : vector<8x256xbf16>, vector<256x384xbf16>, vector<8x384xf32> -> vector<8x384xf32>
      %c1 = arith.constant 1 : index
      %c0_22 = arith.constant 0 : index
      %27 = vector.load %arg14[%c1, %c0_22] : memref<8x384xf32, #tpu.memory_space<vmem>>, vector<1x384xf32>
      %28 = vector.broadcast %27 : vector<1x384xf32> to vector<8x384xf32>
      %29 = arith.addf %26, %28 : vector<8x384xf32>
      %c0_23 = arith.constant 0 : index
      %c0_24 = arith.constant 0 : index
      %30 = vector.load %arg8[%c0_23, %c0_24] : memref<384x256xbf16, #tpu.memory_space<vmem>>, vector<384x256xbf16>
      %31 = arith.truncf %29 : vector<8x384xf32> to vector<8x384xbf16>
      %cst_25 = arith.constant dense<0.000000e+00> : vector<8x256xf32>
      %32 = tpu.matmul %31, %30, %cst_25 {dimension_numbers = #tpu.dot_dimension_numbers<[1], [0], [0], [1], [0, 0, 1, 1], [], []>} : vector<8x384xbf16>, vector<384x256xbf16>, vector<8x256xf32> -> vector<8x256xf32>
      %c2 = arith.constant 2 : index
      %c0_26 = arith.constant 0 : index
      %33 = vector.load %arg14[%c2, %c0_26] : memref<8x384xf32, #tpu.memory_space<vmem>>, vector<1x256xf32>
      %34 = vector.broadcast %33 : vector<1x256xf32> to vector<8x256xf32>
      %35 = arith.addf %32, %34 : vector<8x256xf32>
      %c0_27 = arith.constant 0 : index
      %c0_28 = arith.constant 0 : index
      %36 = vector.load %arg19[%c0_27, %c0_28] : memref<8x256xf32, #tpu.memory_space<vmem>>, vector<8x256xf32>
      tpu.vector_store %arg19[%c0_27, %c0_28], %35 {strides = array<i32>} : memref<8x256xf32, #tpu.memory_space<vmem>>, vector<8x256xf32>,
      %c0_29 = arith.constant 0 : index
      %c0_30 = arith.constant 0 : index
      %37 = vector.load %arg3[%c0_29, %c0_30] : memref<8x128xf32, #tpu.memory_space<vmem>>, vector<8x128xf32>
      %c256 = arith.constant 256 : index
      %c0_31 = arith.constant 0 : index
      %38 = vector.load %arg9[%c256, %c0_31] : memref<512x128xbf16, #tpu.memory_space<vmem>>, vector<128x128xbf16>
      %c128 = arith.constant 128 : index
      %c0_32 = arith.constant 0 : index
      %39 = vector.load %arg10[%c128, %c0_32] : memref<384x128xbf16, #tpu.memory_space<vmem>>, vector<128x128xbf16>
      %c4 = arith.constant 4 : index
      %c0_33 = arith.constant 0 : index
      %40 = vector.load %arg11[%c4, %c0_33] : memref<12x128xf32, #tpu.memory_space<vmem>>, vector<1x128xf32>
      %c5 = arith.constant 5 : index
      %c0_34 = arith.constant 0 : index
      %41 = vector.load %arg11[%c5, %c0_34] : memref<12x128xf32, #tpu.memory_space<vmem>>, vector<1x128xf32>
      %c6 = arith.constant 6 : index
      %c0_35 = arith.constant 0 : index
      %42 = vector.load %arg11[%c6, %c0_35] : memref<12x128xf32, #tpu.memory_space<vmem>>, vector<1x128xf32>
      %c7 = arith.constant 7 : index
      %c0_36 = arith.constant 0 : index
      %43 = vector.load %arg11[%c7, %c0_36] : memref<12x128xf32, #tpu.memory_space<vmem>>, vector<1x128xf32>
      %44 = arith.truncf %37 : vector<8x128xf32> to vector<8x128xbf16>
      %cst_37 = arith.constant dense<0.000000e+00> : vector<8x128xf32>
      %45 = tpu.matmul %44, %38, %cst_37 {dimension_numbers = #tpu.dot_dimension_numbers<[1], [0], [0], [1], [0, 0, 1, 1], [], []>} : vector<8x128xbf16>, vector<128x128xbf16>, vector<8x128xf32> -> vector<8x128xf32>
      %46 = vector.broadcast %40 : vector<1x128xf32> to vector<8x128xf32>
      %47 = arith.addf %45, %46 : vector<8x128xf32>
      %cst_38 = arith.constant 5.000000e-01 : f32
      %48 = vector.broadcast %cst_38 : f32 to vector<8x128xf32>
      %49 = arith.mulf %48, %47 : vector<8x128xf32>
      %cst_39 = arith.constant 4.471500e-02 : f32
      %50 = vector.broadcast %cst_39 : f32 to vector<8x128xf32>
      %51 = arith.mulf %50, %47 : vector<8x128xf32>
      %52 = arith.mulf %51, %47 : vector<8x128xf32>
      %53 = arith.mulf %52, %47 : vector<8x128xf32>
      %54 = arith.addf %47, %53 : vector<8x128xf32>
      %cst_40 = arith.constant 0.797884583 : f32
      %55 = vector.broadcast %cst_40 : f32 to vector<8x128xf32>
      %56 = arith.mulf %55, %54 : vector<8x128xf32>
      %57 = math.tanh %56 : vector<8x128xf32>
      %cst_41 = arith.constant 1.000000e+00 : f32
      %58 = vector.broadcast %cst_41 : f32 to vector<8x128xf32>
      %59 = arith.addf %58, %57 : vector<8x128xf32>
      %60 = arith.mulf %49, %59 : vector<8x128xf32>
      %61 = arith.truncf %60 : vector<8x128xf32> to vector<8x128xbf16>
      %cst_42 = arith.constant dense<0.000000e+00> : vector<8x128xf32>
      %62 = tpu.matmul %61, %39, %cst_42 {dimension_numbers = #tpu.dot_dimension_numbers<[1], [0], [0], [1], [0, 0, 1, 1], [], []>} : vector<8x128xbf16>, vector<128x128xbf16>, vector<8x128xf32> -> vector<8x128xf32>
      %63 = vector.broadcast %41 : vector<1x128xf32> to vector<8x128xf32>
      %64 = arith.addf %62, %63 : vector<8x128xf32>
      %65 = arith.addf %64, %47 : vector<8x128xf32>
      %cst_43 = arith.constant dense<0.000000e+00> : vector<8xf32>
      %66 = vector.multi_reduction <add>, %65, %cst_43 [1] : vector<8x128xf32> to vector<8xf32>
      %67 = vector.shape_cast %66 : vector<8xf32> to vector<8x1xf32>
      %cst_44 = arith.constant 1.280000e+02 : f32
      %68 = vector.broadcast %cst_44 : f32 to vector<8x1xf32>
      %69 = arith.divf %67, %68 : vector<8x1xf32>
      %70 = vector.broadcast %69 : vector<8x1xf32> to vector<8x128xf32>
      %71 = arith.subf %65, %70 : vector<8x128xf32>
      %72 = arith.mulf %71, %71 : vector<8x128xf32>
      %cst_45 = arith.constant dense<0.000000e+00> : vector<8xf32>
      %73 = vector.multi_reduction <add>, %72, %cst_45 [1] : vector<8x128xf32> to vector<8xf32>
      %74 = vector.shape_cast %73 : vector<8xf32> to vector<8x1xf32>
      %cst_46 = arith.constant 1.280000e+02 : f32
      %75 = vector.broadcast %cst_46 : f32 to vector<8x1xf32>
      %76 = arith.divf %74, %75 : vector<8x1xf32>
      %77 = vector.broadcast %69 : vector<8x1xf32> to vector<8x128xf32>
      %78 = arith.subf %65, %77 : vector<8x128xf32>
      %cst_47 = arith.constant 9.99999974E-6 : f32
      %79 = vector.broadcast %cst_47 : f32 to vector<8x1xf32>
      %80 = arith.addf %76, %79 : vector<8x1xf32>
      %81 = math.rsqrt %80 : vector<8x1xf32>
      %82 = vector.broadcast %81 : vector<8x1xf32> to vector<8x128xf32>
      %83 = arith.mulf %78, %82 : vector<8x128xf32>
      %84 = vector.broadcast %42 : vector<1x128xf32> to vector<8x128xf32>
      %85 = arith.mulf %83, %84 : vector<8x128xf32>
      %86 = vector.broadcast %43 : vector<1x128xf32> to vector<8x128xf32>
      %87 = arith.addf %85, %86 : vector<8x128xf32>
      %c0_48 = arith.constant 0 : index
      %c0_49 = arith.constant 0 : index
      %88 = vector.load %arg16[%c0_48, %c0_49] : memref<8x128xf32, #tpu.memory_space<vmem>>, vector<8x128xf32>
      tpu.vector_store %arg16[%c0_48, %c0_49], %87 {strides = array<i32>} : memref<8x128xf32, #tpu.memory_space<vmem>>, vector<8x128xf32>,
      %c0_50 = arith.constant 0 : index
      %c0_51 = arith.constant 0 : index
      %89 = vector.load %arg4[%c0_50, %c0_51] : memref<8x128xf32, #tpu.memory_space<vmem>>, vector<8x128xf32>
      %c384 = arith.constant 384 : index
      %c0_52 = arith.constant 0 : index
      %90 = vector.load %arg9[%c384, %c0_52] : memref<512x128xbf16, #tpu.memory_space<vmem>>, vector<128x128xbf16>
      %c256_53 = arith.constant 256 : index
      %c0_54 = arith.constant 0 : index
      %91 = vector.load %arg10[%c256_53, %c0_54] : memref<384x128xbf16, #tpu.memory_space<vmem>>, vector<128x128xbf16>
      %c8 = arith.constant 8 : index
      %c0_55 = arith.constant 0 : index
      %92 = vector.load %arg11[%c8, %c0_55] : memref<12x128xf32, #tpu.memory_space<vmem>>, vector<1x128xf32>
      %c9 = arith.constant 9 : index
      %c0_56 = arith.constant 0 : index
      %93 = vector.load %arg11[%c9, %c0_56] : memref<12x128xf32, #tpu.memory_space<vmem>>, vector<1x128xf32>
      %c10 = arith.constant 10 : index
      %c0_57 = arith.constant 0 : index
      %94 = vector.load %arg11[%c10, %c0_57] : memref<12x128xf32, #tpu.memory_space<vmem>>, vector<1x128xf32>
      %c11 = arith.constant 11 : index
      %c0_58 = arith.constant 0 : index
      %95 = vector.load %arg11[%c11, %c0_58] : memref<12x128xf32, #tpu.memory_space<vmem>>, vector<1x128xf32>
      %96 = arith.truncf %89 : vector<8x128xf32> to vector<8x128xbf16>
      %cst_59 = arith.constant dense<0.000000e+00> : vector<8x128xf32>
      %97 = tpu.matmul %96, %90, %cst_59 {dimension_numbers = #tpu.dot_dimension_numbers<[1], [0], [0], [1], [0, 0, 1, 1], [], []>} : vector<8x128xbf16>, vector<128x128xbf16>, vector<8x128xf32> -> vector<8x128xf32>
      %98 = vector.broadcast %92 : vector<1x128xf32> to vector<8x128xf32>
      %99 = arith.addf %97, %98 : vector<8x128xf32>
      %cst_60 = arith.constant 5.000000e-01 : f32
      %100 = vector.broadcast %cst_60 : f32 to vector<8x128xf32>
      %101 = arith.mulf %100, %99 : vector<8x128xf32>
      %cst_61 = arith.constant 4.471500e-02 : f32
      %102 = vector.broadcast %cst_61 : f32 to vector<8x128xf32>
      %103 = arith.mulf %102, %99 : vector<8x128xf32>
      %104 = arith.mulf %103, %99 : vector<8x128xf32>
      %105 = arith.mulf %104, %99 : vector<8x128xf32>
      %106 = arith.addf %99, %105 : vector<8x128xf32>
      %cst_62 = arith.constant 0.797884583 : f32
      %107 = vector.broadcast %cst_62 : f32 to vector<8x128xf32>
      %108 = arith.mulf %107, %106 : vector<8x128xf32>
      %109 = math.tanh %108 : vector<8x128xf32>
      %cst_63 = arith.constant 1.000000e+00 : f32
      %110 = vector.broadcast %cst_63 : f32 to vector<8x128xf32>
      %111 = arith.addf %110, %109 : vector<8x128xf32>
      %112 = arith.mulf %101, %111 : vector<8x128xf32>
      %113 = arith.truncf %112 : vector<8x128xf32> to vector<8x128xbf16>
      %cst_64 = arith.constant dense<0.000000e+00> : vector<8x128xf32>
      %114 = tpu.matmul %113, %91, %cst_64 {dimension_numbers = #tpu.dot_dimension_numbers<[1], [0], [0], [1], [0, 0, 1, 1], [], []>} : vector<8x128xbf16>, vector<128x128xbf16>, vector<8x128xf32> -> vector<8x128xf32>
      %115 = vector.broadcast %93 : vector<1x128xf32> to vector<8x128xf32>
      %116 = arith.addf %114, %115 : vector<8x128xf32>
      %117 = arith.addf %116, %99 : vector<8x128xf32>
      %cst_65 = arith.constant dense<0.000000e+00> : vector<8xf32>
      %118 = vector.multi_reduction <add>, %117, %cst_65 [1] : vector<8x128xf32> to vector<8xf32>
      %119 = vector.shape_cast %118 : vector<8xf32> to vector<8x1xf32>
      %cst_66 = arith.constant 1.280000e+02 : f32
      %120 = vector.broadcast %cst_66 : f32 to vector<8x1xf32>
      %121 = arith.divf %119, %120 : vector<8x1xf32>
      %122 = vector.broadcast %121 : vector<8x1xf32> to vector<8x128xf32>
      %123 = arith.subf %117, %122 : vector<8x128xf32>
      %124 = arith.mulf %123, %123 : vector<8x128xf32>
      %cst_67 = arith.constant dense<0.000000e+00> : vector<8xf32>
      %125 = vector.multi_reduction <add>, %124, %cst_67 [1] : vector<8x128xf32> to vector<8xf32>
      %126 = vector.shape_cast %125 : vector<8xf32> to vector<8x1xf32>
      %cst_68 = arith.constant 1.280000e+02 : f32
      %127 = vector.broadcast %cst_68 : f32 to vector<8x1xf32>
      %128 = arith.divf %126, %127 : vector<8x1xf32>
      %129 = vector.broadcast %121 : vector<8x1xf32> to vector<8x128xf32>
      %130 = arith.subf %117, %129 : vector<8x128xf32>
      %cst_69 = arith.constant 9.99999974E-6 : f32
      %131 = vector.broadcast %cst_69 : f32 to vector<8x1xf32>
      %132 = arith.addf %128, %131 : vector<8x1xf32>
      %133 = math.rsqrt %132 : vector<8x1xf32>
      %134 = vector.broadcast %133 : vector<8x1xf32> to vector<8x128xf32>
      %135 = arith.mulf %130, %134 : vector<8x128xf32>
      %136 = vector.broadcast %94 : vector<1x128xf32> to vector<8x128xf32>
      %137 = arith.mulf %135, %136 : vector<8x128xf32>
      %138 = vector.broadcast %95 : vector<1x128xf32> to vector<8x128xf32>
      %139 = arith.addf %137, %138 : vector<8x128xf32>
      %c0_70 = arith.constant 0 : index
      %c0_71 = arith.constant 0 : index
      %140 = vector.load %arg17[%c0_70, %c0_71] : memref<8x128xf32, #tpu.memory_space<vmem>>, vector<8x128xf32>
      tpu.vector_store %arg17[%c0_70, %c0_71], %139 {strides = array<i32>} : memref<8x128xf32, #tpu.memory_space<vmem>>, vector<8x128xf32>,
    } else {
    }
    %c0 = arith.constant 0 : index
    %c0_1 = arith.constant 0 : index
    %3 = vector.load %arg19[%c0, %c0_1] : memref<8x256xf32, #tpu.memory_space<vmem>>, vector<8x256xf32>
    %c0_2 = arith.constant 0 : index
    %c0_3 = arith.constant 0 : index
    %4 = vector.load %arg1[%c0_2, %c0_3] : memref<8x3072xbf16, #tpu.memory_space<vmem>>, vector<8x3072xbf16>
    %c0_4 = arith.constant 0 : index
    %c0_5 = arith.constant 0 : index
    %5 = vector.load %arg7[%c0_4, %c0_5] : memref<3072x256xbf16, #tpu.memory_space<vmem>>, vector<3072x256xbf16>
    %cst = arith.constant dense<0.000000e+00> : vector<8x256xf32>
    %6 = tpu.matmul %4, %5, %cst {dimension_numbers = #tpu.dot_dimension_numbers<[1], [0], [0], [1], [0, 0, 1, 1], [], []>} : vector<8x3072xbf16>, vector<3072x256xbf16>, vector<8x256xf32> -> vector<8x256xf32>
    %7 = arith.addf %3, %6 : vector<8x256xf32>
    %c0_6 = arith.constant 0 : index
    %c0_7 = arith.constant 0 : index
    %8 = vector.load %arg19[%c0_6, %c0_7] : memref<8x256xf32, #tpu.memory_space<vmem>>, vector<8x256xf32>
    tpu.vector_store %arg19[%c0_6, %c0_7], %7 {strides = array<i32>} : memref<8x256xf32, #tpu.memory_space<vmem>>, vector<8x256xf32>,
    %c0_i32_8 = arith.constant 0 : i32
    %9 = arith.cmpi eq, %arg0, %c0_i32_8 : i32
    %10 = arith.extui %9 : i1 to i32
    %c0_i32_9 = arith.constant 0 : i32
    %11 = arith.cmpi ne, %10, %c0_i32_9 : i32
    scf.if %11 {
      %c0_10 = arith.constant 0 : index
      %c0_11 = arith.constant 0 : index
      %12 = vector.load %arg19[%c0_10, %c0_11] : memref<8x256xf32, #tpu.memory_space<vmem>>, vector<8x256xf32>
      %cst_12 = arith.constant 0.000000e+00 : f32
      %13 = vector.broadcast %cst_12 : f32 to vector<8x256xf32>
      %14 = arith.cmpf oge, %12, %13 : vector<8x256xf32>
      %cst_13 = arith.constant 0.00999999977 : f32
      %15 = vector.broadcast %cst_13 : f32 to vector<8x256xf32>
      %16 = arith.mulf %15, %12 : vector<8x256xf32>
      %17 = arith.select %14, %12, %16 : vector<8x256xi1>, vector<8x256xf32>
      %c0_14 = arith.constant 0 : index
      %c0_15 = arith.constant 0 : index
      %18 = vector.load %arg9[%c0_14, %c0_15] : memref<512x128xbf16, #tpu.memory_space<vmem>>, vector<256x128xbf16>
      %c0_16 = arith.constant 0 : index
      %c0_17 = arith.constant 0 : index
      %19 = vector.load %arg10[%c0_16, %c0_17] : memref<384x128xbf16, #tpu.memory_space<vmem>>, vector<128x128xbf16>
      %c0_18 = arith.constant 0 : index
      %c0_19 = arith.constant 0 : index
      %20 = vector.load %arg11[%c0_18, %c0_19] : memref<12x128xf32, #tpu.memory_space<vmem>>, vector<1x128xf32>
      %c1 = arith.constant 1 : index
      %c0_20 = arith.constant 0 : index
      %21 = vector.load %arg11[%c1, %c0_20] : memref<12x128xf32, #tpu.memory_space<vmem>>, vector<1x128xf32>
      %c2 = arith.constant 2 : index
      %c0_21 = arith.constant 0 : index
      %22 = vector.load %arg11[%c2, %c0_21] : memref<12x128xf32, #tpu.memory_space<vmem>>, vector<1x128xf32>
      %c3 = arith.constant 3 : index
      %c0_22 = arith.constant 0 : index
      %23 = vector.load %arg11[%c3, %c0_22] : memref<12x128xf32, #tpu.memory_space<vmem>>, vector<1x128xf32>
      %24 = arith.truncf %17 : vector<8x256xf32> to vector<8x256xbf16>
      %cst_23 = arith.constant dense<0.000000e+00> : vector<8x128xf32>
      %25 = tpu.matmul %24, %18, %cst_23 {dimension_numbers = #tpu.dot_dimension_numbers<[1], [0], [0], [1], [0, 0, 1, 1], [], []>} : vector<8x256xbf16>, vector<256x128xbf16>, vector<8x128xf32> -> vector<8x128xf32>
      %26 = vector.broadcast %20 : vector<1x128xf32> to vector<8x128xf32>
      %27 = arith.addf %25, %26 : vector<8x128xf32>
      %cst_24 = arith.constant 5.000000e-01 : f32
      %28 = vector.broadcast %cst_24 : f32 to vector<8x128xf32>
      %29 = arith.mulf %28, %27 : vector<8x128xf32>
      %cst_25 = arith.constant 4.471500e-02 : f32
      %30 = vector.broadcast %cst_25 : f32 to vector<8x128xf32>
      %31 = arith.mulf %30, %27 : vector<8x128xf32>
      %32 = arith.mulf %31, %27 : vector<8x128xf32>
      %33 = arith.mulf %32, %27 : vector<8x128xf32>
      %34 = arith.addf %27, %33 : vector<8x128xf32>
      %cst_26 = arith.constant 0.797884583 : f32
      %35 = vector.broadcast %cst_26 : f32 to vector<8x128xf32>
      %36 = arith.mulf %35, %34 : vector<8x128xf32>
      %37 = math.tanh %36 : vector<8x128xf32>
      %cst_27 = arith.constant 1.000000e+00 : f32
      %38 = vector.broadcast %cst_27 : f32 to vector<8x128xf32>
      %39 = arith.addf %38, %37 : vector<8x128xf32>
      %40 = arith.mulf %29, %39 : vector<8x128xf32>
      %41 = arith.truncf %40 : vector<8x128xf32> to vector<8x128xbf16>
      %cst_28 = arith.constant dense<0.000000e+00> : vector<8x128xf32>
      %42 = tpu.matmul %41, %19, %cst_28 {dimension_numbers = #tpu.dot_dimension_numbers<[1], [0], [0], [1], [0, 0, 1, 1], [], []>} : vector<8x128xbf16>, vector<128x128xbf16>, vector<8x128xf32> -> vector<8x128xf32>
      %43 = vector.broadcast %21 : vector<1x128xf32> to vector<8x128xf32>
      %44 = arith.addf %42, %43 : vector<8x128xf32>
      %45 = arith.addf %44, %27 : vector<8x128xf32>
      %cst_29 = arith.constant dense<0.000000e+00> : vector<8xf32>
      %46 = vector.multi_reduction <add>, %45, %cst_29 [1] : vector<8x128xf32> to vector<8xf32>
      %47 = vector.shape_cast %46 : vector<8xf32> to vector<8x1xf32>
      %cst_30 = arith.constant 1.280000e+02 : f32
      %48 = vector.broadcast %cst_30 : f32 to vector<8x1xf32>
      %49 = arith.divf %47, %48 : vector<8x1xf32>
      %50 = vector.broadcast %49 : vector<8x1xf32> to vector<8x128xf32>
      %51 = arith.subf %45, %50 : vector<8x128xf32>
      %52 = arith.mulf %51, %51 : vector<8x128xf32>
      %cst_31 = arith.constant dense<0.000000e+00> : vector<8xf32>
      %53 = vector.multi_reduction <add>, %52, %cst_31 [1] : vector<8x128xf32> to vector<8xf32>
      %54 = vector.shape_cast %53 : vector<8xf32> to vector<8x1xf32>
      %cst_32 = arith.constant 1.280000e+02 : f32
      %55 = vector.broadcast %cst_32 : f32 to vector<8x1xf32>
      %56 = arith.divf %54, %55 : vector<8x1xf32>
      %57 = vector.broadcast %49 : vector<8x1xf32> to vector<8x128xf32>
      %58 = arith.subf %45, %57 : vector<8x128xf32>
      %cst_33 = arith.constant 9.99999974E-6 : f32
      %59 = vector.broadcast %cst_33 : f32 to vector<8x1xf32>
      %60 = arith.addf %56, %59 : vector<8x1xf32>
      %61 = math.rsqrt %60 : vector<8x1xf32>
      %62 = vector.broadcast %61 : vector<8x1xf32> to vector<8x128xf32>
      %63 = arith.mulf %58, %62 : vector<8x128xf32>
      %64 = vector.broadcast %22 : vector<1x128xf32> to vector<8x128xf32>
      %65 = arith.mulf %63, %64 : vector<8x128xf32>
      %66 = vector.broadcast %23 : vector<1x128xf32> to vector<8x128xf32>
      %67 = arith.addf %65, %66 : vector<8x128xf32>
      %c0_34 = arith.constant 0 : index
      %c0_35 = arith.constant 0 : index
      %68 = vector.load %arg15[%c0_34, %c0_35] : memref<8x128xf32, #tpu.memory_space<vmem>>, vector<8x128xf32>
      tpu.vector_store %arg15[%c0_34, %c0_35], %67 {strides = array<i32>} : memref<8x128xf32, #tpu.memory_space<vmem>>, vector<8x128xf32>,
      %c0_36 = arith.constant 0 : index
      %c0_37 = arith.constant 0 : index
      %69 = vector.load %arg16[%c0_36, %c0_37] : memref<8x128xf32, #tpu.memory_space<vmem>>, vector<8x128xf32>
      %c0_38 = arith.constant 0 : index
      %c0_39 = arith.constant 0 : index
      %70 = vector.load %arg17[%c0_38, %c0_39] : memref<8x128xf32, #tpu.memory_space<vmem>>, vector<8x128xf32>
      %c0_40 = arith.constant 0 : index
      %c0_41 = arith.constant 0 : index
      %71 = vector.load %arg12[%c0_40, %c0_41] : memref<384x256xbf16, #tpu.memory_space<vmem>>, vector<128x256xbf16>
      %72 = arith.truncf %67 : vector<8x128xf32> to vector<8x128xbf16>
      %cst_42 = arith.constant dense<0.000000e+00> : vector<8x256xf32>
      %73 = tpu.matmul %72, %71, %cst_42 {dimension_numbers = #tpu.dot_dimension_numbers<[1], [0], [0], [1], [0, 0, 1, 1], [], []>} : vector<8x128xbf16>, vector<128x256xbf16>, vector<8x256xf32> -> vector<8x256xf32>
      %c128 = arith.constant 128 : index
      %c0_43 = arith.constant 0 : index
      %74 = vector.load %arg12[%c128, %c0_43] : memref<384x256xbf16, #tpu.memory_space<vmem>>, vector<128x256xbf16>
      %75 = arith.truncf %69 : vector<8x128xf32> to vector<8x128xbf16>
      %cst_44 = arith.constant dense<0.000000e+00> : vector<8x256xf32>
      %76 = tpu.matmul %75, %74, %cst_44 {dimension_numbers = #tpu.dot_dimension_numbers<[1], [0], [0], [1], [0, 0, 1, 1], [], []>} : vector<8x128xbf16>, vector<128x256xbf16>, vector<8x256xf32> -> vector<8x256xf32>
      %77 = arith.addf %73, %76 : vector<8x256xf32>
      %c256 = arith.constant 256 : index
      %c0_45 = arith.constant 0 : index
      %78 = vector.load %arg12[%c256, %c0_45] : memref<384x256xbf16, #tpu.memory_space<vmem>>, vector<128x256xbf16>
      %79 = arith.truncf %70 : vector<8x128xf32> to vector<8x128xbf16>
      %cst_46 = arith.constant dense<0.000000e+00> : vector<8x256xf32>
      %80 = tpu.matmul %79, %78, %cst_46 {dimension_numbers = #tpu.dot_dimension_numbers<[1], [0], [0], [1], [0, 0, 1, 1], [], []>} : vector<8x128xbf16>, vector<128x256xbf16>, vector<8x256xf32> -> vector<8x256xf32>
      %81 = arith.addf %77, %80 : vector<8x256xf32>
      %c3_47 = arith.constant 3 : index
      %c0_48 = arith.constant 0 : index
      %82 = vector.load %arg14[%c3_47, %c0_48] : memref<8x384xf32, #tpu.memory_space<vmem>>, vector<1x256xf32>
      %83 = vector.broadcast %82 : vector<1x256xf32> to vector<8x256xf32>
      %84 = arith.addf %81, %83 : vector<8x256xf32>
      %cst_49 = arith.constant 0.000000e+00 : f32
      %85 = vector.broadcast %cst_49 : f32 to vector<8x256xf32>
      %86 = arith.cmpf oge, %84, %85 : vector<8x256xf32>
      %cst_50 = arith.constant 0.00999999977 : f32
      %87 = vector.broadcast %cst_50 : f32 to vector<8x256xf32>
      %88 = arith.mulf %87, %84 : vector<8x256xf32>
      %89 = arith.select %86, %84, %88 : vector<8x256xi1>, vector<8x256xf32>
      %c0_51 = arith.constant 0 : index
      %c0_52 = arith.constant 0 : index
      %90 = vector.load %arg13[%c0_51, %c0_52] : memref<256x128xbf16, #tpu.memory_space<vmem>>, vector<256x128xbf16>
      %91 = arith.truncf %89 : vector<8x256xf32> to vector<8x256xbf16>
      %cst_53 = arith.constant dense<0.000000e+00> : vector<8x128xf32>
      %92 = tpu.matmul %91, %90, %cst_53 {dimension_numbers = #tpu.dot_dimension_numbers<[1], [0], [0], [1], [0, 0, 1, 1], [], []>} : vector<8x256xbf16>, vector<256x128xbf16>, vector<8x128xf32> -> vector<8x128xf32>
      %c4 = arith.constant 4 : index
      %c0_54 = arith.constant 0 : index
      %93 = vector.load %arg14[%c4, %c0_54] : memref<8x384xf32, #tpu.memory_space<vmem>>, vector<1x128xf32>
      %94 = vector.broadcast %93 : vector<1x128xf32> to vector<8x128xf32>
      %95 = arith.addf %92, %94 : vector<8x128xf32>
      %c0_55 = arith.constant 0 : index
      %c0_56 = arith.constant 0 : index
      %96 = vector.load %arg18[%c0_55, %c0_56] : memref<8x128xf32, #tpu.memory_space<vmem>>, vector<8x128xf32>
      tpu.vector_store %arg18[%c0_55, %c0_56], %95 {strides = array<i32>} : memref<8x128xf32, #tpu.memory_space<vmem>>, vector<8x128xf32>,
    } else {
    }
    return
  }
  func.func @transform_0(%arg0: i32) -> (i32, i32) {
    %c0_i32 = arith.constant 0 : i32
    %c0_i32_0 = arith.constant 0 : i32
    return %c0_i32, %arg0 : i32, i32
  }
  func.func @transform_1(%arg0: i32) -> (i32, i32) {
    %c0_i32 = arith.constant 0 : i32
    %c0_i32_0 = arith.constant 0 : i32
    %c0_i32_1 = arith.constant 0 : i32
    return %c0_i32, %c0_i32_0 : i32, i32
  }
  func.func @transform_2(%arg0: i32) -> (i32, i32) {
    %c0_i32 = arith.constant 0 : i32
    %c0_i32_0 = arith.constant 0 : i32
    %c0_i32_1 = arith.constant 0 : i32
    return %c0_i32, %c0_i32_0 : i32, i32
  }
  func.func @transform_3(%arg0: i32) -> (i32, i32) {
    %c0_i32 = arith.constant 0 : i32
    %c0_i32_0 = arith.constant 0 : i32
    %c0_i32_1 = arith.constant 0 : i32
    return %c0_i32, %c0_i32_0 : i32, i32
  }
  func.func @transform_4(%arg0: i32) -> (i32, i32) {
    %c0_i32 = arith.constant 0 : i32
    %c0_i32_0 = arith.constant 0 : i32
    %c0_i32_1 = arith.constant 0 : i32
    return %c0_i32, %c0_i32_0 : i32, i32
  }
  func.func @transform_5(%arg0: i32) -> (i32, i32) {
    %c0_i32 = arith.constant 0 : i32
    %c0_i32_0 = arith.constant 0 : i32
    %c0_i32_1 = arith.constant 0 : i32
    return %c0_i32, %c0_i32_0 : i32, i32
  }
  func.func @transform_6(%arg0: i32) -> (i32, i32) {
    %c0_i32 = arith.constant 0 : i32
    %c0_i32_0 = arith.constant 0 : i32
    return %arg0, %c0_i32 : i32, i32
  }
  func.func @transform_7(%arg0: i32) -> (i32, i32) {
    %c0_i32 = arith.constant 0 : i32
    %c0_i32_0 = arith.constant 0 : i32
    %c0_i32_1 = arith.constant 0 : i32
    return %c0_i32, %c0_i32_0 : i32, i32
  }
  func.func @transform_8(%arg0: i32) -> (i32, i32) {
    %c0_i32 = arith.constant 0 : i32
    %c0_i32_0 = arith.constant 0 : i32
    %c0_i32_1 = arith.constant 0 : i32
    return %c0_i32, %c0_i32_0 : i32, i32
  }
  func.func @transform_9(%arg0: i32) -> (i32, i32) {
    %c0_i32 = arith.constant 0 : i32
    %c0_i32_0 = arith.constant 0 : i32
    %c0_i32_1 = arith.constant 0 : i32
    return %c0_i32, %c0_i32_0 : i32, i32
  }
  func.func @transform_10(%arg0: i32) -> (i32, i32) {
    %c0_i32 = arith.constant 0 : i32
    %c0_i32_0 = arith.constant 0 : i32
    %c0_i32_1 = arith.constant 0 : i32
    return %c0_i32, %c0_i32_0 : i32, i32
  }
  func.func @transform_11(%arg0: i32) -> (i32, i32) {
    %c0_i32 = arith.constant 0 : i32
    %c0_i32_0 = arith.constant 0 : i32
    %c0_i32_1 = arith.constant 0 : i32
    return %c0_i32, %c0_i32_0 : i32, i32
  }
  func.func @transform_12(%arg0: i32) -> (i32, i32) {
    %c0_i32 = arith.constant 0 : i32
    %c0_i32_0 = arith.constant 0 : i32
    %c0_i32_1 = arith.constant 0 : i32
    return %c0_i32, %c0_i32_0 : i32, i32
  }
  func.func @transform_13(%arg0: i32) -> (i32, i32) {
    %c0_i32 = arith.constant 0 : i32
    %c0_i32_0 = arith.constant 0 : i32
    %c0_i32_1 = arith.constant 0 : i32
    return %c0_i32, %c0_i32_0 : i32, i32
  }
  func.func @transform_14(%arg0: i32) -> (i32, i32) {
    %c0_i32 = arith.constant 0 : i32
    %c0_i32_0 = arith.constant 0 : i32
    %c0_i32_1 = arith.constant 0 : i32
    return %c0_i32, %c0_i32_0 : i32, i32
  }
  func.func @transform_15(%arg0: i32) -> (i32, i32) {
    %c0_i32 = arith.constant 0 : i32
    %c0_i32_0 = arith.constant 0 : i32
    %c0_i32_1 = arith.constant 0 : i32
    return %c0_i32, %c0_i32_0 : i32, i32
  }
  func.func @transform_16(%arg0: i32) -> (i32, i32) {
    %c0_i32 = arith.constant 0 : i32
    %c0_i32_0 = arith.constant 0 : i32
    %c0_i32_1 = arith.constant 0 : i32
    return %c0_i32, %c0_i32_0 : i32, i32
  }
  func.func @transform_17(%arg0: i32) -> (i32, i32) {
    %c0_i32 = arith.constant 0 : i32
    %c0_i32_0 = arith.constant 0 : i32
    %c0_i32_1 = arith.constant 0 : i32
    return %c0_i32, %c0_i32_0 : i32, i32
  }
}

</mosaic_0001>

<bundles_post_ra>
// kernel: multimodel_forward.1
= control target key start
LH: loop header
LB: loop body
LE: loop exit
PB: predicated region body
PF: predicated region fallthrough
CT: control target
= control target key end

     0   :  { %s8278_s0 = inlined_call_operand.vmem [shape: bf16[8,3072], index: 0, kind: input, shape index: {}]   ;;  %s8279_s1 = inlined_call_operand.vmem [shape: f32[8,256], index: 1, kind: input, shape index: {}]   ;;  %s8280_s2 = inlined_call_operand.vmem [shape: f32[8,128], index: 2, kind: input, shape index: {}]   ;;  %s8281_s3 = inlined_call_operand.vmem [shape: f32[8,128], index: 3, kind: input, shape index: {}]   ;;  %s8282_s4 = inlined_call_operand.hbm [shape: bf16[256,256], index: 4, kind: input, shape index: {}]   ;;  %s8283_s5 = inlined_call_operand.hbm [shape: bf16[256,384], index: 5, kind: input, shape index: {}]   ;;  %s8284_s6 = inlined_call_operand.hbm [shape: bf16[3072,256], index: 6, kind: input, shape index: {}]   ;;  %s8285_s7 = inlined_call_operand.hbm [shape: bf16[384,256], index: 7, kind: input, shape index: {}]   ;;  %s8286_s8 = inlined_call_operand.hbm [shape: bf16[512,128], index: 8, kind: input, shape index: {}]   ;;  %s8287_s9 = inlined_call_operand.hbm [shape: bf16[384,128], index: 9, kind: input, shape index: {}]   ;;  %s8288_s10 = inlined_call_operand.hbm [shape: f32[12,128], index: 10, kind: input, shape index: {}]   ;;  %s8289_s11 = inlined_call_operand.hbm [shape: bf16[384,256], index: 11, kind: input, shape index: {}]   ;;  %s8290_s12 = inlined_call_operand.hbm [shape: bf16[256,128], index: 12, kind: input, shape index: {}]   ;;  %s8291_s13 = inlined_call_operand.hbm [shape: f32[8,384], index: 13, kind: input, shape index: {}]   ;;  %s8292_s14 = inlined_call_operand.vmem [shape: f32[8,128], index: 14, kind: output, shape index: {0}]   ;;  %s8293_s15 = inlined_call_operand.vmem [shape: f32[8,128], index: 15, kind: output, shape index: {1}]   ;;  %s8294_s16 = inlined_call_operand.vmem [shape: f32[8,128], index: 16, kind: output, shape index: {2}]   ;;  %s8295_s17 = inlined_call_operand.vmem [shape: f32[8,128], index: 17, kind: output, shape index: {3}]  }
   0x1   :  { %8298 = sst [smem:[#allocation25_spill]] %s8278_s0 }
   0x2   :  { %8299 = sst [smem:[#allocation26_spill]] %s8279_s1 }
   0x3   :  { %23 = vsyncpa [#allocation4], 0 }
   0x4   :  { %24 = vsyncpa [#allocation6], 0 }
   0x5   :  { %25 = vsyncpa [#allocation9], 0 }
   0x6   :  { %26 = vsyncpa [#allocation12], 0 }
   0x7   :  { %27 = vsyncpa [#allocation15], 0 }
   0x8   :  { %28 = vsyncpa [#allocation18], 0  ;;  %s7749_s24 = smov [#allocation5]   ;;  %s7517_s28 = scalar_lea.hbm %s8283_s5, 6144 }
   0x9   :  { %s54_s25 = sshll.u32 %s7749_s24, 4  ;;  %p7518_p0 = scmp.ne.s32.totalorder %s8283_s5, %s7517_s28  ;;  %s55_s25 = int_to_ptr.vmem [resolvable:$true] %s54_s25 }
   0xa   :  { %p7521_p1 = scmp.lt.u32.totalorder %s7517_s28, %s8283_s5 }
   0xc   :  { %p7523_p2 = pnand %p7521_p1, %p7518_p0 }
   0xe   :  { %7526 = shalt.err (!%p7523_p2)
}
   0xf   :  { %s7527_s19 = scalar_lea.vmem %s55_s25, 6144  ;;  %p7532_p4 = scmp.lt.s32.totalorder %s55_s25, %s55_s25 }
  0x10   :  { %p7528_p3 = scmp.ne.s32.totalorder %s55_s25, %s7527_s19  ;;  %p7533_p5 = scmp.lt.s32.totalorder %s7527_s19, %s7527_s19 }
  0x12   :  { %p7534_p6 = por %p7533_p5, %p7532_p4 }
  0x14   :  { %p7535_p7 = pnand %p7534_p6, %p7528_p3 }
  0x16   :  { %7538 = shalt.err (!%p7535_p7)
}
  0x17   :  { %s7750_s1 = smov 192   ;;  %s7751_s20 = smov 12  }
  0x18   :  { %60 = dma.hbm_to_vmem [thread:$0]  %s8283_s5, 6144, %s55_s25, [#allocation6], %s7750_s1, %s7750_s1, %s7751_s20  }
  0x19   :  { %s7752_s23 = smov [#allocation8]   ;;  %s7539_s28 = scalar_lea.hbm %s8285_s7, 6144 }
  0x1a   :  { %s78_s24 = sshll.u32 %s7752_s23, 4  ;;  %p7540_p8 = scmp.ne.s32.totalorder %s8285_s7, %s7539_s28  ;;  %s79_s24 = int_to_ptr.vmem [resolvable:$true] %s78_s24 }
  0x1b   :  { %p7543_p9 = scmp.lt.u32.totalorder %s7539_s28, %s8285_s7 }
  0x1d   :  { %p7545_p10 = pnand %p7543_p9, %p7540_p8 }
  0x1f   :  { %7548 = shalt.err (!%p7545_p10)
}
  0x20   :  { %s7549_s19 = scalar_lea.vmem %s79_s24, 6144  ;;  %p7554_p12 = scmp.lt.s32.totalorder %s79_s24, %s79_s24 }
  0x21   :  { %p7550_p11 = scmp.ne.s32.totalorder %s79_s24, %s7549_s19  ;;  %p7555_p13 = scmp.lt.s32.totalorder %s7549_s19, %s7549_s19 }
  0x23   :  { %p7556_p0 = por %p7555_p13, %p7554_p12 }
  0x25   :  { %p7557_p1 = pnand %p7556_p0, %p7550_p11 }
  0x27   :  { %7560 = shalt.err (!%p7557_p1)
}
  0x28   :  { %s7753_s5 = smov 128   ;;  %s7754_s25 = smov 8  }
  0x29   :  { %84 = dma.hbm_to_vmem [thread:$0]  %s8285_s7, 6144, %s79_s24, [#allocation9], %s7753_s5, %s7753_s5, %s7754_s25  }
  0x2a   :  { %s7755_s21 = smov [#allocation11]   ;;  %s7756_s23 = smov [#allocation14]  }
  0x2b   :  { %s102_s22 = sshll.u32 %s7755_s21, 4  ;;  %s126_s26 = sshll.u32 %s7756_s23, 4  ;;  %s103_s22 = int_to_ptr.vmem [resolvable:$true] %s102_s22  ;;  %s7885_s26 = int_to_ptr.vmem [resolvable:$true] %s126_s26 }
  0x2c   :  { %s7561_s29 = scalar_lea.hbm %s8287_s9, 3072 }
  0x2d   :  { %p7562_p2 = scmp.ne.s32.totalorder %s8287_s9, %s7561_s29  ;;  %p7565_p3 = scmp.lt.u32.totalorder %s7561_s29, %s8287_s9 }
  0x2f   :  { %p7567_p4 = pnand %p7565_p3, %p7562_p2 }
  0x31   :  { %7570 = shalt.err (!%p7567_p4)
}
  0x32   :  { %s7571_s7 = scalar_lea.vmem %s103_s22, 3072  ;;  %p7576_p6 = scmp.lt.s32.totalorder %s103_s22, %s103_s22 }
  0x33   :  { %p7572_p5 = scmp.ne.s32.totalorder %s103_s22, %s7571_s7  ;;  %p7577_p7 = scmp.lt.s32.totalorder %s7571_s7, %s7571_s7 }
  0x35   :  { %p7578_p8 = por %p7577_p7, %p7576_p6 }
  0x37   :  { %p7579_p9 = pnand %p7578_p8, %p7572_p5 }
  0x39   :  { %7582 = shalt.err (!%p7579_p9)
}
  0x3a   :  { %s7757_s24 = smov 64   ;;  %s7758_s1 = smov 4  }
  0x3b   :  { %108 = dma.hbm_to_vmem [thread:$0]  %s8287_s9, 3072, %s103_s22, [#allocation12], %s7757_s24, %s7757_s24, %s7758_s1  }
  0x3c   :  { %s7583_s28 = scalar_lea.hbm %s8289_s11, 6144 }
  0x3d   :  { %p7584_p10 = scmp.ne.s32.totalorder %s8289_s11, %s7583_s28  ;;  %p7587_p11 = scmp.lt.u32.totalorder %s7583_s28, %s8289_s11 }
  0x3f   :  { %p7589_p12 = pnand %p7587_p11, %p7584_p10 }
  0x41   :  { %7592 = shalt.err (!%p7589_p12)
}
  0x42   :  { %s7593_s19 = scalar_lea.vmem %s7885_s26, 6144  ;;  %p7598_p0 = scmp.lt.s32.totalorder %s7885_s26, %s7885_s26 }
  0x43   :  { %p7594_p13 = scmp.ne.s32.totalorder %s7885_s26, %s7593_s19  ;;  %p7599_p1 = scmp.lt.s32.totalorder %s7593_s19, %s7593_s19 }
  0x45   :  { %p7600_p2 = por %p7599_p1, %p7598_p0 }
  0x47   :  { %p7601_p3 = pnand %p7600_p2, %p7594_p13 }
  0x49   :  { %7604 = shalt.err (!%p7601_p3)
}
  0x4a   :  { %132 = dma.hbm_to_vmem [thread:$0]  %s8289_s11, 6144, %s7885_s26, [#allocation15], %s7753_s5, %s7753_s5, %s7754_s25  }
  0x4b   :  { %s7759_s7 = smov [#allocation3]   ;;  %s7760_s21 = smov [#allocation7]  }
  0x4c   :  { %s42_s20 = sshll.u32 %s7759_s7, 4  ;;  %s66_s23 = sshll.u32 %s7760_s21, 4  ;;  %s43_s20 = int_to_ptr.vmem [resolvable:$true] %s42_s20  ;;  %s7922_s23 = int_to_ptr.vmem [resolvable:$true] %s66_s23 }
  0x4d   :  { %s7605_s29 = scalar_lea.hbm %s8282_s4, 4096 }
  0x4e   :  { %p7606_p4 = scmp.ne.s32.totalorder %s8282_s4, %s7605_s29  ;;  %p7609_p5 = scmp.lt.u32.totalorder %s7605_s29, %s8282_s4 }
  0x50   :  { %p7611_p6 = pnand %p7609_p5, %p7606_p4 }
  0x52   :  { %7614 = shalt.err (!%p7611_p6)
}
  0x53   :  { %s7615_s11 = scalar_lea.vmem %s43_s20, 4096  ;;  %p7620_p8 = scmp.lt.s32.totalorder %s43_s20, %s43_s20 }
  0x54   :  { %p7616_p7 = scmp.ne.s32.totalorder %s43_s20, %s7615_s11  ;;  %p7621_p9 = scmp.lt.s32.totalorder %s7615_s11, %s7615_s11 }
  0x56   :  { %p7622_p10 = por %p7621_p9, %p7620_p8 }
  0x58   :  { %p7623_p11 = pnand %p7622_p10, %p7616_p7 }
  0x5a   :  { %7626 = shalt.err (!%p7623_p11)
}
  0x5b   :  { %48 = dma.hbm_to_vmem [thread:$0]  %s8282_s4, 4096, %s43_s20, [#allocation4], %s7753_s5, %s7753_s5, %s7754_s25  }
  0x5c   :  { %s7627_s21 = scalar_lea.hbm %s8284_s6, 49152 }
  0x5d   :  { %p7628_p12 = scmp.ne.s32.totalorder %s8284_s6, %s7627_s21  ;;  %p7631_p13 = scmp.lt.u32.totalorder %s7627_s21, %s8284_s6 }
  0x5f   :  { %p7633_p0 = pnand %p7631_p13, %p7628_p12 }
  0x61   :  { %7636 = shalt.err (!%p7633_p0)
}
  0x62   :  { %s7637_s30 = scalar_lea.vmem %s7922_s23, 49152  ;;  %p7642_p2 = scmp.lt.s32.totalorder %s7922_s23, %s7922_s23 }
  0x63   :  { %p7638_p1 = scmp.ne.s32.totalorder %s7922_s23, %s7637_s30  ;;  %p7643_p3 = scmp.lt.s32.totalorder %s7637_s30, %s7637_s30 }
  0x65   :  { %p7644_p4 = por %p7643_p3, %p7642_p2 }
  0x67   :  { %p7645_p5 = pnand %p7644_p4, %p7638_p1 }
  0x69   :  { %7648 = shalt.err (!%p7645_p5)
}
  0x6a   :  { %72 = dma.hbm_to_vmem [thread:$0]  %s8284_s6, 49152, %s7922_s23, [#allocation6], %s7753_s5, %s7753_s5, %s7754_s25  }
  0x6b   :  { %s7761_s18 = smov [#allocation10]   ;;  %s7762_s11 = smov [#allocation13]  }
  0x6c   :  { %s90_s19 = sshll.u32 %s7761_s18, 4  ;;  %s114_s26 = sshll.u32 %s7762_s11, 4  ;;  %s91_s19 = int_to_ptr.vmem [resolvable:$true] %s90_s19  ;;  %s7959_s26 = int_to_ptr.vmem [resolvable:$true] %s114_s26 }
  0x6d   :  { %s7649_s7 = scalar_lea.hbm %s8286_s8, 4096 }
  0x6e   :  { %p7650_p6 = scmp.ne.s32.totalorder %s8286_s8, %s7649_s7  ;;  %p7653_p7 = scmp.lt.u32.totalorder %s7649_s7, %s8286_s8 }
  0x70   :  { %p7655_p8 = pnand %p7653_p7, %p7650_p6 }
  0x72   :  { %7658 = shalt.err (!%p7655_p8)
}
  0x73   :  { %s7659_s6 = scalar_lea.vmem %s91_s19, 4096  ;;  %p7664_p10 = scmp.lt.s32.totalorder %s91_s19, %s91_s19 }
  0x74   :  { %p7660_p9 = scmp.ne.s32.totalorder %s91_s19, %s7659_s6  ;;  %p7665_p11 = scmp.lt.s32.totalorder %s7659_s6, %s7659_s6 }
  0x76   :  { %p7666_p12 = por %p7665_p11, %p7664_p10 }
  0x78   :  { %p7667_p13 = pnand %p7666_p12, %p7660_p9 }
  0x7a   :  { %7670 = shalt.err (!%p7667_p13)
}
  0x7b   :  { %96 = dma.hbm_to_vmem [thread:$0]  %s8286_s8, 4096, %s91_s19, [#allocation9], %s7757_s24, %s7757_s24, %s7758_s1  }
  0x7c   :  { %s7671_s20 = scalar_lea.hbm %s8288_s10, 256 }
  0x7d   :  { %p7672_p0 = scmp.ne.s32.totalorder %s8288_s10, %s7671_s20  ;;  %p7675_p1 = scmp.lt.u32.totalorder %s7671_s20, %s8288_s10 }
  0x7f   :  { %p7677_p2 = pnand %p7675_p1, %p7672_p0 }
  0x81   :  { %7680 = shalt.err (!%p7677_p2)
}
  0x82   :  { %s7681_s7 = scalar_lea.vmem %s7959_s26, 256  ;;  %p7686_p4 = scmp.lt.s32.totalorder %s7959_s26, %s7959_s26 }
  0x83   :  { %p7682_p3 = scmp.ne.s32.totalorder %s7959_s26, %s7681_s7  ;;  %p7687_p5 = scmp.lt.s32.totalorder %s7681_s7, %s7681_s7 }
  0x85   :  { %p7688_p6 = por %p7687_p5, %p7686_p4 }
  0x87   :  { %p7689_p7 = pnand %p7688_p6, %p7682_p3 }
  0x89   :  { %7692 = shalt.err (!%p7689_p7)
}
  0x8a   :  { %120 = dma.hbm_to_vmem [thread:$0]  %s8288_s10, 256, %s7959_s26, [#allocation12], %s7753_s5, %s7753_s5, %s7754_s25  }
  0x8b   :  { %s7763_s21 = smov [#allocation16]   ;;  %s7764_s28 = smov [#allocation17]  }
  0x8c   :  { %s138_s27 = sshll.u32 %s7763_s21, 4  ;;  %s151_s29 = sshll.u32 %s7764_s28, 4  ;;  %s139_s27 = int_to_ptr.vmem [resolvable:$true] %s138_s27  ;;  %s152_s29 = int_to_ptr.vmem [resolvable:$true] %s151_s29 }
  0x8d   :  { %s7693_s0 = scalar_lea.hbm %s8290_s12, 2048 }
  0x8e   :  { %p7694_p8 = scmp.ne.s32.totalorder %s8290_s12, %s7693_s0  ;;  %p7697_p9 = scmp.lt.u32.totalorder %s7693_s0, %s8290_s12 }
  0x90   :  { %p7699_p10 = pnand %p7697_p9, %p7694_p8 }
  0x92   :  { %7702 = shalt.err (!%p7699_p10)
}
  0x93   :  { %s7703_s10 = scalar_lea.vmem %s139_s27, 2048  ;;  %p7708_p12 = scmp.lt.s32.totalorder %s139_s27, %s139_s27 }
  0x94   :  { %p7704_p11 = scmp.ne.s32.totalorder %s139_s27, %s7703_s10  ;;  %p7709_p13 = scmp.lt.s32.totalorder %s7703_s10, %s7703_s10 }
  0x96   :  { %p7710_p0 = por %p7709_p13, %p7708_p12 }
  0x98   :  { %p7711_p1 = pnand %p7710_p0, %p7704_p11 }
  0x9a   :  { %7714 = shalt.err (!%p7711_p1)
}
  0x9b   :  { %144 = dma.hbm_to_vmem [thread:$0]  %s8290_s12, 2048, %s139_s27, [#allocation15], %s7757_s24, %s7757_s24, %s7758_s1  }
  0x9c   :  { %s7715_s9 = scalar_lea.hbm %s8291_s13, 384 }
  0x9d   :  { %p7716_p2 = scmp.ne.s32.totalorder %s8291_s13, %s7715_s9  ;;  %p7719_p3 = scmp.lt.u32.totalorder %s7715_s9, %s8291_s13 }
  0x9f   :  { %p7721_p4 = pnand %p7719_p3, %p7716_p2 }
  0xa1   :  { %7724 = shalt.err (!%p7721_p4)
}
  0xa2   :  { %s7725_s21 = scalar_lea.vmem %s152_s29, 384  ;;  %p7730_p6 = scmp.lt.s32.totalorder %s152_s29, %s152_s29 }
  0xa3   :  { %p7726_p5 = scmp.ne.s32.totalorder %s152_s29, %s7725_s21  ;;  %p7731_p7 = scmp.lt.s32.totalorder %s7725_s21, %s7725_s21 }
  0xa5   :  { %p7732_p8 = por %p7731_p7, %p7730_p6 }
  0xa7   :  { %p7733_p9 = pnand %p7732_p8, %p7726_p5 }
  0xa9   :  { %7736 = shalt.err (!%p7733_p9)
}
  0xaa   :  { %154 = dma.hbm_to_vmem [thread:$0]  %s8291_s13, 384, %s152_s29, [#allocation18]  }
  0xab   :  { %7737 = dma.done.wait [#allocation4], 4096  }
  0xac   :  { %7738 = vsyncadd [#allocation4], 4294963200 }
  0xad   :  { %7739 = dma.done.wait [#allocation6], 55296  }
  0xae   :  { %7740 = vsyncadd [#allocation6], 4294912000 }
  0xaf   :  { %7741 = dma.done.wait [#allocation9], 10240  }
  0xb0   :  { %7742 = vsyncadd [#allocation9], 4294957056 }
  0xb1   :  { %7743 = dma.done.wait [#allocation12], 3328  }
  0xb2   :  { %7744 = vsyncadd [#allocation12], 4294963968 }
  0xb3   :  { %7745 = dma.done.wait [#allocation15], 8192  }
  0xb4   :  { %7746 = vsyncadd [#allocation15], 4294959104 }
  0xb5   :  { %7747 = dma.done.wait [#allocation18], 384  }
  0xb6   :  { %7748 = vsyncadd [#allocation18], 4294966912  ;;  %v6577_v0 = vld [vmem:[#allocation3 + $0x4] ss:$8 sps:$4 sm:$0xff]   ;;  %v6579_v1 = vld [vmem:[#allocation3] ss:$8 sps:$4 sm:$0xff]  }
  0xb7   :  { %398 = vmatprep.subr.bf16.mxu0 %v6577_v0  ;;  %v6580_v2 = vld [vmem:[#allocation3 + $0x14] ss:$8 sps:$4 sm:$0xff]   ;;  %v6582_v3 = vld [vmem:[#allocation3 + $0x10] ss:$8 sps:$4 sm:$0xff]   ;;  %v6583_v4 = vld [vmem:[#allocation3 + $0x24] ss:$8 sps:$4 sm:$0xff]  }
  0xb8   :  { %399 = vmatpush1.bf16.msra.mxu0 %v6579_v1  ;;  %v6585_v5 = vld [vmem:[#allocation3 + $0x20] ss:$8 sps:$4 sm:$0xff]   ;;  %v6586_v6 = vld [vmem:[#allocation3 + $0x34] ss:$8 sps:$4 sm:$0xff]   ;;  %v6588_v7 = vld [vmem:[#allocation3 + $0x30] ss:$8 sps:$4 sm:$0xff]  }
  0xb9   :  { %400 = vmatprep.subr.bf16.mxu0 %v6580_v2  ;;  %v6589_v8 = vld [vmem:[#allocation3 + $0x44] ss:$8 sps:$4 sm:$0xff]   ;;  %v6591_v9 = vld [vmem:[#allocation3 + $0x40] ss:$8 sps:$4 sm:$0xff]   ;;  %v6592_v10 = vld [vmem:[#allocation3 + $0x54] ss:$8 sps:$4 sm:$0xff]  }
  0xba   :  { %v6594_v11 = vld [vmem:[#allocation3 + $0x50] ss:$8 sps:$4 sm:$0xff]   ;;  %v6595_v12 = vld [vmem:[#allocation3 + $0x64] ss:$8 sps:$4 sm:$0xff]   ;;  %s8300_s27 = sld [smem:[#allocation26_spill]]  ;;  %vm7766_vm2 = vmmov 0  }
  0xbb   :  { %v6597_v15 = vld [vmem:[#allocation3 + $0x60] ss:$8 sps:$4 sm:$0xff]   ;;  %v6598_v16 = vld [vmem:[#allocation3 + $0x74] ss:$8 sps:$4 sm:$0xff]   ;;  %v6600_v17 = vld [vmem:[#allocation3 + $0x70] ss:$8 sps:$4 sm:$0xff]  }
  0xbc   :  { %401 = vmatpush1.bf16.msra.mxu0 %v6582_v3  ;;  %v6601_v18 = vld [vmem:[#allocation3 + $0x84] ss:$8 sps:$4 sm:$0xff]   ;;  %v6603_v19 = vld [vmem:[#allocation3 + $0x80] ss:$8 sps:$4 sm:$0xff]   ;;  %v6604_v20 = vld [vmem:[#allocation3 + $0x94] ss:$8 sps:$4 sm:$0xff]  }
  0xbd   :  { %402 = vmatprep.subr.bf16.mxu0 %v6583_v4  ;;  %v6606_v21 = vld [vmem:[#allocation3 + $0x90] ss:$8 sps:$4 sm:$0xff]   ;;  %v6607_v22 = vld [vmem:[#allocation3 + $0xa4] ss:$8 sps:$4 sm:$0xff]   ;;  %v6609_v23 = vld [vmem:[#allocation3 + $0xa0] ss:$8 sps:$4 sm:$0xff]  }
  0xbe   :  { %v6610_v24 = vld [vmem:[#allocation3 + $0xb4] ss:$8 sps:$4 sm:$0xff]   ;;  %v6612_v25 = vld [vmem:[#allocation3 + $0xb0] ss:$8 sps:$4 sm:$0xff]   ;;  %v6613_v26 = vld [vmem:[#allocation3 + $0xc4] ss:$8 sps:$4 sm:$0xff]  }
  0xbf   :  { %v6615_v27 = vld [vmem:[#allocation3 + $0xc0] ss:$8 sps:$4 sm:$0xff]   ;;  %v6616_v28 = vld [vmem:[#allocation3 + $0xd4] ss:$8 sps:$4 sm:$0xff]   ;;  %v6618_v29 = vld [vmem:[#allocation3 + $0xd0] ss:$8 sps:$4 sm:$0xff]  }
  0xc0   :  { %403 = vmatpush1.bf16.msra.mxu0 %v6585_v5  ;;  %v191_v13 = vld [vmem:[%s8300_s27 + $0x8] sm:$0xff]  ;;  %v6622_v32 = vld [vmem:[#allocation3 + $0xf4] ss:$8 sps:$4 sm:$0xff]   ;;  %v6624_v33 = vld [vmem:[#allocation3 + $0xf0] ss:$8 sps:$4 sm:$0xff]   ;;  %v228_v5 = vlaneseq  ;;  %s8301_s20 = sld [smem:[#allocation25_spill]] }
  0xc1   :  { %404 = vmatprep.subr.bf16.mxu0 %v6586_v6  ;;  %v225_v14 = vpack.c.bf16 %v191_v13, %v191_v13  ;;  %v6619_v30 = vld [vmem:[#allocation3 + $0xe4] ss:$8 sps:$4 sm:$0xff]   ;;  %v6621_v31 = vld [vmem:[#allocation3 + $0xe0] ss:$8 sps:$4 sm:$0xff]   ;;  %v6631_v41 = vld [vmem:[#allocation5 + $0x30] ss:$12 sps:$4 sm:$0xff]  }
  0xc2   :  { %v190_v34 = vld [vmem:[%s8300_s27] sm:$0xff]  ;;  %v6630_v38 = vld [vmem:[#allocation5 + $0x1c] ss:$12 sps:$4 sm:$0xff]   ;;  %v6636_v42 = vld [vmem:[#allocation5 + $0x4c] ss:$12 sps:$4 sm:$0xff]   ;;  %v8029_v6 = vshrl.u32 %v228_v5, 7 }
  0xc3   :  { %430 = vmatprep.mubr.bf16.mxu0 %v225_v14  ;;  %v6627_v35 = vld [vmem:[#allocation5 + $0x4] ss:$12 sps:$4 sm:$0xff]   ;;  %v6625_v36 = vld [vmem:[#allocation5] ss:$12 sps:$4 sm:$0xff]   ;;  %v224_v37 = vpack.c.bf16 %v190_v34, %v190_v34  ;;  %v6634_v43 = vld [vmem:[#allocation5 + $0x48] ss:$12 sps:$4 sm:$0xff]  }
  0xc4   :  { %405 = vmatpush1.bf16.msra.mxu0 %v6588_v7  ;;  %v6628_v39 = vld [vmem:[#allocation5 + $0x18] ss:$12 sps:$4 sm:$0xff]   ;;  %v6633_v40 = vld [vmem:[#allocation5 + $0x34] ss:$12 sps:$4 sm:$0xff]   ;;  %v6642_v46 = vld [vmem:[#allocation5 + $0x7c] ss:$12 sps:$4 sm:$0xff]  }
  0xc5   :  { %406 = vmatprep.subr.bf16.mxu0 %v6589_v8  ;;  %v6639_v44 = vld [vmem:[#allocation5 + $0x64] ss:$12 sps:$4 sm:$0xff]   ;;  %v6637_v45 = vld [vmem:[#allocation5 + $0x60] ss:$12 sps:$4 sm:$0xff]   ;;  %v6646_v51 = vld [vmem:[#allocation5 + $0xa8] ss:$12 sps:$4 sm:$0xff]  }
  0xc6   :  { %v6640_v47 = vld [vmem:[#allocation5 + $0x78] ss:$12 sps:$4 sm:$0xff]   ;;  %v6645_v48 = vld [vmem:[#allocation5 + $0x94] ss:$12 sps:$4 sm:$0xff]   ;;  %v6643_v49 = vld [vmem:[#allocation5 + $0x90] ss:$12 sps:$4 sm:$0xff]  }
  0xc7   :  { %v6648_v50 = vld [vmem:[#allocation5 + $0xac] ss:$12 sps:$4 sm:$0xff]   ;;  %v6651_v52 = vld [vmem:[#allocation5 + $0xc4] ss:$12 sps:$4 sm:$0xff]   ;;  %v6654_v54 = vld [vmem:[#allocation5 + $0xdc] ss:$12 sps:$4 sm:$0xff]  }
  0xc8   :  { %407 = vmatpush1.bf16.msra.mxu0 %v6591_v9  ;;  %v6649_v53 = vld [vmem:[#allocation5 + $0xc0] ss:$12 sps:$4 sm:$0xff]   ;;  %v6652_v55 = vld [vmem:[#allocation5 + $0xd8] ss:$12 sps:$4 sm:$0xff]   ;;  %v6655_v57 = vld [vmem:[#allocation5 + $0xf0] ss:$12 sps:$4 sm:$0xff]  }
  0xc9   :  { %408 = vmatprep.subr.bf16.mxu0 %v6592_v10  ;;  %v6657_v56 = vld [vmem:[#allocation5 + $0xf4] ss:$12 sps:$4 sm:$0xff]   ;;  %v6660_v58 = vld [vmem:[#allocation5 + $0x10c] ss:$12 sps:$4 sm:$0xff]   ;;  %v6663_v60 = vld [vmem:[#allocation5 + $0x124] ss:$12 sps:$4 sm:$0xff]  }
  0xca   :  { %v6658_v59 = vld [vmem:[#allocation5 + $0x108] ss:$12 sps:$4 sm:$0xff]   ;;  %v6661_v61 = vld [vmem:[#allocation5 + $0x120] ss:$12 sps:$4 sm:$0xff]   ;;  %v6664_v63 = vld [vmem:[#allocation5 + $0x138] ss:$12 sps:$4 sm:$0xff]  }
  0xcb   :  { %v6666_v62 = vld [vmem:[#allocation5 + $0x13c] ss:$12 sps:$4 sm:$0xff]   ;;  %v6669_v0 = vld [vmem:[#allocation5 + $0x154] ss:$12 sps:$4 sm:$0xff]   ;;  %v6672_v2 = vld [vmem:[#allocation5 + $0x16c] ss:$12 sps:$4 sm:$0xff]  }
  0xcc   :  { %409 = vmatpush1.bf16.msra.mxu0 %v6594_v11  ;;  %v6667_v1 = vld [vmem:[#allocation5 + $0x150] ss:$12 sps:$4 sm:$0xff]   ;;  %v6670_v3 = vld [vmem:[#allocation5 + $0x168] ss:$12 sps:$4 sm:$0xff]   ;;  %v8032_v7 = vsub.s32 0, %v8029_v6  ;;  %v8035_v8 = vsub.s32 1, %v8029_v6 }
  0xcd   :  { %410 = vmatprep.subr.bf16.mxu0 %v6595_v12  ;;  %v6673_v4 = vld [vmem:[#allocation5 + $0xc8] ss:$12 sps:$4 sm:$0xff]   ;;  %v226_v9 = vld [vmem:[#allocation17] ss:$8 sm:$0x3] }
  0xce   :  { %v231_v10 = vrot.slane %v226_v9, %v8032_v7  ;;  %v235_v11 = vrot.slane %v226_v9, %v8035_v8  ;;  %v6684_v34 = vld [vmem:[#allocation5 + $0x80] ss:$12 sps:$4 sm:$0xff]   ;;  %v6736_v5 = vld [vmem:[#allocation8 + $0xf4] ss:$8 sps:$4 sm:$0xff]   ;;  %v6734_v9 = vld [vmem:[#allocation8 + $0xf0] ss:$8 sps:$4 sm:$0xff]  }
  0xd0   :  { %411 = vmatpush1.bf16.msra.mxu0 %v6597_v15 }
  0xd1   :  { %412 = vmatprep.subr.bf16.mxu0 %v6598_v16 }
  0xd4   :  { %413 = vmatpush1.bf16.msra.mxu0 %v6600_v17 }
  0xd5   :  { %414 = vmatprep.subr.bf16.mxu0 %v6601_v18 }
  0xd8   :  { %415 = vmatpush1.bf16.msra.mxu0 %v6603_v19 }
  0xd9   :  { %416 = vmatprep.subr.bf16.mxu0 %v6604_v20 }
  0xdc   :  { %417 = vmatpush1.bf16.msra.mxu0 %v6606_v21 }
  0xdd   :  { %418 = vmatprep.subr.bf16.mxu0 %v6607_v22 }
  0xe0   :  { %419 = vmatpush1.bf16.msra.mxu0 %v6609_v23  ;;  %v6674_v23 = vld [vmem:[#allocation5 + $0x8] ss:$12 sps:$4 sm:$0xff]  }
  0xe1   :  { %420 = vmatprep.subr.bf16.mxu0 %v6610_v24 }
  0xe4   :  { %421 = vmatpush1.bf16.msra.mxu0 %v6612_v25  ;;  %v6675_v25 = vld [vmem:[#allocation5 + $0xe0] ss:$12 sps:$4 sm:$0xff]  }
  0xe5   :  { %422 = vmatprep.subr.bf16.mxu0 %v6613_v26  ;;  %v6676_v26 = vld [vmem:[#allocation5 + $0x20] ss:$12 sps:$4 sm:$0xff]  }
  0xe8   :  { %423 = vmatpush1.bf16.msra.mxu0 %v6615_v27  ;;  %v6677_v27 = vld [vmem:[#allocation5 + $0xf8] ss:$12 sps:$4 sm:$0xff]  }
  0xe9   :  { %424 = vmatprep.subr.bf16.mxu0 %v6616_v28  ;;  %v6678_v28 = vld [vmem:[#allocation5 + $0x38] ss:$12 sps:$4 sm:$0xff]  }
  0xec   :  { %425 = vmatpush1.bf16.msra.mxu0 %v6618_v29  ;;  %v6679_v29 = vld [vmem:[#allocation5 + $0x110] ss:$12 sps:$4 sm:$0xff]  }
  0xed   :  { %426 = vmatprep.subr.bf16.mxu0 %v6619_v30  ;;  %v6680_v30 = vld [vmem:[#allocation5 + $0x50] ss:$12 sps:$4 sm:$0xff]  }
  0xf0   :  { %427 = vmatpush1.bf16.msra.mxu0 %v6621_v31  ;;  %v6681_v31 = vld [vmem:[#allocation5 + $0x128] ss:$12 sps:$4 sm:$0xff]  }
  0xf1   :  { %428 = vmatprep.subr.bf16.mxu0 %v6622_v32  ;;  %v6682_v32 = vld [vmem:[#allocation5 + $0x68] ss:$12 sps:$4 sm:$0xff]  }
  0xf4   :  { %429 = vmatpush1.bf16.msra.mxu0 %v6624_v33  ;;  %v6683_v33 = vld [vmem:[#allocation5 + $0x140] ss:$12 sps:$4 sm:$0xff]  }
  0xf5   :  { %785 = vmatprep.subr.bf16.mxu0 %v6627_v35  ;;  %v6685_v35 = vld [vmem:[#allocation5 + $0x158] ss:$12 sps:$4 sm:$0xff]  }
  0xf7   :  { %431 = vmatmul.mubr.bf16.vlgmr.msra.gmra.mrb[0].mxu0 %v224_v37  ;;  %v6687_v37 = vld [vmem:[#allocation5 + $0x170] ss:$12 sps:$4 sm:$0xff]  }
  0xf8   :  { %786 = vmatpush1.bf16.msra.mxu0 %v6625_v36  ;;  %v6686_v36 = vld [vmem:[#allocation5 + $0x98] ss:$12 sps:$4 sm:$0xff]  }
  0xf9   :  { %787 = vmatprep.subr.bf16.mxu0 %v6630_v38  ;;  %v6688_v38 = vld [vmem:[#allocation5 + $0xb0] ss:$12 sps:$4 sm:$0xff]  }
  0xfc   :  { %788 = vmatpush1.bf16.msra.mxu0 %v6628_v39  ;;  %v6691_v39 = vld [vmem:[#allocation8 + $0x4] ss:$8 sps:$4 sm:$0xff]  }
  0xfd   :  { %789 = vmatprep.subr.bf16.mxu0 %v6633_v40  ;;  %v6689_v40 = vld [vmem:[#allocation8] ss:$8 sps:$4 sm:$0xff]  }
 0x100   :  { %790 = vmatpush1.bf16.msra.mxu0 %v6631_v41  ;;  %v6694_v41 = vld [vmem:[#allocation8 + $0x14] ss:$8 sps:$4 sm:$0xff]  }
 0x101   :  { %791 = vmatprep.subr.bf16.mxu0 %v6636_v42  ;;  %v6692_v42 = vld [vmem:[#allocation8 + $0x10] ss:$8 sps:$4 sm:$0xff]  }
 0x104   :  { %792 = vmatpush1.bf16.msra.mxu0 %v6634_v43  ;;  %v6697_v43 = vld [vmem:[#allocation8 + $0x24] ss:$8 sps:$4 sm:$0xff]  }
 0x105   :  { %793 = vmatprep.subr.bf16.mxu0 %v6639_v44  ;;  %v6695_v44 = vld [vmem:[#allocation8 + $0x20] ss:$8 sps:$4 sm:$0xff]  }
 0x108   :  { %794 = vmatpush1.bf16.msra.mxu0 %v6637_v45  ;;  %v6700_v45 = vld [vmem:[#allocation8 + $0x34] ss:$8 sps:$4 sm:$0xff]  }
 0x109   :  { %795 = vmatprep.subr.bf16.mxu0 %v6642_v46  ;;  %v6698_v46 = vld [vmem:[#allocation8 + $0x30] ss:$8 sps:$4 sm:$0xff]  }
 0x10c   :  { %796 = vmatpush1.bf16.msra.mxu0 %v6640_v47  ;;  %v6703_v47 = vld [vmem:[#allocation8 + $0x44] ss:$8 sps:$4 sm:$0xff]  }
 0x10d   :  { %797 = vmatprep.subr.bf16.mxu0 %v6645_v48  ;;  %v6701_v48 = vld [vmem:[#allocation8 + $0x40] ss:$8 sps:$4 sm:$0xff]  }
 0x110   :  { %798 = vmatpush1.bf16.msra.mxu0 %v6643_v49  ;;  %v6706_v49 = vld [vmem:[#allocation8 + $0x54] ss:$8 sps:$4 sm:$0xff]  }
 0x111   :  { %799 = vmatprep.subr.bf16.mxu0 %v6648_v50  ;;  %v6704_v50 = vld [vmem:[#allocation8 + $0x50] ss:$8 sps:$4 sm:$0xff]  }
 0x114   :  { %800 = vmatpush1.bf16.msra.mxu0 %v6646_v51  ;;  %v6709_v51 = vld [vmem:[#allocation8 + $0x64] ss:$8 sps:$4 sm:$0xff]  }
 0x115   :  { %801 = vmatprep.subr.bf16.mxu0 %v6651_v52  ;;  %v6707_v52 = vld [vmem:[#allocation8 + $0x60] ss:$8 sps:$4 sm:$0xff]  }
 0x118   :  { %802 = vmatpush1.bf16.msra.mxu0 %v6649_v53  ;;  %v6712_v53 = vld [vmem:[#allocation8 + $0x74] ss:$8 sps:$4 sm:$0xff]  }
 0x119   :  { %803 = vmatprep.subr.bf16.mxu0 %v6654_v54  ;;  %v6710_v54 = vld [vmem:[#allocation8 + $0x70] ss:$8 sps:$4 sm:$0xff]  }
 0x11c   :  { %804 = vmatpush1.bf16.msra.mxu0 %v6652_v55  ;;  %v6715_v55 = vld [vmem:[#allocation8 + $0x84] ss:$8 sps:$4 sm:$0xff]  }
 0x11d   :  { %805 = vmatprep.subr.bf16.mxu0 %v6657_v56  ;;  %v6713_v56 = vld [vmem:[#allocation8 + $0x80] ss:$8 sps:$4 sm:$0xff]  }
 0x120   :  { %806 = vmatpush1.bf16.msra.mxu0 %v6655_v57  ;;  %v6718_v57 = vld [vmem:[#allocation8 + $0x94] ss:$8 sps:$4 sm:$0xff]  }
 0x121   :  { %807 = vmatprep.subr.bf16.mxu0 %v6660_v58  ;;  %v6716_v58 = vld [vmem:[#allocation8 + $0x90] ss:$8 sps:$4 sm:$0xff]  }
 0x124   :  { %808 = vmatpush1.bf16.msra.mxu0 %v6658_v59  ;;  %v6721_v59 = vld [vmem:[#allocation8 + $0xa4] ss:$8 sps:$4 sm:$0xff]  }
 0x125   :  { %809 = vmatprep.subr.bf16.mxu0 %v6663_v60  ;;  %v6719_v60 = vld [vmem:[#allocation8 + $0xa0] ss:$8 sps:$4 sm:$0xff]  }
 0x128   :  { %810 = vmatpush1.bf16.msra.mxu0 %v6661_v61  ;;  %v6724_v61 = vld [vmem:[#allocation8 + $0xb4] ss:$8 sps:$4 sm:$0xff]  }
 0x129   :  { %811 = vmatprep.subr.bf16.mxu0 %v6666_v62  ;;  %v6722_v62 = vld [vmem:[#allocation8 + $0xb0] ss:$8 sps:$4 sm:$0xff]  }
 0x12c   :  { %812 = vmatpush1.bf16.msra.mxu0 %v6664_v63  ;;  %v6727_v63 = vld [vmem:[#allocation8 + $0xc4] ss:$8 sps:$4 sm:$0xff]  }
 0x12d   :  { %813 = vmatprep.subr.bf16.mxu0 %v6669_v0  ;;  %v6725_v0 = vld [vmem:[#allocation8 + $0xc0] ss:$8 sps:$4 sm:$0xff]  }
 0x130   :  { %814 = vmatpush1.bf16.msra.mxu0 %v6667_v1  ;;  %v6730_v1 = vld [vmem:[#allocation8 + $0xd4] ss:$8 sps:$4 sm:$0xff]  }
 0x131   :  { %815 = vmatprep.subr.bf16.mxu0 %v6672_v2  ;;  %v6728_v2 = vld [vmem:[#allocation8 + $0xd0] ss:$8 sps:$4 sm:$0xff]  }
 0x134   :  { %816 = vmatpush1.bf16.msra.mxu0 %v6670_v3  ;;  %v6733_v3 = vld [vmem:[#allocation8 + $0xe4] ss:$8 sps:$4 sm:$0xff]  }
 0x135   :  { %6295 = vmatprep.subr.bf16.mxu0 %v6673_v4  ;;  %v6731_v4 = vld [vmem:[#allocation8 + $0xe0] ss:$8 sps:$4 sm:$0xff]  }
 0x1ca   :  { %v432_v12 = vpop.f32.mrb[0].mxu0 }
 0x1cb   :  { %v433_v13 = vadd.f32 %v432_v12, %v231_v10  ;;  %v434_v14 = vpop.f32.mrb[1].mxu0  ;;  %v6739_v10 = vld [vmem:[#allocation8 + $0x104] ss:$8 sps:$4 sm:$0xff]   ;;  %v512_v12 = vld [vmem:[#allocation17 + $0x1] ss:$8 sm:$0x7] }
 0x1cc   :  { %v435_v15 = vadd.f32 %v434_v14, %v235_v11  ;;  %v436_v16 = vpop.f32.mrb[2].mxu0  ;;  %v7765_v11 = vmov 0.0   ;;  %v521_v14 = vrot.slane %v512_v12, %v8035_v8 }
 0x1cd   :  { %vm439_vm0 = vcmp.ge.f32.partialorder %v433_v13, 0.0  ;;  %v441_v17 = vmul.f32 0.01, %v433_v13  ;;  %v437_v18 = vpop.f32.mrb[3].mxu0  ;;  %6466 = vmatprep.subr.bf16.mxu1 %v7765_v11  ;;  %6482 = vmatprep.mubr.msk.bf16.mxu1 %vm7766_vm2, %v7765_v11 }
 0x1ce   :  { %vm440_vm1 = vcmp.ge.f32.partialorder %v435_v15, 0.0  ;;  %v442_v19 = vmul.f32 0.01, %v435_v15 }
 0x1cf   :  { %v443_v20 = vsel %vm439_vm0, %v433_v13, %v441_v17  ;;  %v517_v13 = vrot.slane %v512_v12, %v8032_v7 }
 0x1d0   :  { %v444_v21 = vsel %vm440_vm1, %v435_v15, %v442_v19  ;;  %v509_v24 = vpack.c.bf16 %v443_v20, %v443_v20 }
 0x1d1   :  { %v510_v22 = vpack.c.bf16 %v444_v21, %v444_v21 }
 0x1d3   :  { %817 = vmatprep.mubr.bf16.mxu0 %v510_v22 }
 0x1d4   :  { %818 = vmatmul.mubr.bf16.vlgmr.msra.gmra.mrb[4].mxu0 %v509_v24 }
 0x1d5   :  { %6296 = vmatpush3.bf16.msra.mxu0 %v6674_v23  ;;  %858 = vmatprep.mubr.bf16.mxu0 %v510_v22  ;;  %v6737_v22 = vld [vmem:[#allocation8 + $0x100] ss:$8 sps:$4 sm:$0xff]  }
 0x1d6   :  { %6297 = vmatprep.subr.bf16.mxu0 %v6675_v25  ;;  %v6740_v25 = vld [vmem:[#allocation8 + $0x110] ss:$8 sps:$4 sm:$0xff]  }
 0x1d9   :  { %6298 = vmatpush3.bf16.msra.mxu0 %v6676_v26  ;;  %v7767_v26 = vmov 0  }
 0x1da   :  { %6299 = vmatprep.subr.bf16.mxu0 %v6677_v27  ;;  %v6745_v27 = vld [vmem:[#allocation8 + $0x124] ss:$8 sps:$4 sm:$0xff]  }
 0x1dd   :  { %6300 = vmatpush3.bf16.msra.mxu0 %v6678_v28  ;;  %v6743_v28 = vld [vmem:[#allocation8 + $0x120] ss:$8 sps:$4 sm:$0xff]  }
 0x1de   :  { %6301 = vmatprep.subr.bf16.mxu0 %v6679_v29  ;;  %v6748_v29 = vld [vmem:[#allocation8 + $0x134] ss:$8 sps:$4 sm:$0xff]  }
 0x1e1   :  { %6302 = vmatpush3.bf16.msra.mxu0 %v6680_v30  ;;  %v6746_v30 = vld [vmem:[#allocation8 + $0x130] ss:$8 sps:$4 sm:$0xff]  }
 0x1e2   :  { %6303 = vmatprep.subr.bf16.mxu0 %v6681_v31  ;;  %v6751_v31 = vld [vmem:[#allocation8 + $0x144] ss:$8 sps:$4 sm:$0xff]  }
 0x1e5   :  { %6304 = vmatpush3.bf16.msra.mxu0 %v6682_v32  ;;  %v6749_v32 = vld [vmem:[#allocation8 + $0x140] ss:$8 sps:$4 sm:$0xff]  }
 0x1e6   :  { %6305 = vmatprep.subr.bf16.mxu0 %v6683_v33  ;;  %v6754_v33 = vld [vmem:[#allocation8 + $0x154] ss:$8 sps:$4 sm:$0xff]  }
 0x1e9   :  { %6306 = vmatpush3.bf16.msra.mxu0 %v6684_v34  ;;  %v6752_v34 = vld [vmem:[#allocation8 + $0x150] ss:$8 sps:$4 sm:$0xff]  }
 0x1ea   :  { %6307 = vmatprep.subr.bf16.mxu0 %v6685_v35  ;;  %v6757_v35 = vld [vmem:[#allocation8 + $0x164] ss:$8 sps:$4 sm:$0xff]  }
 0x1ed   :  { %6308 = vmatpush3.bf16.msra.mxu0 %v6686_v36  ;;  %v6755_v36 = vld [vmem:[#allocation8 + $0x160] ss:$8 sps:$4 sm:$0xff]  }
 0x1ee   :  { %6309 = vmatprep.subr.bf16.mxu0 %v6687_v37  ;;  %v524_v37 = vsub.s32 2, %v8029_v6  ;;  %v6762_v6 = vld [vmem:[#allocation10 + $0x88] sm:$0xff]  }
 0x1f1   :  { %6310 = vmatpush3.bf16.msra.mxu0 %v6688_v38  ;;  %v6760_v38 = vld [vmem:[#allocation8 + $0x174] ss:$8 sps:$4 sm:$0xff]  }
 0x1f2   :  { %1170 = vmatprep.subr.bf16.mxu0 %v6691_v39 }
 0x1f4   :  { %859 = vmatmul.mubr.bf16.vlgmr.msra.gmra.mrb[8].mxu0 %v509_v24  ;;  %v6742_v24 = vld [vmem:[#allocation8 + $0x114] ss:$8 sps:$4 sm:$0xff]  }
 0x1f5   :  { %1171 = vmatpush1.bf16.msra.mxu0 %v6689_v40  ;;  %v525_v40 = vrot.slane %v512_v12, %v524_v37  ;;  %v6788_v37 = vld [vmem:[#allocation7 + $0x10] ss:$8 sps:$4 sm:$0xff]  }
 0x1f6   :  { %1172 = vmatprep.subr.bf16.mxu0 %v6694_v41  ;;  %v6758_v41 = vld [vmem:[#allocation8 + $0x170] ss:$8 sps:$4 sm:$0xff]  }
 0x1f9   :  { %1173 = vmatpush1.bf16.msra.mxu0 %v6692_v42 }
 0x1fa   :  { %1174 = vmatprep.subr.bf16.mxu0 %v6697_v43 }
 0x1fd   :  { %1175 = vmatpush1.bf16.msra.mxu0 %v6695_v44 }
 0x1fe   :  { %1176 = vmatprep.subr.bf16.mxu0 %v6700_v45 }
 0x201   :  { %1177 = vmatpush1.bf16.msra.mxu0 %v6698_v46 }
 0x202   :  { %1178 = vmatprep.subr.bf16.mxu0 %v6703_v47  ;;  %v6761_v47 = vld [vmem:[#allocation10 + $0x80] sm:$0xff]  }
 0x205   :  { %1179 = vmatpush1.bf16.msra.mxu0 %v6701_v48 }
 0x206   :  { %1180 = vmatprep.subr.bf16.mxu0 %v6706_v49  ;;  %v6763_v49 = vld [vmem:[#allocation10 + $0x90] sm:$0xff]  }
 0x209   :  { %1181 = vmatpush1.bf16.msra.mxu0 %v6704_v50  ;;  %v6764_v50 = vld [vmem:[#allocation10 + $0x98] sm:$0xff]  }
 0x20a   :  { %1182 = vmatprep.subr.bf16.mxu0 %v6709_v51  ;;  %v6765_v51 = vld [vmem:[#allocation10 + $0xa0] sm:$0xff]  }
 0x20d   :  { %1183 = vmatpush1.bf16.msra.mxu0 %v6707_v52  ;;  %v6766_v52 = vld [vmem:[#allocation10 + $0xa8] sm:$0xff]  }
 0x20e   :  { %1184 = vmatprep.subr.bf16.mxu0 %v6712_v53  ;;  %v6767_v53 = vld [vmem:[#allocation10 + $0xb0] sm:$0xff]  }
 0x211   :  { %1185 = vmatpush1.bf16.msra.mxu0 %v6710_v54  ;;  %v6768_v54 = vld [vmem:[#allocation10 + $0xb8] sm:$0xff]  }
 0x212   :  { %1186 = vmatprep.subr.bf16.mxu0 %v6715_v55  ;;  %v1254_v55 = vld [vmem:[%s8280_s2] sm:$0xff] }
 0x215   :  { %1187 = vmatpush1.bf16.msra.mxu0 %v6713_v56  ;;  %v1291_v56 = vpack.c.bf16 %v1254_v55, %v1254_v55  ;;  %v6820_v55 = vld [vmem:[#allocation7 + $0xb4] ss:$8 sps:$4 sm:$0xff]  }
 0x216   :  { %1188 = vmatprep.subr.bf16.mxu0 %v6718_v57  ;;  %v6769_v57 = vld [vmem:[#allocation11 + $0x40] sm:$0xff]  }
 0x219   :  { %1189 = vmatpush1.bf16.msra.mxu0 %v6716_v58  ;;  %v6770_v58 = vld [vmem:[#allocation11 + $0x48] sm:$0xff]  }
 0x21a   :  { %1190 = vmatprep.subr.bf16.mxu0 %v6721_v59  ;;  %v6771_v59 = vld [vmem:[#allocation11 + $0x50] sm:$0xff]  }
 0x21d   :  { %1191 = vmatpush1.bf16.msra.mxu0 %v6719_v60  ;;  %v6772_v60 = vld [vmem:[#allocation11 + $0x58] sm:$0xff]  }
 0x21e   :  { %1192 = vmatprep.subr.bf16.mxu0 %v6724_v61  ;;  %v6773_v61 = vld [vmem:[#allocation11 + $0x60] sm:$0xff]  }
 0x221   :  { %1193 = vmatpush1.bf16.msra.mxu0 %v6722_v62  ;;  %v6774_v62 = vld [vmem:[#allocation11 + $0x68] sm:$0xff]  }
 0x222   :  { %1194 = vmatprep.subr.bf16.mxu0 %v6727_v63  ;;  %v6775_v63 = vld [vmem:[#allocation11 + $0x70] sm:$0xff]  }
 0x225   :  { %1195 = vmatpush1.bf16.msra.mxu0 %v6725_v0  ;;  %v6776_v0 = vld [vmem:[#allocation11 + $0x78] sm:$0xff]  }
 0x226   :  { %1196 = vmatprep.subr.bf16.mxu0 %v6730_v1  ;;  %v5755_v1 = vld [vmem:[#allocation13 + $0x4] ss:$0 sm:$0xff] }
 0x229   :  { %1197 = vmatpush1.bf16.msra.mxu0 %v6728_v2 }
 0x22a   :  { %1198 = vmatprep.subr.bf16.mxu0 %v6733_v3 }
 0x22d   :  { %1199 = vmatpush1.bf16.msra.mxu0 %v6731_v4 }
 0x22e   :  { %1200 = vmatprep.subr.bf16.mxu0 %v6736_v5 }
 0x231   :  { %1201 = vmatpush1.bf16.msra.mxu0 %v6734_v9 }
 0x232   :  { %1211 = vmatprep.subr.bf16.mxu0 %v6739_v10 }
 0x2a7   :  { %v819_v15 = vpop.f32.mrb[4].mxu0 }
 0x2a8   :  { %v820_v16 = vadd.f32 %v819_v15, %v517_v13  ;;  %v821_v17 = vpop.f32.mrb[5].mxu0 }
 0x2a9   :  { %v822_v18 = vadd.f32 %v821_v17, %v521_v14  ;;  %v823_v19 = vpop.f32.mrb[6].mxu0 }
 0x2aa   :  { %v824_v20 = vpop.f32.mrb[7].mxu0  ;;  %v914_v23 = vpack.c.bf16 %v820_v16, %v820_v16 }
 0x2ab   :  { %v915_v21 = vpack.c.bf16 %v822_v18, %v822_v18  ;;  %v6777_v20 = vld [vmem:[#allocation10 + $0xc0] sm:$0xff]  }
 0x2ad   :  { %1202 = vmatprep.mubr.bf16.mxu0 %v915_v21 }
 0x2ae   :  { %1203 = vmatmul.mubr.bf16.vlgmr.msra.gmra.mrb[12].mxu0 %v914_v23  ;;  %v6779_v23 = vld [vmem:[#allocation10 + $0xd0] sm:$0xff]  }
 0x2af   :  { %1212 = vmatpush1.bf16.msra.mxu0 %v6737_v22  ;;  %1243 = vmatprep.mubr.bf16.mxu0 %v7767_v26  ;;  %v6778_v22 = vld [vmem:[#allocation10 + $0xc8] sm:$0xff]  }
 0x2b0   :  { %1213 = vmatprep.subr.bf16.mxu0 %v6742_v24  ;;  %v6780_v24 = vld [vmem:[#allocation10 + $0xd8] sm:$0xff]  }
 0x2b3   :  { %1214 = vmatpush1.bf16.msra.mxu0 %v6740_v25  ;;  %v6781_v25 = vld [vmem:[#allocation10 + $0xe0] sm:$0xff]  }
 0x2b4   :  { %1215 = vmatprep.subr.bf16.mxu0 %v6745_v27  ;;  %v6782_v27 = vld [vmem:[#allocation10 + $0xe8] sm:$0xff]  }
 0x2b7   :  { %1216 = vmatpush1.bf16.msra.mxu0 %v6743_v28  ;;  %v6783_v28 = vld [vmem:[#allocation10 + $0xf0] sm:$0xff]  }
 0x2b8   :  { %1217 = vmatprep.subr.bf16.mxu0 %v6748_v29  ;;  %v6784_v29 = vld [vmem:[#allocation10 + $0xf8] sm:$0xff]  }
 0x2bb   :  { %1218 = vmatpush1.bf16.msra.mxu0 %v6746_v30  ;;  %v1510_v30 = vld [vmem:[%s8281_s3] sm:$0xff] }
 0x2bc   :  { %1219 = vmatprep.subr.bf16.mxu0 %v6751_v31  ;;  %v6787_v31 = vld [vmem:[#allocation7 + $0x4] ss:$8 sps:$4 sm:$0xff]  }
 0x2bf   :  { %1220 = vmatpush1.bf16.msra.mxu0 %v6749_v32  ;;  %v8092_v32 = vld [vmem:[%s8301_s20] sm:$0xff] }
 0x2c0   :  { %1221 = vmatprep.subr.bf16.mxu0 %v6754_v33  ;;  %v1547_v33 = vpack.c.bf16 %v1510_v30, %v1510_v30  ;;  %v6861_v30 = vld [vmem:[#allocation7 + $0x184] ss:$8 sps:$4 sm:$0xff]  }
 0x2c3   :  { %1222 = vmatpush1.bf16.msra.mxu0 %v6752_v34  ;;  %v6785_v34 = vld [vmem:[#allocation7] ss:$8 sps:$4 sm:$0xff]  }
 0x2c4   :  { %1223 = vmatprep.subr.bf16.mxu0 %v6757_v35  ;;  %v5796_v35 = vcombine.high %v8092_v32, %v8092_v32 }
 0x2c7   :  { %v6311_v39 = vpop.f32.mrb[8].mxu0  ;;  %1224 = vmatpush1.bf16.msra.mxu0 %v6755_v36  ;;  %v6790_v36 = vld [vmem:[#allocation7 + $0x14] ss:$8 sps:$4 sm:$0xff]  }
 0x2c8   :  { %v6312_v42 = vpop.f32.mrb[9].mxu0  ;;  %1225 = vmatprep.subr.bf16.mxu0 %v6760_v38  ;;  %v6793_v38 = vld [vmem:[#allocation7 + $0x24] ss:$8 sps:$4 sm:$0xff]  }
 0x2c9   :  { %v6313_v43 = vadd.f32 %v6312_v42, %v6311_v39  ;;  %v6314_v44 = vpop.f32.mrb[10].mxu0  ;;  %v6791_v39 = vld [vmem:[#allocation7 + $0x20] ss:$8 sps:$4 sm:$0xff]   ;;  %v6799_v42 = vld [vmem:[#allocation7 + $0x44] ss:$8 sps:$4 sm:$0xff]  }
 0x2ca   :  { %v6315_v45 = vpop.f32.mrb[11].mxu0  ;;  %v6802_v44 = vld [vmem:[#allocation7 + $0x54] ss:$8 sps:$4 sm:$0xff]  }
 0x2cb   :  { %v861_v46 = vadd.f32 %v6313_v43, %v525_v40  ;;  %1226 = vmatpush1.bf16.msra.mxu0 %v6758_v41  ;;  %v6796_v40 = vld [vmem:[#allocation7 + $0x34] ss:$8 sps:$4 sm:$0xff]   ;;  %v6794_v41 = vld [vmem:[#allocation7 + $0x30] ss:$8 sps:$4 sm:$0xff]   ;;  %v6797_v43 = vld [vmem:[#allocation7 + $0x40] ss:$8 sps:$4 sm:$0xff]  }
 0x2cc   :  { %6406 = vmatprep.subr.bf16.mxu0 %v7765_v11  ;;  %v6800_v45 = vld [vmem:[#allocation7 + $0x50] ss:$8 sps:$4 sm:$0xff]  }
 0x2cd   :  { %v916_v48 = vpack.c.bf16 %v861_v46, %v861_v46  ;;  %v6805_v46 = vld [vmem:[#allocation7 + $0x64] ss:$8 sps:$4 sm:$0xff]  }
 0x2cf   :  { %1244 = vmatmul.mubr.bf16.vlgmr.msra.gmra.mrb[12].mxu0 %v916_v48  ;;  %v6808_v48 = vld [vmem:[#allocation7 + $0x74] ss:$8 sps:$4 sm:$0xff]  }
 0x2d0   :  { %6407 = vmatpush3.bf16.msra.mxu0 %v6761_v47  ;;  %6422 = vmatprep.mubr.msk.bf16.mxu0 %vm7766_vm2, %v7765_v11  ;;  %v6803_v47 = vld [vmem:[#allocation7 + $0x60] ss:$8 sps:$4 sm:$0xff]  }
 0x2d1   :  { %6408 = vmatprep.subr.bf16.mxu0 %v7765_v11 }
 0x2d4   :  { %6409 = vmatpush3.bf16.msra.mxu0 %v6762_v6  ;;  %v6806_v6 = vld [vmem:[#allocation7 + $0x70] ss:$8 sps:$4 sm:$0xff]  }
 0x2d5   :  { %6410 = vmatprep.subr.bf16.mxu0 %v7765_v11 }
 0x2d8   :  { %6411 = vmatpush3.bf16.msra.mxu0 %v6763_v49  ;;  %v6811_v49 = vld [vmem:[#allocation7 + $0x84] ss:$8 sps:$4 sm:$0xff]  }
 0x2d9   :  { %6412 = vmatprep.subr.bf16.mxu0 %v7765_v11 }
 0x2dc   :  { %6413 = vmatpush3.bf16.msra.mxu0 %v6764_v50  ;;  %v6809_v50 = vld [vmem:[#allocation7 + $0x80] ss:$8 sps:$4 sm:$0xff]  }
 0x2dd   :  { %6414 = vmatprep.subr.bf16.mxu0 %v7765_v11 }
 0x2e0   :  { %6415 = vmatpush3.bf16.msra.mxu0 %v6765_v51  ;;  %v6814_v51 = vld [vmem:[#allocation7 + $0x94] ss:$8 sps:$4 sm:$0xff]  }
 0x2e1   :  { %6416 = vmatprep.subr.bf16.mxu0 %v7765_v11 }
 0x2e4   :  { %6417 = vmatpush3.bf16.msra.mxu0 %v6766_v52  ;;  %v6812_v52 = vld [vmem:[#allocation7 + $0x90] ss:$8 sps:$4 sm:$0xff]  }
 0x2e5   :  { %6418 = vmatprep.subr.bf16.mxu0 %v7765_v11 }
 0x2e8   :  { %6419 = vmatpush3.bf16.msra.mxu0 %v6767_v53  ;;  %v6817_v53 = vld [vmem:[#allocation7 + $0xa4] ss:$8 sps:$4 sm:$0xff]  }
 0x2e9   :  { %6420 = vmatprep.subr.bf16.mxu0 %v7765_v11 }
 0x2ec   :  { %6421 = vmatpush3.bf16.msra.mxu0 %v6768_v54  ;;  %v6815_v54 = vld [vmem:[#allocation7 + $0xa0] ss:$8 sps:$4 sm:$0xff]  }
 0x2ed   :  { %6426 = vmatprep.subr.bf16.mxu0 %v7765_v11 }
 0x2ef   :  { %6423 = vmatmul.mubr.bf16.vlgmr.msra.gmra.mrb[16].mxu0 %v1291_v56  ;;  %v6818_v56 = vld [vmem:[#allocation7 + $0xb0] ss:$8 sps:$4 sm:$0xff]  }
 0x2f0   :  { %6427 = vmatpush3.bf16.msra.mxu0 %v6769_v57  ;;  %6442 = vmatprep.mubr.msk.bf16.mxu0 %vm7766_vm2, %v7765_v11  ;;  %v6823_v57 = vld [vmem:[#allocation7 + $0xc4] ss:$8 sps:$4 sm:$0xff]  }
 0x2f1   :  { %6428 = vmatprep.subr.bf16.mxu0 %v7765_v11 }
 0x2f4   :  { %6429 = vmatpush3.bf16.msra.mxu0 %v6770_v58  ;;  %v6821_v58 = vld [vmem:[#allocation7 + $0xc0] ss:$8 sps:$4 sm:$0xff]  }
 0x2f5   :  { %6430 = vmatprep.subr.bf16.mxu0 %v7765_v11 }
 0x2f8   :  { %6431 = vmatpush3.bf16.msra.mxu0 %v6771_v59  ;;  %v6826_v59 = vld [vmem:[#allocation7 + $0xd4] ss:$8 sps:$4 sm:$0xff]  }
 0x2f9   :  { %6432 = vmatprep.subr.bf16.mxu0 %v7765_v11 }
 0x2fc   :  { %6433 = vmatpush3.bf16.msra.mxu0 %v6772_v60  ;;  %v6824_v60 = vld [vmem:[#allocation7 + $0xd0] ss:$8 sps:$4 sm:$0xff]  }
 0x2fd   :  { %6434 = vmatprep.subr.bf16.mxu0 %v7765_v11 }
 0x300   :  { %6435 = vmatpush3.bf16.msra.mxu0 %v6773_v61  ;;  %v6829_v61 = vld [vmem:[#allocation7 + $0xe4] ss:$8 sps:$4 sm:$0xff]  }
 0x301   :  { %6436 = vmatprep.subr.bf16.mxu0 %v7765_v11 }
 0x304   :  { %6437 = vmatpush3.bf16.msra.mxu0 %v6774_v62  ;;  %v6827_v62 = vld [vmem:[#allocation7 + $0xe0] ss:$8 sps:$4 sm:$0xff]  }
 0x305   :  { %6438 = vmatprep.subr.bf16.mxu0 %v7765_v11 }
 0x308   :  { %6439 = vmatpush3.bf16.msra.mxu0 %v6775_v63  ;;  %v6832_v63 = vld [vmem:[#allocation7 + $0xf4] ss:$8 sps:$4 sm:$0xff]  }
 0x309   :  { %6440 = vmatprep.subr.bf16.mxu0 %v7765_v11 }
 0x30c   :  { %6441 = vmatpush3.bf16.msra.mxu0 %v6776_v0  ;;  %v6885_v0 = vld [vmem:[#allocation11 + $0x80] sm:$0xff]  }
 0x30d   :  { %6446 = vmatprep.subr.bf16.mxu0 %v7765_v11  ;;  %6467 = vmatpush3.bf16.msra.mxu1 %v6885_v0 }
 0x30e   :  { %6468 = vmatprep.subr.bf16.mxu1 %v7765_v11 }
 0x3c2   :  { %v1378_v2 = vpop.f32.mrb[16].mxu0 }
 0x3c3   :  { %v8070_v3 = vadd.f32 %v5755_v1, %v1378_v2  ;;  %v6424_v4 = vpop.f32.mrb[17].mxu0  ;;  %v6830_v1 = vld [vmem:[#allocation7 + $0xf0] ss:$8 sps:$4 sm:$0xff]   ;;  %v6837_v2 = vld [vmem:[#allocation7 + $0x104] ss:$8 sps:$4 sm:$0xff]  }
 0x3c4   :  { %v1381_v5 = vpop.f32.mrb[18].mxu0  ;;  %v8099_v4 = vld [vmem:[%s8301_s20 + $0x8] sm:$0xff] }
 0x3c5   :  { %v1385_v9 = vmul.f32 0.044715, %v8070_v3  ;;  %v6425_v10 = vpop.f32.mrb[19].mxu0  ;;  %v1384_v17 = vmul.f32 0.5, %v8070_v3  ;;  %v5795_v5 = vcombine.low %v8092_v32, %v8092_v32  ;;  %v6889_v32 = vld [vmem:[#allocation11 + $0xa0] sm:$0xff]  }
 0x3c6   :  { %v5798_v10 = vcombine.high %v8099_v4, %v8099_v4 }
 0x3c7   :  { %v1386_v12 = vmul.f32 %v1385_v9, %v8070_v3  ;;  %v6835_v9 = vld [vmem:[#allocation7 + $0x100] ss:$8 sps:$4 sm:$0xff]  }
 0x3c9   :  { %v1387_v13 = vmul.f32 %v1386_v12, %v8070_v3  ;;  %v6840_v12 = vld [vmem:[#allocation7 + $0x114] ss:$8 sps:$4 sm:$0xff]  }
 0x3cb   :  { %v1388_v14 = vadd.f32 %v1387_v13, %v8070_v3  ;;  %v6838_v13 = vld [vmem:[#allocation7 + $0x110] ss:$8 sps:$4 sm:$0xff]  }
 0x3cd   :  { %v1389_v15 = vmul.f32 0.7978846, %v1388_v14  ;;  %v6843_v14 = vld [vmem:[#allocation7 + $0x124] ss:$8 sps:$4 sm:$0xff]  }
 0x3cf   :  { %7505 = vtanh.f32 %v1389_v15  ;;  %v6841_v15 = vld [vmem:[#allocation7 + $0x120] ss:$8 sps:$4 sm:$0xff]  }
 0x3d9   :  { %v7506_v16 = vpop.eup %7505 }
 0x3da   :  { %v1391_v18 = vadd.f32 1.0, %v7506_v16  ;;  %v6846_v16 = vld [vmem:[#allocation7 + $0x134] ss:$8 sps:$4 sm:$0xff]  }
 0x3dc   :  { %v1392_v19 = vmul.f32 %v1391_v18, %v1384_v17  ;;  %v6844_v17 = vld [vmem:[#allocation7 + $0x130] ss:$8 sps:$4 sm:$0xff]   ;;  %v6849_v18 = vld [vmem:[#allocation7 + $0x144] ss:$8 sps:$4 sm:$0xff]  }
 0x3de   :  { %v1393_v21 = vpack.c.bf16 %v1392_v19, %v1392_v19  ;;  %v6847_v19 = vld [vmem:[#allocation7 + $0x140] ss:$8 sps:$4 sm:$0xff]  }
 0x3e0   :  { %6443 = vmatmul.mubr.bf16.vlgmr.msra.gmra.mrb[20].mxu0 %v1393_v21  ;;  %v6850_v21 = vld [vmem:[#allocation7 + $0x150] ss:$8 sps:$4 sm:$0xff]  }
 0x3e1   :  { %6447 = vmatpush3.bf16.msra.mxu0 %v6777_v20  ;;  %6462 = vmatprep.mubr.msk.bf16.mxu0 %vm7766_vm2, %v7765_v11  ;;  %v6852_v20 = vld [vmem:[#allocation7 + $0x154] ss:$8 sps:$4 sm:$0xff]  }
 0x3e2   :  { %6448 = vmatprep.subr.bf16.mxu0 %v7765_v11 }
 0x3e5   :  { %6449 = vmatpush3.bf16.msra.mxu0 %v6778_v22  ;;  %v6855_v22 = vld [vmem:[#allocation7 + $0x164] ss:$8 sps:$4 sm:$0xff]  }
 0x3e6   :  { %6450 = vmatprep.subr.bf16.mxu0 %v7765_v11 }
 0x3e9   :  { %6451 = vmatpush3.bf16.msra.mxu0 %v6779_v23  ;;  %v6886_v23 = vld [vmem:[#allocation11 + $0x88] sm:$0xff]  }
 0x3ea   :  { %6452 = vmatprep.subr.bf16.mxu0 %v7765_v11  ;;  %6469 = vmatpush3.bf16.msra.mxu1 %v6886_v23  ;;  %v6907_v23 = vld [vmem:[#allocation7 + $0x244] ss:$8 sps:$4 sm:$0xff]  }
 0x3eb   :  { %6470 = vmatprep.subr.bf16.mxu1 %v7765_v11 }
 0x3ed   :  { %6453 = vmatpush3.bf16.msra.mxu0 %v6780_v24  ;;  %v6853_v24 = vld [vmem:[#allocation7 + $0x160] ss:$8 sps:$4 sm:$0xff]  }
 0x3ee   :  { %6454 = vmatprep.subr.bf16.mxu0 %v7765_v11 }
 0x3f1   :  { %6455 = vmatpush3.bf16.msra.mxu0 %v6781_v25  ;;  %v6858_v25 = vld [vmem:[#allocation7 + $0x174] ss:$8 sps:$4 sm:$0xff]  }
 0x3f2   :  { %6456 = vmatprep.subr.bf16.mxu0 %v7765_v11 }
 0x3f5   :  { %6457 = vmatpush3.bf16.msra.mxu0 %v6782_v27  ;;  %v6887_v27 = vld [vmem:[#allocation11 + $0x90] sm:$0xff]  }
 0x3f6   :  { %6458 = vmatprep.subr.bf16.mxu0 %v7765_v11  ;;  %6471 = vmatpush3.bf16.msra.mxu1 %v6887_v27  ;;  %v6908_v27 = vld [vmem:[#allocation7 + $0x250] ss:$8 sps:$4 sm:$0xff]  }
 0x3f7   :  { %6472 = vmatprep.subr.bf16.mxu1 %v7765_v11 }
 0x3f9   :  { %6459 = vmatpush3.bf16.msra.mxu0 %v6783_v28  ;;  %v6856_v28 = vld [vmem:[#allocation7 + $0x170] ss:$8 sps:$4 sm:$0xff]  }
 0x3fa   :  { %6460 = vmatprep.subr.bf16.mxu0 %v7765_v11 }
 0x3fd   :  { %6461 = vmatpush3.bf16.msra.mxu0 %v6784_v29  ;;  %v6888_v29 = vld [vmem:[#allocation11 + $0x98] sm:$0xff]  }
 0x3fe   :  { %4167 = vmatprep.subr.bf16.mxu0 %v6787_v31  ;;  %v6859_v31 = vld [vmem:[#allocation7 + $0x180] ss:$8 sps:$4 sm:$0xff]   ;;  %6473 = vmatpush3.bf16.msra.mxu1 %v6888_v29 }
 0x3ff   :  { %6474 = vmatprep.subr.bf16.mxu1 %v7765_v11  ;;  %v6911_v29 = vld [vmem:[#allocation7 + $0x260] ss:$8 sps:$4 sm:$0xff]  }
 0x400   :  { %6463 = vmatmul.mubr.bf16.vlgmr.msra.gmra.mrb[24].mxu0 %v1547_v33  ;;  %v6864_v33 = vld [vmem:[#allocation7 + $0x194] ss:$8 sps:$4 sm:$0xff]  }
 0x401   :  { %4168 = vmatpush1.bf16.msra.mxu0 %v6785_v34  ;;  %4199 = vmatprep.mubr.bf16.mxu0 %v5796_v35  ;;  %v6862_v34 = vld [vmem:[#allocation7 + $0x190] ss:$8 sps:$4 sm:$0xff]   ;;  %v6890_v35 = vld [vmem:[#allocation11 + $0xa8] sm:$0xff]  }
 0x402   :  { %4169 = vmatprep.subr.bf16.mxu0 %v6790_v36  ;;  %6475 = vmatpush3.bf16.msra.mxu1 %v6889_v32  ;;  %v6867_v36 = vld [vmem:[#allocation7 + $0x1a4] ss:$8 sps:$4 sm:$0xff]  }
 0x403   :  { %6476 = vmatprep.subr.bf16.mxu1 %v7765_v11  ;;  %v6919_v32 = vld [vmem:[#allocation7 + $0x284] ss:$8 sps:$4 sm:$0xff]  }
 0x405   :  { %4170 = vmatpush1.bf16.msra.mxu0 %v6788_v37  ;;  %v6865_v37 = vld [vmem:[#allocation7 + $0x1a0] ss:$8 sps:$4 sm:$0xff]  }
 0x406   :  { %4171 = vmatprep.subr.bf16.mxu0 %v6793_v38  ;;  %6477 = vmatpush3.bf16.msra.mxu1 %v6890_v35  ;;  %v6891_v38 = vld [vmem:[#allocation11 + $0xb0] sm:$0xff]  }
 0x407   :  { %6478 = vmatprep.subr.bf16.mxu1 %v7765_v11  ;;  %v6920_v35 = vld [vmem:[#allocation7 + $0x290] ss:$8 sps:$4 sm:$0xff]  }
 0x409   :  { %4172 = vmatpush1.bf16.msra.mxu0 %v6791_v39  ;;  %v6870_v39 = vld [vmem:[#allocation7 + $0x1b4] ss:$8 sps:$4 sm:$0xff]  }
 0x40a   :  { %4173 = vmatprep.subr.bf16.mxu0 %v6796_v40  ;;  %v6868_v40 = vld [vmem:[#allocation7 + $0x1b0] ss:$8 sps:$4 sm:$0xff]   ;;  %6479 = vmatpush3.bf16.msra.mxu1 %v6891_v38  ;;  %v6928_v38 = vld [vmem:[#allocation7 + $0x2b4] ss:$8 sps:$4 sm:$0xff]  }
 0x40b   :  { %6480 = vmatprep.subr.bf16.mxu1 %v7765_v11 }
 0x40d   :  { %4174 = vmatpush1.bf16.msra.mxu0 %v6794_v41  ;;  %v6892_v41 = vld [vmem:[#allocation11 + $0xb8] sm:$0xff]  }
 0x40e   :  { %4175 = vmatprep.subr.bf16.mxu0 %v6799_v42  ;;  %v6873_v42 = vld [vmem:[#allocation7 + $0x1c4] ss:$8 sps:$4 sm:$0xff]   ;;  %6481 = vmatpush3.bf16.msra.mxu1 %v6892_v41  ;;  %v6929_v41 = vld [vmem:[#allocation7 + $0x2c0] ss:$8 sps:$4 sm:$0xff]  }
 0x411   :  { %4176 = vmatpush1.bf16.msra.mxu0 %v6797_v43  ;;  %v6895_v43 = vld [vmem:[#allocation7 + $0x204] ss:$8 sps:$4 sm:$0xff]  }
 0x412   :  { %4177 = vmatprep.subr.bf16.mxu0 %v6802_v44  ;;  %v6871_v44 = vld [vmem:[#allocation7 + $0x1c0] ss:$8 sps:$4 sm:$0xff]   ;;  %4249 = vmatprep.subr.bf16.mxu1 %v6895_v43  ;;  %v6932_v43 = vld [vmem:[#allocation7 + $0x2d0] ss:$8 sps:$4 sm:$0xff]  }
 0x415   :  { %4178 = vmatpush1.bf16.msra.mxu0 %v6800_v45  ;;  %v6876_v45 = vld [vmem:[#allocation7 + $0x1d4] ss:$8 sps:$4 sm:$0xff]  }
 0x416   :  { %4179 = vmatprep.subr.bf16.mxu0 %v6805_v46  ;;  %v6874_v46 = vld [vmem:[#allocation7 + $0x1d0] ss:$8 sps:$4 sm:$0xff]  }
 0x419   :  { %4180 = vmatpush1.bf16.msra.mxu0 %v6803_v47  ;;  %v6879_v47 = vld [vmem:[#allocation7 + $0x1e4] ss:$8 sps:$4 sm:$0xff]  }
 0x41a   :  { %4181 = vmatprep.subr.bf16.mxu0 %v6808_v48  ;;  %v6877_v48 = vld [vmem:[#allocation7 + $0x1e0] ss:$8 sps:$4 sm:$0xff]  }
 0x41d   :  { %4182 = vmatpush1.bf16.msra.mxu0 %v6806_v6  ;;  %v6882_v6 = vld [vmem:[#allocation7 + $0x1f4] ss:$8 sps:$4 sm:$0xff]  }
 0x41e   :  { %4183 = vmatprep.subr.bf16.mxu0 %v6811_v49  ;;  %v6880_v49 = vld [vmem:[#allocation7 + $0x1f0] ss:$8 sps:$4 sm:$0xff]  }
 0x421   :  { %4184 = vmatpush1.bf16.msra.mxu0 %v6809_v50  ;;  %v5797_v50 = vcombine.low %v8099_v4, %v8099_v4 }
 0x422   :  { %4185 = vmatprep.subr.bf16.mxu0 %v6814_v51  ;;  %v5764_v51 = vld [vmem:[#allocation13 + $0x5] ss:$0 sm:$0xff] }
 0x425   :  { %4186 = vmatpush1.bf16.msra.mxu0 %v6812_v52 }
 0x426   :  { %4187 = vmatprep.subr.bf16.mxu0 %v6817_v53 }
 0x429   :  { %4188 = vmatpush1.bf16.msra.mxu0 %v6815_v54 }
 0x42a   :  { %4189 = vmatprep.subr.bf16.mxu0 %v6820_v55 }
 0x42d   :  { %4190 = vmatpush1.bf16.msra.mxu0 %v6818_v56 }
 0x42e   :  { %4191 = vmatprep.subr.bf16.mxu0 %v6823_v57 }
 0x431   :  { %4192 = vmatpush1.bf16.msra.mxu0 %v6821_v58  ;;  %v5775_v58 = vld [vmem:[#allocation13 + $0x8] ss:$0 sm:$0xff] }
 0x432   :  { %4193 = vmatprep.subr.bf16.mxu0 %v6826_v59 }
 0x435   :  { %4194 = vmatpush1.bf16.msra.mxu0 %v6824_v60 }
 0x436   :  { %4195 = vmatprep.subr.bf16.mxu0 %v6829_v61 }
 0x439   :  { %4196 = vmatpush1.bf16.msra.mxu0 %v6827_v62 }
 0x43a   :  { %4197 = vmatprep.subr.bf16.mxu0 %v6832_v63 }
 0x43d   :  { %4198 = vmatpush1.bf16.msra.mxu0 %v6830_v1 }
 0x43e   :  { %4208 = vmatprep.subr.bf16.mxu0 %v6837_v2 }
 0x440   :  { %4200 = vmatmul.mubr.bf16.vlgmr.msra.gmra.mrb[12].mxu0 %v5795_v5 }
 0x441   :  { %4209 = vmatpush1.bf16.msra.mxu0 %v6835_v9  ;;  %4240 = vmatprep.mubr.bf16.mxu0 %v5798_v10 }
 0x442   :  { %4210 = vmatprep.subr.bf16.mxu0 %v6840_v12  ;;  %v8128_v12 = vld [vmem:[%s8301_s20 + $0x10] sm:$0xff] }
 0x445   :  { %4211 = vmatpush1.bf16.msra.mxu0 %v6838_v13 }
 0x446   :  { %4212 = vmatprep.subr.bf16.mxu0 %v6843_v14  ;;  %v6893_v14 = vld [vmem:[#allocation7 + $0x200] ss:$8 sps:$4 sm:$0xff]  }
 0x449   :  { %4213 = vmatpush1.bf16.msra.mxu0 %v6841_v15  ;;  %v5800_v15 = vcombine.high %v8128_v12, %v8128_v12 }
 0x44a   :  { %4214 = vmatprep.subr.bf16.mxu0 %v6846_v16 }
 0x44d   :  { %4215 = vmatpush1.bf16.msra.mxu0 %v6844_v17  ;;  %v6898_v17 = vld [vmem:[#allocation7 + $0x214] ss:$8 sps:$4 sm:$0xff]  }
 0x44e   :  { %4216 = vmatprep.subr.bf16.mxu0 %v6849_v18  ;;  %v6896_v18 = vld [vmem:[#allocation7 + $0x210] ss:$8 sps:$4 sm:$0xff]  }
 0x451   :  { %4217 = vmatpush1.bf16.msra.mxu0 %v6847_v19  ;;  %v6901_v19 = vld [vmem:[#allocation7 + $0x224] ss:$8 sps:$4 sm:$0xff]  }
 0x452   :  { %4218 = vmatprep.subr.bf16.mxu0 %v6852_v20  ;;  %v6899_v20 = vld [vmem:[#allocation7 + $0x220] ss:$8 sps:$4 sm:$0xff]  }
 0x455   :  { %4219 = vmatpush1.bf16.msra.mxu0 %v6850_v21  ;;  %v6904_v21 = vld [vmem:[#allocation7 + $0x234] ss:$8 sps:$4 sm:$0xff]  }
 0x456   :  { %4220 = vmatprep.subr.bf16.mxu0 %v6855_v22  ;;  %v6902_v22 = vld [vmem:[#allocation7 + $0x230] ss:$8 sps:$4 sm:$0xff]  }
 0x459   :  { %4221 = vmatpush1.bf16.msra.mxu0 %v6853_v24  ;;  %v6905_v24 = vld [vmem:[#allocation7 + $0x240] ss:$8 sps:$4 sm:$0xff]  }
 0x45a   :  { %4222 = vmatprep.subr.bf16.mxu0 %v6858_v25  ;;  %v6910_v25 = vld [vmem:[#allocation7 + $0x254] ss:$8 sps:$4 sm:$0xff]  }
 0x45d   :  { %4223 = vmatpush1.bf16.msra.mxu0 %v6856_v28  ;;  %v6913_v28 = vld [vmem:[#allocation7 + $0x264] ss:$8 sps:$4 sm:$0xff]  }
 0x45e   :  { %4224 = vmatprep.subr.bf16.mxu0 %v6861_v30  ;;  %v6916_v30 = vld [vmem:[#allocation7 + $0x274] ss:$8 sps:$4 sm:$0xff]  }
 0x461   :  { %4225 = vmatpush1.bf16.msra.mxu0 %v6859_v31  ;;  %v6914_v31 = vld [vmem:[#allocation7 + $0x270] ss:$8 sps:$4 sm:$0xff]  }
 0x462   :  { %4226 = vmatprep.subr.bf16.mxu0 %v6864_v33  ;;  %v6917_v33 = vld [vmem:[#allocation7 + $0x280] ss:$8 sps:$4 sm:$0xff]  }
 0x465   :  { %4227 = vmatpush1.bf16.msra.mxu0 %v6862_v34  ;;  %v6922_v34 = vld [vmem:[#allocation7 + $0x294] ss:$8 sps:$4 sm:$0xff]  }
 0x466   :  { %4228 = vmatprep.subr.bf16.mxu0 %v6867_v36  ;;  %v6925_v36 = vld [vmem:[#allocation7 + $0x2a4] ss:$8 sps:$4 sm:$0xff]  }
 0x469   :  { %4229 = vmatpush1.bf16.msra.mxu0 %v6865_v37  ;;  %v6923_v37 = vld [vmem:[#allocation7 + $0x2a0] ss:$8 sps:$4 sm:$0xff]  }
 0x46a   :  { %4230 = vmatprep.subr.bf16.mxu0 %v6870_v39  ;;  %v6926_v39 = vld [vmem:[#allocation7 + $0x2b0] ss:$8 sps:$4 sm:$0xff]  }
 0x46d   :  { %4231 = vmatpush1.bf16.msra.mxu0 %v6868_v40  ;;  %v6931_v40 = vld [vmem:[#allocation7 + $0x2c4] ss:$8 sps:$4 sm:$0xff]  }
 0x46e   :  { %4232 = vmatprep.subr.bf16.mxu0 %v6873_v42  ;;  %v6934_v42 = vld [vmem:[#allocation7 + $0x2d4] ss:$8 sps:$4 sm:$0xff]  }
 0x471   :  { %4233 = vmatpush1.bf16.msra.mxu0 %v6871_v44  ;;  %v6937_v44 = vld [vmem:[#allocation7 + $0x2e4] ss:$8 sps:$4 sm:$0xff]  }
 0x472   :  { %4234 = vmatprep.subr.bf16.mxu0 %v6876_v45  ;;  %v6935_v45 = vld [vmem:[#allocation7 + $0x2e0] ss:$8 sps:$4 sm:$0xff]  }
 0x475   :  { %4235 = vmatpush1.bf16.msra.mxu0 %v6874_v46  ;;  %v6940_v46 = vld [vmem:[#allocation7 + $0x2f4] ss:$8 sps:$4 sm:$0xff]  }
 0x476   :  { %4236 = vmatprep.subr.bf16.mxu0 %v6879_v47  ;;  %v6938_v47 = vld [vmem:[#allocation7 + $0x2f0] ss:$8 sps:$4 sm:$0xff]  }
 0x479   :  { %4237 = vmatpush1.bf16.msra.mxu0 %v6877_v48  ;;  %v6945_v48 = vld [vmem:[#allocation7 + $0x304] ss:$8 sps:$4 sm:$0xff]  }
 0x47a   :  { %4238 = vmatprep.subr.bf16.mxu0 %v6882_v6  ;;  %v8135_v6 = vld [vmem:[%s8301_s20 + $0x18] sm:$0xff] }
 0x47d   :  { %4239 = vmatpush1.bf16.msra.mxu0 %v6880_v49  ;;  %v5799_v49 = vcombine.low %v8128_v12, %v8128_v12 }
 0x480   :  { %4241 = vmatmul.mubr.bf16.vlgmr.msra.gmra.mrb[12].mxu0 %v5797_v50  ;;  %v6943_v50 = vld [vmem:[#allocation7 + $0x300] ss:$8 sps:$4 sm:$0xff]  }
 0x4b3   :  { %v1480_v52 = vpop.f32.mrb[20].mxu0 }
 0x4b4   :  { %v1481_v53 = vadd.f32 %v5764_v51, %v1480_v52  ;;  %v6444_v54 = vpop.f32.mrb[21].mxu0  ;;  %v5802_v51 = vcombine.high %v8135_v6, %v8135_v6  ;;  %v6948_v52 = vld [vmem:[#allocation7 + $0x314] ss:$8 sps:$4 sm:$0xff]  }
 0x4b5   :  { %v1483_v55 = vpop.f32.mrb[22].mxu0  ;;  %v6951_v54 = vld [vmem:[#allocation7 + $0x324] ss:$8 sps:$4 sm:$0xff]  }
 0x4b6   :  { %v6445_v56 = vpop.f32.mrb[23].mxu0  ;;  %v8115_v57 = vadd.f32 %v1481_v53, %v8070_v3  ;;  %v6946_v53 = vld [vmem:[#allocation7 + $0x310] ss:$8 sps:$4 sm:$0xff]   ;;  %v6949_v55 = vld [vmem:[#allocation7 + $0x320] ss:$8 sps:$4 sm:$0xff]  }
 0x4b7   :  { %v6954_v56 = vld [vmem:[#allocation7 + $0x334] ss:$8 sps:$4 sm:$0xff]  }
 0x4b8   :  { %1487 = vadd.xlane.f32.xlu0 %v8115_v57 }
 0x4d3   :  { %v1634_v59 = vpop.f32.mrb[24].mxu0 }
 0x4d4   :  { %v8118_v60 = vadd.f32 %v5775_v58, %v1634_v59  ;;  %v6464_v61 = vpop.f32.mrb[25].mxu0  ;;  %v6952_v58 = vld [vmem:[#allocation7 + $0x330] ss:$8 sps:$4 sm:$0xff]   ;;  %v6957_v59 = vld [vmem:[#allocation7 + $0x344] ss:$8 sps:$4 sm:$0xff]  }
 0x4d5   :  { %v1637_v62 = vpop.f32.mrb[26].mxu0  ;;  %v6955_v61 = vld [vmem:[#allocation7 + $0x340] ss:$8 sps:$4 sm:$0xff]  }
 0x4d6   :  { %v6465_v63 = vpop.f32.mrb[27].mxu0  ;;  %v1641_v0 = vmul.f32 0.044715, %v8118_v60  ;;  %v1640_v9 = vmul.f32 0.5, %v8118_v60  ;;  %v6960_v62 = vld [vmem:[#allocation7 + $0x354] ss:$8 sps:$4 sm:$0xff]  }
 0x4d7   :  { %v6958_v63 = vld [vmem:[#allocation7 + $0x350] ss:$8 sps:$4 sm:$0xff]  }
 0x4d8   :  { %v1642_v1 = vmul.f32 %v1641_v0, %v8118_v60  ;;  %v6963_v0 = vld [vmem:[#allocation7 + $0x364] ss:$8 sps:$4 sm:$0xff]  }
 0x4da   :  { %v1643_v2 = vmul.f32 %v1642_v1, %v8118_v60  ;;  %v6961_v1 = vld [vmem:[#allocation7 + $0x360] ss:$8 sps:$4 sm:$0xff]  }
 0x4dc   :  { %v1644_v4 = vadd.f32 %v1643_v2, %v8118_v60  ;;  %v6966_v2 = vld [vmem:[#allocation7 + $0x374] ss:$8 sps:$4 sm:$0xff]  }
 0x4de   :  { %v1645_v5 = vmul.f32 0.7978846, %v1644_v4  ;;  %v6964_v4 = vld [vmem:[#allocation7 + $0x370] ss:$8 sps:$4 sm:$0xff]  }
 0x4e0   :  { %7507 = vtanh.f32 %v1645_v5  ;;  %v6969_v5 = vld [vmem:[#allocation7 + $0x384] ss:$8 sps:$4 sm:$0xff]  }
 0x4ea   :  { %v7508_v3 = vpop.eup %7507 }
 0x4eb   :  { %v1647_v10 = vadd.f32 1.0, %v7508_v3  ;;  %v6967_v3 = vld [vmem:[#allocation7 + $0x380] ss:$8 sps:$4 sm:$0xff]  }
 0x4ed   :  { %v1648_v13 = vmul.f32 %v1647_v10, %v1640_v9  ;;  %v6972_v9 = vld [vmem:[#allocation7 + $0x394] ss:$8 sps:$4 sm:$0xff]   ;;  %v6970_v10 = vld [vmem:[#allocation7 + $0x390] ss:$8 sps:$4 sm:$0xff]  }
 0x4ef   :  { %v1649_v16 = vpack.c.bf16 %v1648_v13, %v1648_v13  ;;  %v6975_v13 = vld [vmem:[#allocation7 + $0x3a4] ss:$8 sps:$4 sm:$0xff]  }
 0x4f1   :  { %6483 = vmatmul.mubr.bf16.vlgmr.msra.gmra.mrb[0].mxu1 %v1649_v16 }
 0x4f2   :  { %4250 = vmatpush1.bf16.msra.mxu1 %v6893_v14  ;;  %4281 = vmatprep.mubr.bf16.mxu1 %v5800_v15 }
 0x4f3   :  { %4251 = vmatprep.subr.bf16.mxu1 %v6898_v17  ;;  %v6973_v17 = vld [vmem:[#allocation7 + $0x3a0] ss:$8 sps:$4 sm:$0xff]  }
 0x4f6   :  { %4252 = vmatpush1.bf16.msra.mxu1 %v6896_v18  ;;  %v6978_v18 = vld [vmem:[#allocation7 + $0x3b4] ss:$8 sps:$4 sm:$0xff]  }
 0x4f7   :  { %4253 = vmatprep.subr.bf16.mxu1 %v6901_v19  ;;  %v6976_v19 = vld [vmem:[#allocation7 + $0x3b0] ss:$8 sps:$4 sm:$0xff]  }
 0x4fa   :  { %4254 = vmatpush1.bf16.msra.mxu1 %v6899_v20  ;;  %v6981_v20 = vld [vmem:[#allocation7 + $0x3c4] ss:$8 sps:$4 sm:$0xff]  }
 0x4fb   :  { %4255 = vmatprep.subr.bf16.mxu1 %v6904_v21  ;;  %v6979_v21 = vld [vmem:[#allocation7 + $0x3c0] ss:$8 sps:$4 sm:$0xff]  }
 0x4fe   :  { %4256 = vmatpush1.bf16.msra.mxu1 %v6902_v22  ;;  %v6984_v22 = vld [vmem:[#allocation7 + $0x3d4] ss:$8 sps:$4 sm:$0xff]  }
 0x4ff   :  { %4257 = vmatprep.subr.bf16.mxu1 %v6907_v23  ;;  %v6982_v23 = vld [vmem:[#allocation7 + $0x3d0] ss:$8 sps:$4 sm:$0xff]  }
 0x502   :  { %4258 = vmatpush1.bf16.msra.mxu1 %v6905_v24  ;;  %v6987_v24 = vld [vmem:[#allocation7 + $0x3e4] ss:$8 sps:$4 sm:$0xff]  }
 0x503   :  { %4259 = vmatprep.subr.bf16.mxu1 %v6910_v25  ;;  %v6985_v25 = vld [vmem:[#allocation7 + $0x3e0] ss:$8 sps:$4 sm:$0xff]  }
 0x506   :  { %4260 = vmatpush1.bf16.msra.mxu1 %v6908_v27  ;;  %v6990_v27 = vld [vmem:[#allocation7 + $0x3f4] ss:$8 sps:$4 sm:$0xff]  }
 0x507   :  { %4261 = vmatprep.subr.bf16.mxu1 %v6913_v28  ;;  %v6988_v28 = vld [vmem:[#allocation7 + $0x3f0] ss:$8 sps:$4 sm:$0xff]  }
 0x50a   :  { %4262 = vmatpush1.bf16.msra.mxu1 %v6911_v29  ;;  %v6995_v29 = vld [vmem:[#allocation7 + $0x404] ss:$8 sps:$4 sm:$0xff]  }
 0x50b   :  { %4263 = vmatprep.subr.bf16.mxu1 %v6916_v30  ;;  %v8148_v30 = vld [vmem:[%s8301_s20 + $0x20] sm:$0xff] }
 0x50e   :  { %4264 = vmatpush1.bf16.msra.mxu1 %v6914_v31  ;;  %v5801_v31 = vcombine.low %v8135_v6, %v8135_v6  ;;  %v7017_v6 = vld [vmem:[#allocation7 + $0x480] ss:$8 sps:$4 sm:$0xff]  }
 0x50f   :  { %4265 = vmatprep.subr.bf16.mxu1 %v6919_v32  ;;  %v6993_v32 = vld [vmem:[#allocation7 + $0x400] ss:$8 sps:$4 sm:$0xff]  }
 0x512   :  { %4266 = vmatpush1.bf16.msra.mxu1 %v6917_v33  ;;  %v5804_v33 = vcombine.high %v8148_v30, %v8148_v30 }
 0x513   :  { %4267 = vmatprep.subr.bf16.mxu1 %v6922_v34  ;;  %v6998_v34 = vld [vmem:[#allocation7 + $0x414] ss:$8 sps:$4 sm:$0xff]  }
 0x516   :  { %4268 = vmatpush1.bf16.msra.mxu1 %v6920_v35  ;;  %v6996_v35 = vld [vmem:[#allocation7 + $0x410] ss:$8 sps:$4 sm:$0xff]  }
 0x517   :  { %4269 = vmatprep.subr.bf16.mxu1 %v6925_v36  ;;  %v7001_v36 = vld [vmem:[#allocation7 + $0x424] ss:$8 sps:$4 sm:$0xff]  }
 0x51a   :  { %4270 = vmatpush1.bf16.msra.mxu1 %v6923_v37  ;;  %v6999_v37 = vld [vmem:[#allocation7 + $0x420] ss:$8 sps:$4 sm:$0xff]  }
 0x51b   :  { %4271 = vmatprep.subr.bf16.mxu1 %v6928_v38  ;;  %v7004_v38 = vld [vmem:[#allocation7 + $0x434] ss:$8 sps:$4 sm:$0xff]  }
 0x51e   :  { %4272 = vmatpush1.bf16.msra.mxu1 %v6926_v39  ;;  %v7002_v39 = vld [vmem:[#allocation7 + $0x430] ss:$8 sps:$4 sm:$0xff]  }
 0x51f   :  { %4273 = vmatprep.subr.bf16.mxu1 %v6931_v40  ;;  %v7007_v40 = vld [vmem:[#allocation7 + $0x444] ss:$8 sps:$4 sm:$0xff]  }
 0x522   :  { %4274 = vmatpush1.bf16.msra.mxu1 %v6929_v41  ;;  %v7005_v41 = vld [vmem:[#allocation7 + $0x440] ss:$8 sps:$4 sm:$0xff]  }
 0x523   :  { %4275 = vmatprep.subr.bf16.mxu1 %v6934_v42  ;;  %v7010_v42 = vld [vmem:[#allocation7 + $0x454] ss:$8 sps:$4 sm:$0xff]  }
 0x526   :  { %4276 = vmatpush1.bf16.msra.mxu1 %v6932_v43  ;;  %v7008_v43 = vld [vmem:[#allocation7 + $0x450] ss:$8 sps:$4 sm:$0xff]  }
 0x527   :  { %4277 = vmatprep.subr.bf16.mxu1 %v6937_v44  ;;  %v7013_v44 = vld [vmem:[#allocation7 + $0x464] ss:$8 sps:$4 sm:$0xff]  }
 0x52a   :  { %4278 = vmatpush1.bf16.msra.mxu1 %v6935_v45  ;;  %v7011_v45 = vld [vmem:[#allocation7 + $0x460] ss:$8 sps:$4 sm:$0xff]  }
 0x52b   :  { %4279 = vmatprep.subr.bf16.mxu1 %v6940_v46  ;;  %v7016_v46 = vld [vmem:[#allocation7 + $0x474] ss:$8 sps:$4 sm:$0xff]  }
 0x52e   :  { %4280 = vmatpush1.bf16.msra.mxu1 %v6938_v47  ;;  %v7014_v47 = vld [vmem:[#allocation7 + $0x470] ss:$8 sps:$4 sm:$0xff]  }
 0x52f   :  { %4290 = vmatprep.subr.bf16.mxu1 %v6945_v48  ;;  %v7019_v48 = vld [vmem:[#allocation7 + $0x484] ss:$8 sps:$4 sm:$0xff]  }
 0x531   :  { %4282 = vmatmul.mubr.bf16.vlgmr.msra.gmra.mrb[4].mxu1 %v5799_v49  ;;  %v7022_v49 = vld [vmem:[#allocation7 + $0x494] ss:$8 sps:$4 sm:$0xff]  }
 0x532   :  { %4291 = vmatpush1.bf16.msra.mxu1 %v6943_v50  ;;  %4322 = vmatprep.mubr.bf16.mxu1 %v5802_v51  ;;  %v7020_v50 = vld [vmem:[#allocation7 + $0x490] ss:$8 sps:$4 sm:$0xff]   ;;  %v7025_v51 = vld [vmem:[#allocation7 + $0x4a4] ss:$8 sps:$4 sm:$0xff]  }
 0x533   :  { %4292 = vmatprep.subr.bf16.mxu1 %v6948_v52  ;;  %v7023_v52 = vld [vmem:[#allocation7 + $0x4a0] ss:$8 sps:$4 sm:$0xff]  }
 0x536   :  { %4293 = vmatpush1.bf16.msra.mxu1 %v6946_v53  ;;  %v7028_v53 = vld [vmem:[#allocation7 + $0x4b4] ss:$8 sps:$4 sm:$0xff]  }
 0x537   :  { %4294 = vmatprep.subr.bf16.mxu1 %v6951_v54  ;;  %v7026_v54 = vld [vmem:[#allocation7 + $0x4b0] ss:$8 sps:$4 sm:$0xff]  }
 0x53a   :  { %4295 = vmatpush1.bf16.msra.mxu1 %v6949_v55  ;;  %v7031_v55 = vld [vmem:[#allocation7 + $0x4c4] ss:$8 sps:$4 sm:$0xff]  }
 0x53b   :  { %4296 = vmatprep.subr.bf16.mxu1 %v6954_v56  ;;  %v7029_v56 = vld [vmem:[#allocation7 + $0x4c0] ss:$8 sps:$4 sm:$0xff]  }
 0x53e   :  { %4297 = vmatpush1.bf16.msra.mxu1 %v6952_v58  ;;  %v7034_v58 = vld [vmem:[#allocation7 + $0x4d4] ss:$8 sps:$4 sm:$0xff]  }
 0x53f   :  { %4298 = vmatprep.subr.bf16.mxu1 %v6957_v59  ;;  %v7032_v59 = vld [vmem:[#allocation7 + $0x4d0] ss:$8 sps:$4 sm:$0xff]  }
 0x542   :  { %4299 = vmatpush1.bf16.msra.mxu1 %v6955_v61  ;;  %v7037_v61 = vld [vmem:[#allocation7 + $0x4e4] ss:$8 sps:$4 sm:$0xff]  }
 0x543   :  { %4300 = vmatprep.subr.bf16.mxu1 %v6960_v62  ;;  %v7035_v62 = vld [vmem:[#allocation7 + $0x4e0] ss:$8 sps:$4 sm:$0xff]  }
 0x546   :  { %4301 = vmatpush1.bf16.msra.mxu1 %v6958_v63  ;;  %v7040_v63 = vld [vmem:[#allocation7 + $0x4f4] ss:$8 sps:$4 sm:$0xff]  }
 0x547   :  { %4302 = vmatprep.subr.bf16.mxu1 %v6963_v0  ;;  %v7038_v0 = vld [vmem:[#allocation7 + $0x4f0] ss:$8 sps:$4 sm:$0xff]  }
 0x54a   :  { %4303 = vmatpush1.bf16.msra.mxu1 %v6961_v1  ;;  %v7045_v1 = vld [vmem:[#allocation7 + $0x504] ss:$8 sps:$4 sm:$0xff]  }
 0x54b   :  { %4304 = vmatprep.subr.bf16.mxu1 %v6966_v2  ;;  %v8157_v2 = vld [vmem:[%s8301_s20 + $0x28] sm:$0xff] }
 0x54e   :  { %4305 = vmatpush1.bf16.msra.mxu1 %v6964_v4  ;;  %v5803_v4 = vcombine.low %v8148_v30, %v8148_v30 }
 0x54f   :  { %4306 = vmatprep.subr.bf16.mxu1 %v6969_v5  ;;  %v7043_v5 = vld [vmem:[#allocation7 + $0x500] ss:$8 sps:$4 sm:$0xff]  }
 0x552   :  { %4307 = vmatpush1.bf16.msra.mxu1 %v6967_v3  ;;  %v5806_v3 = vcombine.high %v8157_v2, %v8157_v2 }
 0x553   :  { %v8141_v12 = vpop.f32.mrb[12].mxu0  ;;  %4308 = vmatprep.subr.bf16.mxu1 %v6972_v9  ;;  %v7048_v9 = vld [vmem:[#allocation7 + $0x514] ss:$8 sps:$4 sm:$0xff]  }
 0x554   :  { %v8143_v14 = vpop.f32.mrb[13].mxu0 }
 0x555   :  { %v4246_v15 = vpop.f32.mrb[14].mxu0 }
 0x556   :  { %4309 = vmatpush1.bf16.msra.mxu1 %v6970_v10  ;;  %v4247_v16 = vpop.f32.mrb[15].mxu0  ;;  %v7046_v10 = vld [vmem:[#allocation7 + $0x510] ss:$8 sps:$4 sm:$0xff]   ;;  %v7049_v15 = vld [vmem:[#allocation7 + $0x520] ss:$8 sps:$4 sm:$0xff]  }
 0x557   :  { %4310 = vmatprep.subr.bf16.mxu1 %v6975_v13  ;;  %v7051_v13 = vld [vmem:[#allocation7 + $0x524] ss:$8 sps:$4 sm:$0xff]   ;;  %v7054_v16 = vld [vmem:[#allocation7 + $0x534] ss:$8 sps:$4 sm:$0xff]  }
 0x55a   :  { %4311 = vmatpush1.bf16.msra.mxu1 %v6973_v17  ;;  %v7052_v17 = vld [vmem:[#allocation7 + $0x530] ss:$8 sps:$4 sm:$0xff]  }
 0x55b   :  { %4312 = vmatprep.subr.bf16.mxu1 %v6978_v18  ;;  %v7057_v18 = vld [vmem:[#allocation7 + $0x544] ss:$8 sps:$4 sm:$0xff]  }
 0x55e   :  { %4313 = vmatpush1.bf16.msra.mxu1 %v6976_v19  ;;  %v7055_v19 = vld [vmem:[#allocation7 + $0x540] ss:$8 sps:$4 sm:$0xff]  }
 0x55f   :  { %4314 = vmatprep.subr.bf16.mxu1 %v6981_v20  ;;  %v7060_v20 = vld [vmem:[#allocation7 + $0x554] ss:$8 sps:$4 sm:$0xff]  }
 0x562   :  { %4315 = vmatpush1.bf16.msra.mxu1 %v6979_v21  ;;  %v1488_v21 = vpop.xlane.xlu0 %1487 }
 0x563   :  { %4316 = vmatprep.subr.bf16.mxu1 %v6984_v22  ;;  %v5784_v22 = vld [vmem:[#allocation13 + $0x9] ss:$0 sm:$0xff] }
 0x566   :  { %4317 = vmatpush1.bf16.msra.mxu1 %v6982_v23  ;;  %v7058_v23 = vld [vmem:[#allocation7 + $0x550] ss:$8 sps:$4 sm:$0xff]  }
 0x567   :  { %4318 = vmatprep.subr.bf16.mxu1 %v6987_v24  ;;  %v1490_v24 = vmul.f32 0.0078125, %v1488_v21  ;;  %v7126_v21 = vld [vmem:[#allocation7 + $0x6b0] ss:$8 sps:$4 sm:$0xff]  }
 0x56a   :  { %4319 = vmatpush1.bf16.msra.mxu1 %v6985_v25  ;;  %v7063_v25 = vld [vmem:[#allocation7 + $0x564] ss:$8 sps:$4 sm:$0xff]  }
 0x56b   :  { %4320 = vmatprep.subr.bf16.mxu1 %v6990_v27 }
 0x56e   :  { %4321 = vmatpush1.bf16.msra.mxu1 %v6988_v28 }
 0x56f   :  { %4331 = vmatprep.subr.bf16.mxu1 %v6995_v29 }
 0x571   :  { %4323 = vmatmul.mubr.bf16.vlgmr.msra.gmra.mrb[4].mxu1 %v5801_v31  ;;  %v7061_v31 = vld [vmem:[#allocation7 + $0x560] ss:$8 sps:$4 sm:$0xff]  }
 0x572   :  { %4332 = vmatpush1.bf16.msra.mxu1 %v6993_v32  ;;  %4363 = vmatprep.mubr.bf16.mxu1 %v5804_v33  ;;  %v8164_v32 = vsub.f32 %v8115_v57, %v1490_v24  ;;  %v7072_v57 = vld [vmem:[#allocation7 + $0x594] ss:$8 sps:$4 sm:$0xff]  }
 0x573   :  { %4333 = vmatprep.subr.bf16.mxu1 %v6998_v34  ;;  %v7134_v24 = vld [vmem:[#allocation7 + $0x6d4] ss:$8 sps:$4 sm:$0xff]  }
 0x576   :  { %4334 = vmatpush1.bf16.msra.mxu1 %v6996_v35  ;;  %v7066_v35 = vld [vmem:[#allocation7 + $0x574] ss:$8 sps:$4 sm:$0xff]  }
 0x577   :  { %4335 = vmatprep.subr.bf16.mxu1 %v7001_v36  ;;  %v7064_v36 = vld [vmem:[#allocation7 + $0x570] ss:$8 sps:$4 sm:$0xff]  }
 0x57a   :  { %4336 = vmatpush1.bf16.msra.mxu1 %v6999_v37  ;;  %v1492_v37 = vmul.f32 %v8164_v32, %v8164_v32 }
 0x57b   :  { %4337 = vmatprep.subr.bf16.mxu1 %v7004_v38  ;;  %v7069_v38 = vld [vmem:[#allocation7 + $0x584] ss:$8 sps:$4 sm:$0xff]  }
 0x57e   :  { %4338 = vmatpush1.bf16.msra.mxu1 %v7002_v39  ;;  %v7067_v39 = vld [vmem:[#allocation7 + $0x580] ss:$8 sps:$4 sm:$0xff]  }
 0x57f   :  { %4339 = vmatprep.subr.bf16.mxu1 %v7007_v40  ;;  %v7070_v40 = vld [vmem:[#allocation7 + $0x590] ss:$8 sps:$4 sm:$0xff]  }
 0x582   :  { %4340 = vmatpush1.bf16.msra.mxu1 %v7005_v41  ;;  %v7073_v41 = vld [vmem:[#allocation7 + $0x5a0] ss:$8 sps:$4 sm:$0xff]  }
 0x583   :  { %4341 = vmatprep.subr.bf16.mxu1 %v7010_v42  ;;  %v7078_v42 = vld [vmem:[#allocation7 + $0x5b4] ss:$8 sps:$4 sm:$0xff]  }
 0x586   :  { %4342 = vmatpush1.bf16.msra.mxu1 %v7008_v43  ;;  %v7076_v43 = vld [vmem:[#allocation7 + $0x5b0] ss:$8 sps:$4 sm:$0xff]  }
 0x587   :  { %4343 = vmatprep.subr.bf16.mxu1 %v7013_v44  ;;  %v7081_v44 = vld [vmem:[#allocation7 + $0x5c4] ss:$8 sps:$4 sm:$0xff]  }
 0x58a   :  { %4344 = vmatpush1.bf16.msra.mxu1 %v7011_v45  ;;  %v7079_v45 = vld [vmem:[#allocation7 + $0x5c0] ss:$8 sps:$4 sm:$0xff]  }
 0x58b   :  { %4345 = vmatprep.subr.bf16.mxu1 %v7016_v46  ;;  %v7084_v46 = vld [vmem:[#allocation7 + $0x5d4] ss:$8 sps:$4 sm:$0xff]  }
 0x58e   :  { %4346 = vmatpush1.bf16.msra.mxu1 %v7014_v47  ;;  %v7082_v47 = vld [vmem:[#allocation7 + $0x5d0] ss:$8 sps:$4 sm:$0xff]  }
 0x58f   :  { %4347 = vmatprep.subr.bf16.mxu1 %v7019_v48  ;;  %v7087_v48 = vld [vmem:[#allocation7 + $0x5e4] ss:$8 sps:$4 sm:$0xff]  }
 0x592   :  { %4348 = vmatpush1.bf16.msra.mxu1 %v7017_v6  ;;  %v7085_v6 = vld [vmem:[#allocation7 + $0x5e0] ss:$8 sps:$4 sm:$0xff]  }
 0x593   :  { %4349 = vmatprep.subr.bf16.mxu1 %v7022_v49  ;;  %v7090_v49 = vld [vmem:[#allocation7 + $0x5f4] ss:$8 sps:$4 sm:$0xff]  }
 0x596   :  { %4350 = vmatpush1.bf16.msra.mxu1 %v7020_v50  ;;  %v7088_v50 = vld [vmem:[#allocation7 + $0x5f0] ss:$8 sps:$4 sm:$0xff]  }
 0x597   :  { %4351 = vmatprep.subr.bf16.mxu1 %v7025_v51  ;;  %v7095_v51 = vld [vmem:[#allocation7 + $0x604] ss:$8 sps:$4 sm:$0xff]  }
 0x59a   :  { %4352 = vmatpush1.bf16.msra.mxu1 %v7023_v52  ;;  %v8175_v52 = vld [vmem:[%s8301_s20 + $0x30] sm:$0xff] }
 0x59b   :  { %4353 = vmatprep.subr.bf16.mxu1 %v7028_v53  ;;  %v5805_v53 = vcombine.low %v8157_v2, %v8157_v2  ;;  %v7110_v2 = vld [vmem:[#allocation7 + $0x654] ss:$8 sps:$4 sm:$0xff]  }
 0x59e   :  { %4354 = vmatpush1.bf16.msra.mxu1 %v7026_v54  ;;  %v7093_v54 = vld [vmem:[#allocation7 + $0x600] ss:$8 sps:$4 sm:$0xff]  }
 0x59f   :  { %4355 = vmatprep.subr.bf16.mxu1 %v7031_v55  ;;  %v5808_v55 = vcombine.high %v8175_v52, %v8175_v52 }
 0x5a2   :  { %4356 = vmatpush1.bf16.msra.mxu1 %v7029_v56  ;;  %v7098_v56 = vld [vmem:[#allocation7 + $0x614] ss:$8 sps:$4 sm:$0xff]  }
 0x5a3   :  { %4357 = vmatprep.subr.bf16.mxu1 %v7034_v58  ;;  %v7096_v58 = vld [vmem:[#allocation7 + $0x610] ss:$8 sps:$4 sm:$0xff]  }
 0x5a6   :  { %4358 = vmatpush1.bf16.msra.mxu1 %v7032_v59  ;;  %v7101_v59 = vld [vmem:[#allocation7 + $0x624] ss:$8 sps:$4 sm:$0xff]  }
 0x5a7   :  { %4359 = vmatprep.subr.bf16.mxu1 %v7037_v61  ;;  %v7099_v61 = vld [vmem:[#allocation7 + $0x620] ss:$8 sps:$4 sm:$0xff]  }
 0x5aa   :  { %4360 = vmatpush1.bf16.msra.mxu1 %v7035_v62  ;;  %v7104_v62 = vld [vmem:[#allocation7 + $0x634] ss:$8 sps:$4 sm:$0xff]  }
 0x5ab   :  { %4361 = vmatprep.subr.bf16.mxu1 %v7040_v63  ;;  %v7102_v63 = vld [vmem:[#allocation7 + $0x630] ss:$8 sps:$4 sm:$0xff]  }
 0x5ae   :  { %4362 = vmatpush1.bf16.msra.mxu1 %v7038_v0  ;;  %v7107_v0 = vld [vmem:[#allocation7 + $0x644] ss:$8 sps:$4 sm:$0xff]  }
 0x5af   :  { %4372 = vmatprep.subr.bf16.mxu1 %v7045_v1  ;;  %v7105_v1 = vld [vmem:[#allocation7 + $0x640] ss:$8 sps:$4 sm:$0xff]  }
 0x5b1   :  { %4364 = vmatmul.mubr.bf16.vlgmr.msra.gmra.mrb[4].mxu1 %v5803_v4  ;;  %v7108_v4 = vld [vmem:[#allocation7 + $0x650] ss:$8 sps:$4 sm:$0xff]  }
 0x5b2   :  { %4373 = vmatpush1.bf16.msra.mxu1 %v7043_v5  ;;  %4404 = vmatprep.mubr.bf16.mxu1 %v5806_v3  ;;  %v7113_v5 = vld [vmem:[#allocation7 + $0x664] ss:$8 sps:$4 sm:$0xff]   ;;  %v7111_v3 = vld [vmem:[#allocation7 + $0x660] ss:$8 sps:$4 sm:$0xff]  }
 0x5b3   :  { %4374 = vmatprep.subr.bf16.mxu1 %v7048_v9  ;;  %v7116_v9 = vld [vmem:[#allocation7 + $0x674] ss:$8 sps:$4 sm:$0xff]  }
 0x5b6   :  { %4375 = vmatpush1.bf16.msra.mxu1 %v7046_v10  ;;  %v7114_v10 = vld [vmem:[#allocation7 + $0x670] ss:$8 sps:$4 sm:$0xff]  }
 0x5b7   :  { %4376 = vmatprep.subr.bf16.mxu1 %v7051_v13  ;;  %v7119_v13 = vld [vmem:[#allocation7 + $0x684] ss:$8 sps:$4 sm:$0xff]  }
 0x5ba   :  { %4377 = vmatpush1.bf16.msra.mxu1 %v7049_v15  ;;  %v7117_v15 = vld [vmem:[#allocation7 + $0x680] ss:$8 sps:$4 sm:$0xff]  }
 0x5bb   :  { %4378 = vmatprep.subr.bf16.mxu1 %v7054_v16  ;;  %v7122_v16 = vld [vmem:[#allocation7 + $0x694] ss:$8 sps:$4 sm:$0xff]  }
 0x5be   :  { %4379 = vmatpush1.bf16.msra.mxu1 %v7052_v17  ;;  %v7120_v17 = vld [vmem:[#allocation7 + $0x690] ss:$8 sps:$4 sm:$0xff]  }
 0x5bf   :  { %4380 = vmatprep.subr.bf16.mxu1 %v7057_v18  ;;  %v7125_v18 = vld [vmem:[#allocation7 + $0x6a4] ss:$8 sps:$4 sm:$0xff]  }
 0x5c2   :  { %4381 = vmatpush1.bf16.msra.mxu1 %v7055_v19  ;;  %v7123_v19 = vld [vmem:[#allocation7 + $0x6a0] ss:$8 sps:$4 sm:$0xff]  }
 0x5c3   :  { %4382 = vmatprep.subr.bf16.mxu1 %v7060_v20  ;;  %v7128_v20 = vld [vmem:[#allocation7 + $0x6b4] ss:$8 sps:$4 sm:$0xff]  }
 0x5c4   :  { %v1736_v27 = vpop.f32.mrb[0].mxu1 }
 0x5c5   :  { %v1737_v28 = vadd.f32 %v5784_v22, %v1736_v27  ;;  %v6484_v29 = vpop.f32.mrb[1].mxu1  ;;  %v7131_v22 = vld [vmem:[#allocation7 + $0x6c4] ss:$8 sps:$4 sm:$0xff]  }
 0x5c6   :  { %4383 = vmatpush1.bf16.msra.mxu1 %v7058_v23  ;;  %v1739_v30 = vpop.f32.mrb[2].mxu1  ;;  %v7129_v23 = vld [vmem:[#allocation7 + $0x6c0] ss:$8 sps:$4 sm:$0xff]   ;;  %v7137_v27 = vld [vmem:[#allocation7 + $0x6e4] ss:$8 sps:$4 sm:$0xff]  }
 0x5c7   :  { %v6485_v33 = vpop.f32.mrb[3].mxu1  ;;  %4384 = vmatprep.subr.bf16.mxu1 %v7063_v25  ;;  %v8167_v34 = vadd.f32 %v1737_v28, %v8118_v60  ;;  %v7075_v60 = vld [vmem:[#allocation7 + $0x5a4] ss:$8 sps:$4 sm:$0xff]   ;;  %v7132_v25 = vld [vmem:[#allocation7 + $0x6d0] ss:$8 sps:$4 sm:$0xff]  }
 0x5c8   :  { %v7135_v28 = vld [vmem:[#allocation7 + $0x6e0] ss:$8 sps:$4 sm:$0xff]   ;;  %v7140_v29 = vld [vmem:[#allocation7 + $0x6f4] ss:$8 sps:$4 sm:$0xff]   ;;  %v7138_v30 = vld [vmem:[#allocation7 + $0x6f0] ss:$8 sps:$4 sm:$0xff]  }
 0x5c9   :  { %1743 = vadd.xlane.f32.xlu1 %v8167_v34  ;;  %v8184_v33 = vld [vmem:[%s8301_s20 + $0x38] sm:$0xff] }
 0x5ca   :  { %4385 = vmatpush1.bf16.msra.mxu1 %v7061_v31  ;;  %v7145_v31 = vld [vmem:[#allocation7 + $0x704] ss:$8 sps:$4 sm:$0xff]  }
 0x5cb   :  { %4386 = vmatprep.subr.bf16.mxu1 %v7066_v35  ;;  %v5807_v35 = vcombine.low %v8175_v52, %v8175_v52  ;;  %v7170_v52 = vld [vmem:[#allocation7 + $0x790] ss:$8 sps:$4 sm:$0xff]  }
 0x5cd   :  { %1493 = vadd.xlane.f32.xlu1 %v1492_v37  ;;  %v5810_v37 = vcombine.high %v8184_v33, %v8184_v33 }
 0x5ce   :  { %4387 = vmatpush1.bf16.msra.mxu1 %v7064_v36  ;;  %v7143_v36 = vld [vmem:[#allocation7 + $0x700] ss:$8 sps:$4 sm:$0xff]  }
 0x5cf   :  { %4388 = vmatprep.subr.bf16.mxu1 %v7069_v38  ;;  %v7148_v38 = vld [vmem:[#allocation7 + $0x714] ss:$8 sps:$4 sm:$0xff]  }
 0x5d2   :  { %4389 = vmatpush1.bf16.msra.mxu1 %v7067_v39  ;;  %v7146_v39 = vld [vmem:[#allocation7 + $0x710] ss:$8 sps:$4 sm:$0xff]  }
 0x5d3   :  { %4390 = vmatprep.subr.bf16.mxu1 %v7072_v57  ;;  %v7151_v57 = vld [vmem:[#allocation7 + $0x724] ss:$8 sps:$4 sm:$0xff]  }
 0x5d6   :  { %4391 = vmatpush1.bf16.msra.mxu1 %v7070_v40  ;;  %v7149_v40 = vld [vmem:[#allocation7 + $0x720] ss:$8 sps:$4 sm:$0xff]  }
 0x5d7   :  { %4392 = vmatprep.subr.bf16.mxu1 %v7075_v60  ;;  %v7154_v60 = vld [vmem:[#allocation7 + $0x734] ss:$8 sps:$4 sm:$0xff]  }
 0x5da   :  { %4393 = vmatpush1.bf16.msra.mxu1 %v7073_v41  ;;  %v7152_v41 = vld [vmem:[#allocation7 + $0x730] ss:$8 sps:$4 sm:$0xff]  }
 0x5db   :  { %4394 = vmatprep.subr.bf16.mxu1 %v7078_v42  ;;  %v7157_v42 = vld [vmem:[#allocation7 + $0x744] ss:$8 sps:$4 sm:$0xff]  }
 0x5de   :  { %4395 = vmatpush1.bf16.msra.mxu1 %v7076_v43  ;;  %v7155_v43 = vld [vmem:[#allocation7 + $0x740] ss:$8 sps:$4 sm:$0xff]  }
 0x5df   :  { %4396 = vmatprep.subr.bf16.mxu1 %v7081_v44  ;;  %v7160_v44 = vld [vmem:[#allocation7 + $0x754] ss:$8 sps:$4 sm:$0xff]  }
 0x5e2   :  { %4397 = vmatpush1.bf16.msra.mxu1 %v7079_v45  ;;  %v7158_v45 = vld [vmem:[#allocation7 + $0x750] ss:$8 sps:$4 sm:$0xff]  }
 0x5e3   :  { %4398 = vmatprep.subr.bf16.mxu1 %v7084_v46  ;;  %v7163_v46 = vld [vmem:[#allocation7 + $0x764] ss:$8 sps:$4 sm:$0xff]  }
 0x5e6   :  { %4399 = vmatpush1.bf16.msra.mxu1 %v7082_v47  ;;  %v7161_v47 = vld [vmem:[#allocation7 + $0x760] ss:$8 sps:$4 sm:$0xff]  }
 0x5e7   :  { %4400 = vmatprep.subr.bf16.mxu1 %v7087_v48  ;;  %v7166_v48 = vld [vmem:[#allocation7 + $0x774] ss:$8 sps:$4 sm:$0xff]  }
 0x5ea   :  { %4401 = vmatpush1.bf16.msra.mxu1 %v7085_v6  ;;  %v7164_v6 = vld [vmem:[#allocation7 + $0x770] ss:$8 sps:$4 sm:$0xff]  }
 0x5eb   :  { %4402 = vmatprep.subr.bf16.mxu1 %v7090_v49  ;;  %v7169_v49 = vld [vmem:[#allocation7 + $0x784] ss:$8 sps:$4 sm:$0xff]  }
 0x5ee   :  { %4403 = vmatpush1.bf16.msra.mxu1 %v7088_v50  ;;  %v7167_v50 = vld [vmem:[#allocation7 + $0x780] ss:$8 sps:$4 sm:$0xff]  }
 0x5ef   :  { %4413 = vmatprep.subr.bf16.mxu1 %v7095_v51  ;;  %v7172_v51 = vld [vmem:[#allocation7 + $0x794] ss:$8 sps:$4 sm:$0xff]  }
 0x5f1   :  { %4405 = vmatmul.mubr.bf16.vlgmr.msra.gmra.mrb[4].mxu1 %v5805_v53  ;;  %v7175_v53 = vld [vmem:[#allocation7 + $0x7a4] ss:$8 sps:$4 sm:$0xff]  }
 0x5f2   :  { %4414 = vmatpush1.bf16.msra.mxu1 %v7093_v54  ;;  %4445 = vmatprep.mubr.bf16.mxu1 %v5808_v55  ;;  %v7173_v55 = vld [vmem:[#allocation7 + $0x7a0] ss:$8 sps:$4 sm:$0xff]  }
 0x5f3   :  { %4415 = vmatprep.subr.bf16.mxu1 %v7098_v56 }
 0x5f6   :  { %4416 = vmatpush1.bf16.msra.mxu1 %v7096_v58  ;;  %v7178_v58 = vld [vmem:[#allocation7 + $0x7b4] ss:$8 sps:$4 sm:$0xff]  }
 0x5f7   :  { %4417 = vmatprep.subr.bf16.mxu1 %v7101_v59 }
 0x5fa   :  { %4418 = vmatpush1.bf16.msra.mxu1 %v7099_v61 }
 0x5fb   :  { %4419 = vmatprep.subr.bf16.mxu1 %v7104_v62  ;;  %v7176_v62 = vld [vmem:[#allocation7 + $0x7b0] ss:$8 sps:$4 sm:$0xff]  }
 0x5fe   :  { %4420 = vmatpush1.bf16.msra.mxu1 %v7102_v63 }
 0x5ff   :  { %4421 = vmatprep.subr.bf16.mxu1 %v7107_v0 }
 0x602   :  { %4422 = vmatpush1.bf16.msra.mxu1 %v7105_v1  ;;  %v7181_v1 = vld [vmem:[#allocation7 + $0x7c4] ss:$8 sps:$4 sm:$0xff]  }
 0x603   :  { %4423 = vmatprep.subr.bf16.mxu1 %v7110_v2 }
 0x606   :  { %4424 = vmatpush1.bf16.msra.mxu1 %v7108_v4  ;;  %v7179_v4 = vld [vmem:[#allocation7 + $0x7c0] ss:$8 sps:$4 sm:$0xff]  }
 0x607   :  { %4425 = vmatprep.subr.bf16.mxu1 %v7113_v5  ;;  %v7184_v5 = vld [vmem:[#allocation7 + $0x7d4] ss:$8 sps:$4 sm:$0xff]  }
 0x60a   :  { %4426 = vmatpush1.bf16.msra.mxu1 %v7111_v3  ;;  %v7182_v3 = vld [vmem:[#allocation7 + $0x7d0] ss:$8 sps:$4 sm:$0xff]  }
 0x60b   :  { %4427 = vmatprep.subr.bf16.mxu1 %v7116_v9  ;;  %v7185_v9 = vld [vmem:[#allocation7 + $0x7e0] ss:$8 sps:$4 sm:$0xff]  }
 0x60e   :  { %4428 = vmatpush1.bf16.msra.mxu1 %v7114_v10  ;;  %v7190_v10 = vld [vmem:[#allocation7 + $0x7f4] ss:$8 sps:$4 sm:$0xff]  }
 0x60f   :  { %4429 = vmatprep.subr.bf16.mxu1 %v7119_v13 }
 0x612   :  { %4430 = vmatpush1.bf16.msra.mxu1 %v7117_v15  ;;  %v5773_v15 = vld [vmem:[#allocation13 + $0x6] ss:$0 sm:$0xff] }
 0x613   :  { %4431 = vmatprep.subr.bf16.mxu1 %v7122_v16 }
 0x616   :  { %4432 = vmatpush1.bf16.msra.mxu1 %v7120_v17  ;;  %v7188_v17 = vld [vmem:[#allocation7 + $0x7f0] ss:$8 sps:$4 sm:$0xff]  }
 0x617   :  { %4433 = vmatprep.subr.bf16.mxu1 %v7125_v18  ;;  %v5774_v18 = vld [vmem:[#allocation13 + $0x7] ss:$0 sm:$0xff] }
 0x61a   :  { %4434 = vmatpush1.bf16.msra.mxu1 %v7123_v19  ;;  %v7195_v19 = vld [vmem:[#allocation7 + $0x804] ss:$8 sps:$4 sm:$0xff]  }
 0x61b   :  { %4435 = vmatprep.subr.bf16.mxu1 %v7128_v20  ;;  %v8199_v20 = vld [vmem:[%s8301_s20 + $0x40] sm:$0xff] }
 0x61e   :  { %4436 = vmatpush1.bf16.msra.mxu1 %v7126_v21 }
 0x61f   :  { %4437 = vmatprep.subr.bf16.mxu1 %v7131_v22  ;;  %v5809_v22 = vcombine.low %v8184_v33, %v8184_v33  ;;  %v7207_v33 = vld [vmem:[#allocation7 + $0x844] ss:$8 sps:$4 sm:$0xff]  }
 0x622   :  { %4438 = vmatpush1.bf16.msra.mxu1 %v7129_v23 }
 0x623   :  { %4439 = vmatprep.subr.bf16.mxu1 %v7134_v24  ;;  %v7193_v24 = vld [vmem:[#allocation7 + $0x800] ss:$8 sps:$4 sm:$0xff]  }
 0x626   :  { %4440 = vmatpush1.bf16.msra.mxu1 %v7132_v25  ;;  %v7198_v25 = vld [vmem:[#allocation7 + $0x814] ss:$8 sps:$4 sm:$0xff]  }
 0x627   :  { %4441 = vmatprep.subr.bf16.mxu1 %v7137_v27  ;;  %v7196_v27 = vld [vmem:[#allocation7 + $0x810] ss:$8 sps:$4 sm:$0xff]  }
 0x62a   :  { %4442 = vmatpush1.bf16.msra.mxu1 %v7135_v28  ;;  %v7201_v28 = vld [vmem:[#allocation7 + $0x824] ss:$8 sps:$4 sm:$0xff]  }
 0x62b   :  { %4443 = vmatprep.subr.bf16.mxu1 %v7140_v29  ;;  %v7199_v29 = vld [vmem:[#allocation7 + $0x820] ss:$8 sps:$4 sm:$0xff]  }
 0x62e   :  { %4444 = vmatpush1.bf16.msra.mxu1 %v7138_v30  ;;  %v7204_v30 = vld [vmem:[#allocation7 + $0x834] ss:$8 sps:$4 sm:$0xff]  }
 0x62f   :  { %4454 = vmatprep.subr.bf16.mxu1 %v7145_v31  ;;  %v7202_v31 = vld [vmem:[#allocation7 + $0x830] ss:$8 sps:$4 sm:$0xff]  }
 0x631   :  { %4446 = vmatmul.mubr.bf16.vlgmr.msra.gmra.mrb[4].mxu1 %v5807_v35  ;;  %v7205_v35 = vld [vmem:[#allocation7 + $0x840] ss:$8 sps:$4 sm:$0xff]  }
 0x632   :  { %4455 = vmatpush1.bf16.msra.mxu1 %v7143_v36  ;;  %4486 = vmatprep.mubr.bf16.mxu1 %v5810_v37  ;;  %v7210_v36 = vld [vmem:[#allocation7 + $0x854] ss:$8 sps:$4 sm:$0xff]   ;;  %v7208_v37 = vld [vmem:[#allocation7 + $0x850] ss:$8 sps:$4 sm:$0xff]  }
 0x633   :  { %4456 = vmatprep.subr.bf16.mxu1 %v7148_v38  ;;  %v7213_v38 = vld [vmem:[#allocation7 + $0x864] ss:$8 sps:$4 sm:$0xff]  }
 0x636   :  { %4457 = vmatpush1.bf16.msra.mxu1 %v7146_v39  ;;  %v7211_v39 = vld [vmem:[#allocation7 + $0x860] ss:$8 sps:$4 sm:$0xff]  }
 0x637   :  { %4458 = vmatprep.subr.bf16.mxu1 %v7151_v57  ;;  %v7216_v57 = vld [vmem:[#allocation7 + $0x874] ss:$8 sps:$4 sm:$0xff]  }
 0x63a   :  { %4459 = vmatpush1.bf16.msra.mxu1 %v7149_v40  ;;  %v7214_v40 = vld [vmem:[#allocation7 + $0x870] ss:$8 sps:$4 sm:$0xff]  }
 0x63b   :  { %4460 = vmatprep.subr.bf16.mxu1 %v7154_v60  ;;  %v7219_v60 = vld [vmem:[#allocation7 + $0x884] ss:$8 sps:$4 sm:$0xff]  }
 0x63e   :  { %4461 = vmatpush1.bf16.msra.mxu1 %v7152_v41  ;;  %v7217_v41 = vld [vmem:[#allocation7 + $0x880] ss:$8 sps:$4 sm:$0xff]  }
 0x63f   :  { %4462 = vmatprep.subr.bf16.mxu1 %v7157_v42  ;;  %v7222_v42 = vld [vmem:[#allocation7 + $0x894] ss:$8 sps:$4 sm:$0xff]  }
 0x642   :  { %4463 = vmatpush1.bf16.msra.mxu1 %v7155_v43  ;;  %v7220_v43 = vld [vmem:[#allocation7 + $0x890] ss:$8 sps:$4 sm:$0xff]  }
 0x643   :  { %4464 = vmatprep.subr.bf16.mxu1 %v7160_v44  ;;  %v7225_v44 = vld [vmem:[#allocation7 + $0x8a4] ss:$8 sps:$4 sm:$0xff]  }
 0x646   :  { %4465 = vmatpush1.bf16.msra.mxu1 %v7158_v45  ;;  %v7223_v45 = vld [vmem:[#allocation7 + $0x8a0] ss:$8 sps:$4 sm:$0xff]  }
 0x647   :  { %4466 = vmatprep.subr.bf16.mxu1 %v7163_v46  ;;  %v7228_v46 = vld [vmem:[#allocation7 + $0x8b4] ss:$8 sps:$4 sm:$0xff]  }
 0x64a   :  { %4467 = vmatpush1.bf16.msra.mxu1 %v7161_v47  ;;  %v7226_v47 = vld [vmem:[#allocation7 + $0x8b0] ss:$8 sps:$4 sm:$0xff]  }
 0x64b   :  { %4468 = vmatprep.subr.bf16.mxu1 %v7166_v48  ;;  %v7231_v48 = vld [vmem:[#allocation7 + $0x8c4] ss:$8 sps:$4 sm:$0xff]  }
 0x64e   :  { %4469 = vmatpush1.bf16.msra.mxu1 %v7164_v6  ;;  %v7229_v6 = vld [vmem:[#allocation7 + $0x8c0] ss:$8 sps:$4 sm:$0xff]  }
 0x64f   :  { %4470 = vmatprep.subr.bf16.mxu1 %v7169_v49  ;;  %v7234_v49 = vld [vmem:[#allocation7 + $0x8d4] ss:$8 sps:$4 sm:$0xff]  }
 0x652   :  { %4471 = vmatpush1.bf16.msra.mxu1 %v7167_v50  ;;  %v7232_v50 = vld [vmem:[#allocation7 + $0x8d0] ss:$8 sps:$4 sm:$0xff]  }
 0x653   :  { %4472 = vmatprep.subr.bf16.mxu1 %v7172_v51  ;;  %v7237_v51 = vld [vmem:[#allocation7 + $0x8e4] ss:$8 sps:$4 sm:$0xff]  }
 0x656   :  { %4473 = vmatpush1.bf16.msra.mxu1 %v7170_v52  ;;  %v1744_v54 = vpop.xlane.xlu1 %1743  ;;  %v7235_v52 = vld [vmem:[#allocation7 + $0x8e0] ss:$8 sps:$4 sm:$0xff]  }
 0x657   :  { %v1745_v56 = vmul.f32 0.0078125, %v1744_v54  ;;  %4474 = vmatprep.subr.bf16.mxu1 %v7175_v53  ;;  %v7240_v53 = vld [vmem:[#allocation7 + $0x8f4] ss:$8 sps:$4 sm:$0xff]   ;;  %v7238_v54 = vld [vmem:[#allocation7 + $0x8f0] ss:$8 sps:$4 sm:$0xff]  }
 0x659   :  { %v8191_v59 = vsub.f32 %v8167_v34, %v1745_v56  ;;  %v7187_v34 = vld [vmem:[#allocation7 + $0x7e4] ss:$8 sps:$4 sm:$0xff]  }
 0x65a   :  { %4475 = vmatpush1.bf16.msra.mxu1 %v7173_v55  ;;  %v1494_v61 = vpop.xlane.xlu1 %1493  ;;  %v7245_v55 = vld [vmem:[#allocation7 + $0x904] ss:$8 sps:$4 sm:$0xff]  }
 0x65b   :  { %v1495_v63 = vmul.f32 0.0078125, %v1494_v61  ;;  %4476 = vmatprep.subr.bf16.mxu1 %v7178_v58  ;;  %v1747_v0 = vmul.f32 %v8191_v59, %v8191_v59  ;;  %v8211_v56 = vld [vmem:[%s8301_s20 + $0x48] sm:$0xff]  ;;  %v5811_v58 = vcombine.low %v8199_v20, %v8199_v20 }
 0x65c   :  { %v7243_v61 = vld [vmem:[#allocation7 + $0x900] ss:$8 sps:$4 sm:$0xff]  }
 0x65d   :  { %v1496_v2 = vadd.f32 1e-05, %v1495_v63  ;;  %1748 = vadd.xlane.f32.xlu1 %v1747_v0  ;;  %v7248_v63 = vld [vmem:[#allocation7 + $0x914] ss:$8 sps:$4 sm:$0xff]   ;;  %v7246_v0 = vld [vmem:[#allocation7 + $0x910] ss:$8 sps:$4 sm:$0xff]  }
 0x65e   :  { %4477 = vmatpush1.bf16.msra.mxu1 %v7176_v62  ;;  %v5814_v62 = vcombine.high %v8211_v56, %v8211_v56 }
 0x65f   :  { %7509 = vrsqrt.f32 %v1496_v2  ;;  %4478 = vmatprep.subr.bf16.mxu1 %v7181_v1  ;;  %v7251_v1 = vld [vmem:[#allocation7 + $0x924] ss:$8 sps:$4 sm:$0xff]   ;;  %v7249_v2 = vld [vmem:[#allocation7 + $0x920] ss:$8 sps:$4 sm:$0xff]  }
 0x662   :  { %4479 = vmatpush1.bf16.msra.mxu1 %v7179_v4  ;;  %v7254_v4 = vld [vmem:[#allocation7 + $0x934] ss:$8 sps:$4 sm:$0xff]  }
 0x663   :  { %4480 = vmatprep.subr.bf16.mxu1 %v7184_v5  ;;  %v7252_v5 = vld [vmem:[#allocation7 + $0x930] ss:$8 sps:$4 sm:$0xff]  }
 0x666   :  { %4481 = vmatpush1.bf16.msra.mxu1 %v7182_v3  ;;  %v7257_v3 = vld [vmem:[#allocation7 + $0x944] ss:$8 sps:$4 sm:$0xff]  }
 0x667   :  { %4482 = vmatprep.subr.bf16.mxu1 %v7187_v34  ;;  %v7255_v34 = vld [vmem:[#allocation7 + $0x940] ss:$8 sps:$4 sm:$0xff]  }
 0x669   :  { %v7510_v13 = vpop.eup %7509 }
 0x66a   :  { %v1498_v16 = vmul.f32 %v7510_v13, %v8164_v32  ;;  %4483 = vmatpush1.bf16.msra.mxu1 %v7185_v9  ;;  %v5812_v32 = vcombine.high %v8199_v20, %v8199_v20  ;;  %v7260_v9 = vld [vmem:[#allocation7 + $0x954] ss:$8 sps:$4 sm:$0xff]   ;;  %v7263_v13 = vld [vmem:[#allocation7 + $0x964] ss:$8 sps:$4 sm:$0xff]  }
 0x66b   :  { %4484 = vmatprep.subr.bf16.mxu1 %v7190_v10  ;;  %v7258_v10 = vld [vmem:[#allocation7 + $0x950] ss:$8 sps:$4 sm:$0xff]   ;;  %v7272_v20 = vld [vmem:[#allocation7 + $0x994] ss:$8 sps:$4 sm:$0xff]  }
 0x66c   :  { %v1503_v21 = vmul.f32 %v5773_v15, %v1498_v16  ;;  %v7261_v15 = vld [vmem:[#allocation7 + $0x960] ss:$8 sps:$4 sm:$0xff]   ;;  %v7266_v16 = vld [vmem:[#allocation7 + $0x974] ss:$8 sps:$4 sm:$0xff]  }
 0x66e   :  { %v1508_v23 = vadd.f32 %v5774_v18, %v1503_v21  ;;  %4485 = vmatpush1.bf16.msra.mxu1 %v7188_v17  ;;  %v7264_v17 = vld [vmem:[#allocation7 + $0x970] ss:$8 sps:$4 sm:$0xff]   ;;  %v7269_v18 = vld [vmem:[#allocation7 + $0x984] ss:$8 sps:$4 sm:$0xff]  }
 0x66f   :  { %4495 = vmatprep.subr.bf16.mxu1 %v7195_v19  ;;  %v7267_v19 = vld [vmem:[#allocation7 + $0x980] ss:$8 sps:$4 sm:$0xff]   ;;  %v7270_v21 = vld [vmem:[#allocation7 + $0x990] ss:$8 sps:$4 sm:$0xff]  }
 0x670   :  { %1509 = vst [vmem:[%s8293_s15] sm:$0xff] %v1508_v23  ;;  %v7273_v23 = vld [vmem:[#allocation7 + $0x9a0] ss:$8 sps:$4 sm:$0xff]  }
 0x671   :  { %4487 = vmatmul.mubr.bf16.vlgmr.msra.gmra.mrb[4].mxu1 %v5809_v22  ;;  %v7275_v22 = vld [vmem:[#allocation7 + $0x9a4] ss:$8 sps:$4 sm:$0xff]  }
 0x672   :  { %4496 = vmatpush1.bf16.msra.mxu1 %v7193_v24  ;;  %4527 = vmatprep.mubr.bf16.mxu1 %v5812_v32  ;;  %v7278_v24 = vld [vmem:[#allocation7 + $0x9b4] ss:$8 sps:$4 sm:$0xff]   ;;  %v7276_v32 = vld [vmem:[#allocation7 + $0x9b0] ss:$8 sps:$4 sm:$0xff]  }
 0x673   :  { %4497 = vmatprep.subr.bf16.mxu1 %v7198_v25  ;;  %v7281_v25 = vld [vmem:[#allocation7 + $0x9c4] ss:$8 sps:$4 sm:$0xff]  }
 0x676   :  { %4498 = vmatpush1.bf16.msra.mxu1 %v7196_v27  ;;  %v7279_v27 = vld [vmem:[#allocation7 + $0x9c0] ss:$8 sps:$4 sm:$0xff]  }
 0x677   :  { %4499 = vmatprep.subr.bf16.mxu1 %v7201_v28  ;;  %v7284_v28 = vld [vmem:[#allocation7 + $0x9d4] ss:$8 sps:$4 sm:$0xff]  }
 0x67a   :  { %4500 = vmatpush1.bf16.msra.mxu1 %v7199_v29  ;;  %v7282_v29 = vld [vmem:[#allocation7 + $0x9d0] ss:$8 sps:$4 sm:$0xff]  }
 0x67b   :  { %4501 = vmatprep.subr.bf16.mxu1 %v7204_v30  ;;  %v7287_v30 = vld [vmem:[#allocation7 + $0x9e4] ss:$8 sps:$4 sm:$0xff]  }
 0x67e   :  { %4502 = vmatpush1.bf16.msra.mxu1 %v7202_v31  ;;  %v7285_v31 = vld [vmem:[#allocation7 + $0x9e0] ss:$8 sps:$4 sm:$0xff]  }
 0x67f   :  { %4503 = vmatprep.subr.bf16.mxu1 %v7207_v33  ;;  %v7290_v33 = vld [vmem:[#allocation7 + $0x9f4] ss:$8 sps:$4 sm:$0xff]  }
 0x682   :  { %4504 = vmatpush1.bf16.msra.mxu1 %v7205_v35 }
 0x683   :  { %4505 = vmatprep.subr.bf16.mxu1 %v7210_v36  ;;  %v7288_v36 = vld [vmem:[#allocation7 + $0x9f0] ss:$8 sps:$4 sm:$0xff]  }
 0x686   :  { %4506 = vmatpush1.bf16.msra.mxu1 %v7208_v37 }
 0x687   :  { %4507 = vmatprep.subr.bf16.mxu1 %v7213_v38  ;;  %v7295_v38 = vld [vmem:[#allocation7 + $0xa04] ss:$8 sps:$4 sm:$0xff]  }
 0x68a   :  { %4508 = vmatpush1.bf16.msra.mxu1 %v7211_v39  ;;  %v8220_v39 = vld [vmem:[%s8301_s20 + $0x50] sm:$0xff] }
 0x68b   :  { %4509 = vmatprep.subr.bf16.mxu1 %v7216_v57 }
 0x68e   :  { %4510 = vmatpush1.bf16.msra.mxu1 %v7214_v40  ;;  %v5813_v40 = vcombine.low %v8211_v56, %v8211_v56  ;;  %v7302_v56 = vld [vmem:[#allocation7 + $0xa30] ss:$8 sps:$4 sm:$0xff]  }
 0x68f   :  { %4511 = vmatprep.subr.bf16.mxu1 %v7219_v60  ;;  %v7293_v60 = vld [vmem:[#allocation7 + $0xa00] ss:$8 sps:$4 sm:$0xff]  }
 0x692   :  { %4512 = vmatpush1.bf16.msra.mxu1 %v7217_v41  ;;  %v5816_v41 = vcombine.high %v8220_v39, %v8220_v39 }
 0x693   :  { %4513 = vmatprep.subr.bf16.mxu1 %v7222_v42  ;;  %v7298_v42 = vld [vmem:[#allocation7 + $0xa14] ss:$8 sps:$4 sm:$0xff]  }
 0x696   :  { %4514 = vmatpush1.bf16.msra.mxu1 %v7220_v43  ;;  %v7393_v43 = vld [vmem:[#allocation10 + $0x40] sm:$0xff]  }
 0x697   :  { %4515 = vmatprep.subr.bf16.mxu1 %v7225_v44  ;;  %v7394_v44 = vld [vmem:[#allocation10] sm:$0xff]   ;;  %6353 = vmatprep.subr.bf16.mxu0 %v7393_v43  ;;  %v7352_v43 = vld [vmem:[#allocation7 + $0xb30] ss:$8 sps:$4 sm:$0xff]  }
 0x698   :  { %6354 = vmatpush3.bf16.msra.mxu0 %v7394_v44  ;;  %v7355_v44 = vld [vmem:[#allocation7 + $0xb40] ss:$8 sps:$4 sm:$0xff]  }
 0x69a   :  { %4516 = vmatpush1.bf16.msra.mxu1 %v7223_v45  ;;  %v7395_v45 = vld [vmem:[#allocation10 + $0x48] sm:$0xff]  }
 0x69b   :  { %4517 = vmatprep.subr.bf16.mxu1 %v7228_v46  ;;  %v7296_v46 = vld [vmem:[#allocation7 + $0xa10] ss:$8 sps:$4 sm:$0xff]   ;;  %6355 = vmatprep.subr.bf16.mxu0 %v7395_v45  ;;  %v7360_v45 = vld [vmem:[#allocation7 + $0xb54] ss:$8 sps:$4 sm:$0xff]  }
 0x69e   :  { %4518 = vmatpush1.bf16.msra.mxu1 %v7226_v47  ;;  %v7301_v47 = vld [vmem:[#allocation7 + $0xa24] ss:$8 sps:$4 sm:$0xff]  }
 0x69f   :  { %4519 = vmatprep.subr.bf16.mxu1 %v7231_v48  ;;  %v7396_v48 = vld [vmem:[#allocation10 + $0x8] sm:$0xff]  }
 0x6a0   :  { %6356 = vmatpush3.bf16.msra.mxu0 %v7396_v48  ;;  %v7361_v48 = vld [vmem:[#allocation7 + $0xb60] ss:$8 sps:$4 sm:$0xff]  }
 0x6a2   :  { %4520 = vmatpush1.bf16.msra.mxu1 %v7229_v6  ;;  %v7397_v6 = vld [vmem:[#allocation10 + $0x50] sm:$0xff]  }
 0x6a3   :  { %4521 = vmatprep.subr.bf16.mxu1 %v7234_v49  ;;  %v7299_v49 = vld [vmem:[#allocation7 + $0xa20] ss:$8 sps:$4 sm:$0xff]   ;;  %6357 = vmatprep.subr.bf16.mxu0 %v7397_v6  ;;  %v7366_v6 = vld [vmem:[#allocation7 + $0xb74] ss:$8 sps:$4 sm:$0xff]  }
 0x6a6   :  { %4522 = vmatpush1.bf16.msra.mxu1 %v7232_v50  ;;  %v7304_v50 = vld [vmem:[#allocation7 + $0xa34] ss:$8 sps:$4 sm:$0xff]  }
 0x6a7   :  { %4523 = vmatprep.subr.bf16.mxu1 %v7237_v51  ;;  %v7398_v51 = vld [vmem:[#allocation10 + $0x10] sm:$0xff]  }
 0x6a8   :  { %6358 = vmatpush3.bf16.msra.mxu0 %v7398_v51  ;;  %v7367_v51 = vld [vmem:[#allocation7 + $0xb80] ss:$8 sps:$4 sm:$0xff]  }
 0x6aa   :  { %4524 = vmatpush1.bf16.msra.mxu1 %v7235_v52 }
 0x6ab   :  { %4525 = vmatprep.subr.bf16.mxu1 %v7240_v53  ;;  %v5793_v53 = vld [vmem:[#allocation13 + $0xa] ss:$0 sm:$0xff] }
 0x6ae   :  { %4526 = vmatpush1.bf16.msra.mxu1 %v7238_v54  ;;  %v7399_v54 = vld [vmem:[#allocation10 + $0x58] sm:$0xff]  }
 0x6af   :  { %4536 = vmatprep.subr.bf16.mxu1 %v7245_v55  ;;  %6359 = vmatprep.subr.bf16.mxu0 %v7399_v54  ;;  %v7375_v54 = vld [vmem:[#allocation7 + $0xba4] ss:$8 sps:$4 sm:$0xff]  }
 0x6b1   :  { %4528 = vmatmul.mubr.bf16.vlgmr.msra.gmra.mrb[4].mxu1 %v5811_v58  ;;  %v5794_v58 = vld [vmem:[#allocation13 + $0xb] ss:$0 sm:$0xff] }
 0x6b2   :  { %4537 = vmatpush1.bf16.msra.mxu1 %v7243_v61  ;;  %4568 = vmatprep.mubr.bf16.mxu1 %v5814_v62  ;;  %v7307_v61 = vld [vmem:[#allocation7 + $0xa44] ss:$8 sps:$4 sm:$0xff]  }
 0x6b3   :  { %4538 = vmatprep.subr.bf16.mxu1 %v7248_v63  ;;  %v7400_v63 = vld [vmem:[#allocation10 + $0x18] sm:$0xff]  }
 0x6b4   :  { %6360 = vmatpush3.bf16.msra.mxu0 %v7400_v63  ;;  %v7384_v63 = vld [vmem:[#allocation7 + $0xbd4] ss:$8 sps:$4 sm:$0xff]  }
 0x6b6   :  { %4539 = vmatpush1.bf16.msra.mxu1 %v7246_v0  ;;  %v7401_v0 = vld [vmem:[#allocation10 + $0x60] sm:$0xff]  }
 0x6b7   :  { %4540 = vmatprep.subr.bf16.mxu1 %v7251_v1  ;;  %6361 = vmatprep.subr.bf16.mxu0 %v7401_v0  ;;  %v7382_v0 = vld [vmem:[#allocation7 + $0xbd0] ss:$8 sps:$4 sm:$0xff]  }
 0x6ba   :  { %4541 = vmatpush1.bf16.msra.mxu1 %v7249_v2  ;;  %v7305_v2 = vld [vmem:[#allocation7 + $0xa40] ss:$8 sps:$4 sm:$0xff]  }
 0x6bb   :  { %4542 = vmatprep.subr.bf16.mxu1 %v7254_v4  ;;  %v7310_v4 = vld [vmem:[#allocation7 + $0xa54] ss:$8 sps:$4 sm:$0xff]  }
 0x6be   :  { %4543 = vmatpush1.bf16.msra.mxu1 %v7252_v5  ;;  %v7403_v5 = vld [vmem:[#allocation10 + $0x68] sm:$0xff]  }
 0x6bf   :  { %4544 = vmatprep.subr.bf16.mxu1 %v7257_v3  ;;  %v7308_v3 = vld [vmem:[#allocation7 + $0xa50] ss:$8 sps:$4 sm:$0xff]  }
 0x6c2   :  { %4545 = vmatpush1.bf16.msra.mxu1 %v7255_v34  ;;  %v7313_v34 = vld [vmem:[#allocation7 + $0xa64] ss:$8 sps:$4 sm:$0xff]  }
 0x6c3   :  { %4546 = vmatprep.subr.bf16.mxu1 %v7260_v9  ;;  %v7404_v9 = vld [vmem:[#allocation10 + $0x28] sm:$0xff]  }
 0x6c6   :  { %4547 = vmatpush1.bf16.msra.mxu1 %v7258_v10  ;;  %v7311_v10 = vld [vmem:[#allocation7 + $0xa60] ss:$8 sps:$4 sm:$0xff]  }
 0x6c7   :  { %4548 = vmatprep.subr.bf16.mxu1 %v7263_v13  ;;  %v7316_v13 = vld [vmem:[#allocation7 + $0xa74] ss:$8 sps:$4 sm:$0xff]  }
 0x6ca   :  { %4549 = vmatpush1.bf16.msra.mxu1 %v7261_v15  ;;  %v7314_v15 = vld [vmem:[#allocation7 + $0xa70] ss:$8 sps:$4 sm:$0xff]  }
 0x6cb   :  { %4550 = vmatprep.subr.bf16.mxu1 %v7266_v16  ;;  %v7319_v16 = vld [vmem:[#allocation7 + $0xa84] ss:$8 sps:$4 sm:$0xff]  }
 0x6ce   :  { %4551 = vmatpush1.bf16.msra.mxu1 %v7264_v17  ;;  %v7317_v17 = vld [vmem:[#allocation7 + $0xa80] ss:$8 sps:$4 sm:$0xff]  }
 0x6cf   :  { %4552 = vmatprep.subr.bf16.mxu1 %v7269_v18  ;;  %v7322_v18 = vld [vmem:[#allocation7 + $0xa94] ss:$8 sps:$4 sm:$0xff]  }
 0x6d2   :  { %4553 = vmatpush1.bf16.msra.mxu1 %v7267_v19  ;;  %v7320_v19 = vld [vmem:[#allocation7 + $0xa90] ss:$8 sps:$4 sm:$0xff]  }
 0x6d3   :  { %4554 = vmatprep.subr.bf16.mxu1 %v7272_v20  ;;  %v7325_v20 = vld [vmem:[#allocation7 + $0xaa4] ss:$8 sps:$4 sm:$0xff]  }
 0x6d6   :  { %4555 = vmatpush1.bf16.msra.mxu1 %v7270_v21  ;;  %v7323_v21 = vld [vmem:[#allocation7 + $0xaa0] ss:$8 sps:$4 sm:$0xff]  }
 0x6d7   :  { %4556 = vmatprep.subr.bf16.mxu1 %v7275_v22  ;;  %v7328_v22 = vld [vmem:[#allocation7 + $0xab4] ss:$8 sps:$4 sm:$0xff]  }
 0x6da   :  { %4557 = vmatpush1.bf16.msra.mxu1 %v7273_v23  ;;  %v7326_v23 = vld [vmem:[#allocation7 + $0xab0] ss:$8 sps:$4 sm:$0xff]  }
 0x6db   :  { %4558 = vmatprep.subr.bf16.mxu1 %v7278_v24  ;;  %v7331_v24 = vld [vmem:[#allocation7 + $0xac4] ss:$8 sps:$4 sm:$0xff]  }
 0x6de   :  { %4559 = vmatpush1.bf16.msra.mxu1 %v7276_v32  ;;  %v7329_v32 = vld [vmem:[#allocation7 + $0xac0] ss:$8 sps:$4 sm:$0xff]  }
 0x6df   :  { %4560 = vmatprep.subr.bf16.mxu1 %v7281_v25  ;;  %v7334_v25 = vld [vmem:[#allocation7 + $0xad4] ss:$8 sps:$4 sm:$0xff]  }
 0x6e2   :  { %4561 = vmatpush1.bf16.msra.mxu1 %v7279_v27  ;;  %v7332_v27 = vld [vmem:[#allocation7 + $0xad0] ss:$8 sps:$4 sm:$0xff]  }
 0x6e3   :  { %4562 = vmatprep.subr.bf16.mxu1 %v7284_v28  ;;  %v7337_v28 = vld [vmem:[#allocation7 + $0xae4] ss:$8 sps:$4 sm:$0xff]  }
 0x6e6   :  { %4563 = vmatpush1.bf16.msra.mxu1 %v7282_v29  ;;  %v7335_v29 = vld [vmem:[#allocation7 + $0xae0] ss:$8 sps:$4 sm:$0xff]  }
 0x6e7   :  { %4564 = vmatprep.subr.bf16.mxu1 %v7287_v30  ;;  %v7340_v30 = vld [vmem:[#allocation7 + $0xaf4] ss:$8 sps:$4 sm:$0xff]  }
 0x6ea   :  { %4565 = vmatpush1.bf16.msra.mxu1 %v7285_v31  ;;  %v1749_v35 = vpop.xlane.xlu1 %1748  ;;  %v7338_v31 = vld [vmem:[#allocation7 + $0xaf0] ss:$8 sps:$4 sm:$0xff]  }
 0x6eb   :  { %v1750_v37 = vmul.f32 0.0078125, %v1749_v35  ;;  %4566 = vmatprep.subr.bf16.mxu1 %v7290_v33  ;;  %v7345_v33 = vld [vmem:[#allocation7 + $0xb04] ss:$8 sps:$4 sm:$0xff]   ;;  %v8233_v35 = vld [vmem:[%s8301_s20 + $0x58] sm:$0xff] }
 0x6ed   :  { %v1751_v57 = vadd.f32 1e-05, %v1750_v37  ;;  %v7343_v37 = vld [vmem:[#allocation7 + $0xb00] ss:$8 sps:$4 sm:$0xff]  }
 0x6ee   :  { %4567 = vmatpush1.bf16.msra.mxu1 %v7288_v36  ;;  %v5815_v36 = vcombine.low %v8220_v39, %v8220_v39  ;;  %v7357_v39 = vld [vmem:[#allocation7 + $0xb44] ss:$8 sps:$4 sm:$0xff]  }
 0x6ef   :  { %7511 = vrsqrt.f32 %v1751_v57  ;;  %4577 = vmatprep.subr.bf16.mxu1 %v7295_v38  ;;  %v5818_v38 = vcombine.high %v8233_v35, %v8233_v35  ;;  %v7348_v57 = vld [vmem:[#allocation7 + $0xb14] ss:$8 sps:$4 sm:$0xff]  }
 0x6f1   :  { %4569 = vmatmul.mubr.bf16.vlgmr.msra.gmra.mrb[4].mxu1 %v5813_v40  ;;  %v7346_v40 = vld [vmem:[#allocation7 + $0xb10] ss:$8 sps:$4 sm:$0xff]  }
 0x6f2   :  { %4578 = vmatpush1.bf16.msra.mxu1 %v7293_v60  ;;  %4609 = vmatprep.mubr.bf16.mxu1 %v5816_v41  ;;  %v7351_v60 = vld [vmem:[#allocation7 + $0xb24] ss:$8 sps:$4 sm:$0xff]   ;;  %v7349_v41 = vld [vmem:[#allocation7 + $0xb20] ss:$8 sps:$4 sm:$0xff]  }
 0x6f3   :  { %4579 = vmatprep.subr.bf16.mxu1 %v7298_v42  ;;  %v7354_v42 = vld [vmem:[#allocation7 + $0xb34] ss:$8 sps:$4 sm:$0xff]  }
 0x6f6   :  { %4580 = vmatpush1.bf16.msra.mxu1 %v7296_v46  ;;  %v7358_v46 = vld [vmem:[#allocation7 + $0xb50] ss:$8 sps:$4 sm:$0xff]  }
 0x6f7   :  { %4581 = vmatprep.subr.bf16.mxu1 %v7301_v47  ;;  %v7363_v47 = vld [vmem:[#allocation7 + $0xb64] ss:$8 sps:$4 sm:$0xff]  }
 0x6f9   :  { %v7512_v52 = vpop.eup %7511 }
 0x6fa   :  { %v1753_v55 = vmul.f32 %v7512_v52, %v8191_v59  ;;  %4582 = vmatpush1.bf16.msra.mxu1 %v7299_v49  ;;  %v7402_v59 = vld [vmem:[#allocation10 + $0x20] sm:$0xff]   ;;  %v7364_v49 = vld [vmem:[#allocation7 + $0xb70] ss:$8 sps:$4 sm:$0xff]   ;;  %v7372_v52 = vld [vmem:[#allocation7 + $0xb94] ss:$8 sps:$4 sm:$0xff]  }
 0x6fb   :  { %4583 = vmatprep.subr.bf16.mxu1 %v7304_v50  ;;  %6362 = vmatpush3.bf16.msra.mxu0 %v7402_v59  ;;  %v7369_v50 = vld [vmem:[#allocation7 + $0xb84] ss:$8 sps:$4 sm:$0xff]   ;;  %v7388_v59 = vld [vmem:[#allocation7 + $0xbf0] ss:$8 sps:$4 sm:$0xff]  }
 0x6fc   :  { %v1758_v62 = vmul.f32 %v5793_v53, %v1753_v55  ;;  %6363 = vmatprep.subr.bf16.mxu0 %v7403_v5  ;;  %v7370_v53 = vld [vmem:[#allocation7 + $0xb90] ss:$8 sps:$4 sm:$0xff]   ;;  %v7373_v55 = vld [vmem:[#allocation7 + $0xba0] ss:$8 sps:$4 sm:$0xff]   ;;  %v5817_v5 = vcombine.low %v8233_v35, %v8233_v35 }
 0x6fd   :  { %v7413_v35 = vld [vmem:[#allocation11 + $0x20] sm:$0xff]  }
 0x6fe   :  { %v1763_v1 = vadd.f32 %v5794_v58, %v1758_v62  ;;  %4584 = vmatpush1.bf16.msra.mxu1 %v7302_v56  ;;  %v7378_v56 = vld [vmem:[#allocation7 + $0xbb4] ss:$8 sps:$4 sm:$0xff]   ;;  %v7376_v58 = vld [vmem:[#allocation7 + $0xbb0] ss:$8 sps:$4 sm:$0xff]   ;;  %v7379_v62 = vld [vmem:[#allocation7 + $0xbc0] ss:$8 sps:$4 sm:$0xff]  }
 0x6ff   :  { %4585 = vmatprep.subr.bf16.mxu1 %v7307_v61  ;;  %6364 = vmatpush3.bf16.msra.mxu0 %v7404_v9  ;;  %v7381_v61 = vld [vmem:[#allocation7 + $0xbc4] ss:$8 sps:$4 sm:$0xff]   ;;  %v7407_v9 = vld [vmem:[#allocation10 + $0x78] sm:$0xff]  }
 0x700   :  { %1764 = vst [vmem:[%s8294_s16] sm:$0xff] %v1763_v1  ;;  %v7387_v1 = vld [vmem:[#allocation7 + $0xbe4] ss:$8 sps:$4 sm:$0xff]  }
 0x702   :  { %4586 = vmatpush1.bf16.msra.mxu1 %v7305_v2  ;;  %v7385_v2 = vld [vmem:[#allocation7 + $0xbe0] ss:$8 sps:$4 sm:$0xff]  }
 0x703   :  { %4587 = vmatprep.subr.bf16.mxu1 %v7310_v4  ;;  %v7390_v4 = vld [vmem:[#allocation7 + $0xbf4] ss:$8 sps:$4 sm:$0xff]  }
 0x706   :  { %4588 = vmatpush1.bf16.msra.mxu1 %v7308_v3  ;;  %v7405_v3 = vld [vmem:[#allocation10 + $0x70] sm:$0xff]  }
 0x707   :  { %4589 = vmatprep.subr.bf16.mxu1 %v7313_v34  ;;  %v7406_v34 = vld [vmem:[#allocation10 + $0x30] sm:$0xff]   ;;  %6365 = vmatprep.subr.bf16.mxu0 %v7405_v3  ;;  %v7438_v3 = vld [vmem:[#allocation14 + $0xf0] ss:$8 sps:$4 sm:$0xff]  }
 0x708   :  { %6366 = vmatpush3.bf16.msra.mxu0 %v7406_v34  ;;  %v4994_v34 = vld [vmem:[%s8293_s15] sm:$0xff] }
 0x709   :  { %6367 = vmatprep.subr.bf16.mxu0 %v7407_v9  ;;  %v5029_v9 = vpack.c.bf16 %v4994_v34, %v4994_v34  ;;  %v7490_v34 = vld [vmem:[#allocation16] sm:$0xff]  }
 0x70a   :  { %4590 = vmatpush1.bf16.msra.mxu1 %v7311_v10  ;;  %v7408_v10 = vld [vmem:[#allocation10 + $0x38] sm:$0xff]  }
 0x70b   :  { %4591 = vmatprep.subr.bf16.mxu1 %v7316_v13  ;;  %v918_v13 = vld [vmem:[#allocation17 + $0x2] ss:$8 sm:$0x3] }
 0x70c   :  { %6368 = vmatpush3.bf16.msra.mxu0 %v7408_v10  ;;  %v6220_v10 = vld [vmem:[#allocation13 + $0x1] ss:$0 sm:$0xff] }
 0x70d   :  { %6486 = vmatprep.subr.bf16.mxu0 %v7765_v11 }
 0x70e   :  { %4592 = vmatpush1.bf16.msra.mxu1 %v7314_v15  ;;  %v923_v15 = vrot.slane %v918_v13, %v8032_v7 }
 0x70f   :  { %4593 = vmatprep.subr.bf16.mxu1 %v7319_v16  ;;  %v927_v16 = vrot.slane %v918_v13, %v8035_v8 }
 0x712   :  { %4594 = vmatpush1.bf16.msra.mxu1 %v7317_v17  ;;  %v6506_v17 = vadd.f32 %v8141_v12, %v923_v15  ;;  %v7409_v12 = vld [vmem:[#allocation11] sm:$0xff]  }
 0x713   :  { %4595 = vmatprep.subr.bf16.mxu1 %v7322_v18  ;;  %v6508_v18 = vadd.f32 %v8143_v14, %v927_v16  ;;  %v7410_v14 = vld [vmem:[#allocation11 + $0x8] sm:$0xff]  }
 0x716   :  { %4596 = vmatpush1.bf16.msra.mxu1 %v7320_v19 }
 0x717   :  { %4597 = vmatprep.subr.bf16.mxu1 %v7325_v20 }
 0x71a   :  { %4598 = vmatpush1.bf16.msra.mxu1 %v7323_v21 }
 0x71b   :  { %4599 = vmatprep.subr.bf16.mxu1 %v7328_v22 }
 0x71e   :  { %4600 = vmatpush1.bf16.msra.mxu1 %v7326_v23 }
 0x71f   :  { %4601 = vmatprep.subr.bf16.mxu1 %v7331_v24 }
 0x722   :  { %4602 = vmatpush1.bf16.msra.mxu1 %v7329_v32 }
 0x723   :  { %4603 = vmatprep.subr.bf16.mxu1 %v7334_v25 }
 0x726   :  { %4604 = vmatpush1.bf16.msra.mxu1 %v7332_v27 }
 0x727   :  { %4605 = vmatprep.subr.bf16.mxu1 %v7337_v28 }
 0x72a   :  { %4606 = vmatpush1.bf16.msra.mxu1 %v7335_v29 }
 0x72b   :  { %4607 = vmatprep.subr.bf16.mxu1 %v7340_v30 }
 0x72e   :  { %4608 = vmatpush1.bf16.msra.mxu1 %v7338_v31  ;;  %v7411_v31 = vld [vmem:[#allocation11 + $0x10] sm:$0xff]  }
 0x72f   :  { %4618 = vmatprep.subr.bf16.mxu1 %v7345_v33  ;;  %v7412_v33 = vld [vmem:[#allocation11 + $0x18] sm:$0xff]  }
 0x731   :  { %4610 = vmatmul.mubr.bf16.vlgmr.msra.gmra.mrb[4].mxu1 %v5815_v36  ;;  %v7414_v36 = vld [vmem:[#allocation11 + $0x28] sm:$0xff]  }
 0x732   :  { %4619 = vmatpush1.bf16.msra.mxu1 %v7343_v37  ;;  %4650 = vmatprep.mubr.bf16.mxu1 %v5818_v38  ;;  %v7415_v37 = vld [vmem:[#allocation11 + $0x30] sm:$0xff]   ;;  %v7416_v38 = vld [vmem:[#allocation11 + $0x38] sm:$0xff]  }
 0x733   :  { %4620 = vmatprep.subr.bf16.mxu1 %v7348_v57  ;;  %v7419_v57 = vld [vmem:[#allocation14 + $0x84] ss:$8 sps:$4 sm:$0xff]  }
 0x736   :  { %4621 = vmatpush1.bf16.msra.mxu1 %v7346_v40 }
 0x737   :  { %4622 = vmatprep.subr.bf16.mxu1 %v7351_v60  ;;  %v6203_v60 = vld [vmem:[#allocation13] ss:$0 sm:$0xff] }
 0x73a   :  { %4623 = vmatpush1.bf16.msra.mxu1 %v7349_v41 }
 0x73b   :  { %4624 = vmatprep.subr.bf16.mxu1 %v7354_v42 }
 0x73e   :  { %4625 = vmatpush1.bf16.msra.mxu1 %v7352_v43 }
 0x73f   :  { %4626 = vmatprep.subr.bf16.mxu1 %v7357_v39 }
 0x742   :  { %4627 = vmatpush1.bf16.msra.mxu1 %v7355_v44 }
 0x743   :  { %4628 = vmatprep.subr.bf16.mxu1 %v7360_v45 }
 0x746   :  { %4629 = vmatpush1.bf16.msra.mxu1 %v7358_v46 }
 0x747   :  { %4630 = vmatprep.subr.bf16.mxu1 %v7363_v47 }
 0x74a   :  { %4631 = vmatpush1.bf16.msra.mxu1 %v7361_v48 }
 0x74b   :  { %4632 = vmatprep.subr.bf16.mxu1 %v7366_v6 }
 0x74e   :  { %4633 = vmatpush1.bf16.msra.mxu1 %v7364_v49 }
 0x74f   :  { %4634 = vmatprep.subr.bf16.mxu1 %v7369_v50 }
 0x752   :  { %4635 = vmatpush1.bf16.msra.mxu1 %v7367_v51 }
 0x753   :  { %4636 = vmatprep.subr.bf16.mxu1 %v7372_v52  ;;  %v7417_v52 = vld [vmem:[#allocation14 + $0x80] ss:$8 sps:$4 sm:$0xff]  }
 0x756   :  { %4637 = vmatpush1.bf16.msra.mxu1 %v7370_v53 }
 0x757   :  { %4638 = vmatprep.subr.bf16.mxu1 %v7375_v54  ;;  %v7422_v54 = vld [vmem:[#allocation14 + $0x94] ss:$8 sps:$4 sm:$0xff]  }
 0x75a   :  { %4639 = vmatpush1.bf16.msra.mxu1 %v7373_v55  ;;  %v7420_v55 = vld [vmem:[#allocation14 + $0x90] ss:$8 sps:$4 sm:$0xff]  }
 0x75b   :  { %4640 = vmatprep.subr.bf16.mxu1 %v7378_v56  ;;  %v7425_v56 = vld [vmem:[#allocation14 + $0xa4] ss:$8 sps:$4 sm:$0xff]  }
 0x75e   :  { %4641 = vmatpush1.bf16.msra.mxu1 %v7376_v58  ;;  %v7423_v58 = vld [vmem:[#allocation14 + $0xa0] ss:$8 sps:$4 sm:$0xff]  }
 0x75f   :  { %4642 = vmatprep.subr.bf16.mxu1 %v7381_v61  ;;  %v7428_v61 = vld [vmem:[#allocation14 + $0xb4] ss:$8 sps:$4 sm:$0xff]  }
 0x762   :  { %4643 = vmatpush1.bf16.msra.mxu1 %v7379_v62  ;;  %v7426_v62 = vld [vmem:[#allocation14 + $0xb0] ss:$8 sps:$4 sm:$0xff]  }
 0x763   :  { %4644 = vmatprep.subr.bf16.mxu1 %v7384_v63  ;;  %v7431_v63 = vld [vmem:[#allocation14 + $0xc4] ss:$8 sps:$4 sm:$0xff]  }
 0x766   :  { %4645 = vmatpush1.bf16.msra.mxu1 %v7382_v0  ;;  %v7429_v0 = vld [vmem:[#allocation14 + $0xc0] ss:$8 sps:$4 sm:$0xff]  }
 0x767   :  { %4646 = vmatprep.subr.bf16.mxu1 %v7387_v1  ;;  %v7434_v1 = vld [vmem:[#allocation14 + $0xd4] ss:$8 sps:$4 sm:$0xff]  }
 0x76a   :  { %4647 = vmatpush1.bf16.msra.mxu1 %v7385_v2  ;;  %v7432_v2 = vld [vmem:[#allocation14 + $0xd0] ss:$8 sps:$4 sm:$0xff]  }
 0x76b   :  { %4648 = vmatprep.subr.bf16.mxu1 %v7390_v4  ;;  %v7437_v4 = vld [vmem:[#allocation14 + $0xe4] ss:$8 sps:$4 sm:$0xff]  }
 0x76e   :  { %4649 = vmatpush1.bf16.msra.mxu1 %v7388_v59  ;;  %v7435_v59 = vld [vmem:[#allocation14 + $0xe0] ss:$8 sps:$4 sm:$0xff]  }
 0x771   :  { %4651 = vmatmul.mubr.bf16.vlgmr.msra.gmra.mrb[4].mxu1 %v5817_v5  ;;  %v7440_v5 = vld [vmem:[#allocation14 + $0xf4] ss:$8 sps:$4 sm:$0xff]  }
 0x844   :  { %v4652_v19 = vpop.f32.mrb[4].mxu1 }
 0x845   :  { %v6507_v20 = vadd.f32 %v6506_v17, %v4652_v19  ;;  %v4654_v21 = vpop.f32.mrb[5].mxu1 }
 0x846   :  { %v6509_v22 = vadd.f32 %v6508_v18, %v4654_v21  ;;  %v4656_v23 = vpop.f32.mrb[6].mxu1  ;;  %v7443_v21 = vld [vmem:[#allocation14 + $0x4] ss:$8 sps:$4 sm:$0xff]  }
 0x847   :  { %vm4668_vm3 = vcmp.ge.f32.partialorder %v6507_v20, 0.0  ;;  %v4670_v24 = vmul.f32 0.01, %v6507_v20  ;;  %v4657_v32 = vpop.f32.mrb[7].mxu1  ;;  %v7444_v23 = vld [vmem:[#allocation14 + $0x10] ss:$8 sps:$4 sm:$0xff]  }
 0x848   :  { %vm4669_vm4 = vcmp.ge.f32.partialorder %v6509_v22, 0.0  ;;  %v4671_v25 = vmul.f32 0.01, %v6509_v22 }
 0x849   :  { %v4672_v27 = vsel %vm4668_vm3, %v6507_v20, %v4670_v24  ;;  %v7441_v20 = vld [vmem:[#allocation14] ss:$8 sps:$4 sm:$0xff]   ;;  %v7449_v24 = vld [vmem:[#allocation14 + $0x24] ss:$8 sps:$4 sm:$0xff]  }
 0x84a   :  { %v4673_v28 = vsel %vm4669_vm4, %v6509_v22, %v4671_v25  ;;  %v4726_v30 = vpack.c.bf16 %v4672_v27, %v4672_v27  ;;  %v7446_v22 = vld [vmem:[#allocation14 + $0x14] ss:$8 sps:$4 sm:$0xff]   ;;  %v7447_v25 = vld [vmem:[#allocation14 + $0x20] ss:$8 sps:$4 sm:$0xff]  }
 0x84b   :  { %v4727_v29 = vpack.c.bf16 %v4673_v28, %v4673_v28 }
 0x84d   :  { %4860 = vmatprep.mubr.bf16.mxu0 %v4727_v29 }
 0x84e   :  { %4861 = vmatmul.mubr.bf16.vlgmr.msra.gmra.mrb[28].mxu0 %v4726_v30 }
 0x84f   :  { %6502 = vmatprep.mubr.msk.bf16.mxu0 %vm7766_vm2, %v7765_v11  ;;  %6487 = vmatpush3.bf16.msra.mxu0 %v7409_v12 }
 0x850   :  { %6488 = vmatprep.subr.bf16.mxu0 %v7765_v11 }
 0x853   :  { %6489 = vmatpush3.bf16.msra.mxu0 %v7410_v14 }
 0x854   :  { %6490 = vmatprep.subr.bf16.mxu0 %v7765_v11 }
 0x857   :  { %6491 = vmatpush3.bf16.msra.mxu0 %v7411_v31 }
 0x858   :  { %6492 = vmatprep.subr.bf16.mxu0 %v7765_v11 }
 0x85b   :  { %6493 = vmatpush3.bf16.msra.mxu0 %v7412_v33  ;;  %v7452_v33 = vld [vmem:[#allocation14 + $0x34] ss:$8 sps:$4 sm:$0xff]  }
 0x85c   :  { %6494 = vmatprep.subr.bf16.mxu0 %v7765_v11 }
 0x85f   :  { %6495 = vmatpush3.bf16.msra.mxu0 %v7413_v35  ;;  %v7450_v35 = vld [vmem:[#allocation14 + $0x30] ss:$8 sps:$4 sm:$0xff]  }
 0x860   :  { %6496 = vmatprep.subr.bf16.mxu0 %v7765_v11 }
 0x863   :  { %6497 = vmatpush3.bf16.msra.mxu0 %v7414_v36  ;;  %v7455_v36 = vld [vmem:[#allocation14 + $0x44] ss:$8 sps:$4 sm:$0xff]  }
 0x864   :  { %6498 = vmatprep.subr.bf16.mxu0 %v7765_v11 }
 0x867   :  { %6499 = vmatpush3.bf16.msra.mxu0 %v7415_v37  ;;  %v7453_v37 = vld [vmem:[#allocation14 + $0x40] ss:$8 sps:$4 sm:$0xff]  }
 0x868   :  { %6500 = vmatprep.subr.bf16.mxu0 %v7765_v11 }
 0x86b   :  { %6501 = vmatpush3.bf16.msra.mxu0 %v7416_v38  ;;  %v7458_v38 = vld [vmem:[#allocation14 + $0x54] ss:$8 sps:$4 sm:$0xff]  }
 0x86c   :  { %5110 = vmatprep.subr.bf16.mxu0 %v7419_v57  ;;  %v7456_v57 = vld [vmem:[#allocation14 + $0x50] ss:$8 sps:$4 sm:$0xff]  }
 0x921   :  { %v6369_v40 = vpop.f32.mrb[28].mxu0 }
 0x922   :  { %v6370_v41 = vpop.f32.mrb[29].mxu0 }
 0x923   :  { %v6371_v42 = vadd.f32 %v6370_v41, %v6369_v40  ;;  %v6372_v43 = vpop.f32.mrb[30].mxu0  ;;  %v7461_v40 = vld [vmem:[#allocation14 + $0x64] ss:$8 sps:$4 sm:$0xff]   ;;  %v7464_v41 = vld [vmem:[#allocation14 + $0x74] ss:$8 sps:$4 sm:$0xff]  }
 0x924   :  { %v6373_v39 = vpop.f32.mrb[31].mxu0  ;;  %v7467_v43 = vld [vmem:[#allocation14 + $0x104] ss:$8 sps:$4 sm:$0xff]  }
 0x925   :  { %v4863_v44 = vadd.f32 %v6371_v42, %v6203_v60  ;;  %v7459_v60 = vld [vmem:[#allocation14 + $0x60] ss:$8 sps:$4 sm:$0xff]   ;;  %v7462_v42 = vld [vmem:[#allocation14 + $0x70] ss:$8 sps:$4 sm:$0xff]  }
 0x927   :  { %v4869_v45 = vmul.f32 0.044715, %v4863_v44  ;;  %v4868_v50 = vmul.f32 0.5, %v4863_v44 }
 0x929   :  { %v4870_v46 = vmul.f32 %v4869_v45, %v4863_v44 }
 0x92b   :  { %v4871_v47 = vmul.f32 %v4870_v46, %v4863_v44 }
 0x92d   :  { %v4872_v48 = vadd.f32 %v4871_v47, %v4863_v44  ;;  %v6229_v47 = vld [vmem:[#allocation13 + $0x2] ss:$0 sm:$0xff] }
 0x92f   :  { %v4873_v6 = vmul.f32 0.7978846, %v4872_v48 }
 0x931   :  { %7513 = vtanh.f32 %v4873_v6  ;;  %v6230_v6 = vld [vmem:[#allocation13 + $0x3] ss:$0 sm:$0xff] }
 0x93b   :  { %v7514_v49 = vpop.eup %7513 }
 0x93c   :  { %v4875_v51 = vadd.f32 1.0, %v7514_v49 }
 0x93e   :  { %v4876_v11 = vmul.f32 %v4875_v51, %v4868_v50  ;;  %v7465_v51 = vld [vmem:[#allocation14 + $0x100] ss:$8 sps:$4 sm:$0xff]  }
 0x940   :  { %v4877_v53 = vpack.c.bf16 %v4876_v11, %v4876_v11 }
 0x942   :  { %6503 = vmatmul.mubr.bf16.vlgmr.msra.gmra.mrb[32].mxu0 %v4877_v53  ;;  %v7468_v53 = vld [vmem:[#allocation14 + $0x110] ss:$8 sps:$4 sm:$0xff]  }
 0x943   :  { %5111 = vmatpush1.bf16.msra.mxu0 %v7417_v52  ;;  %5142 = vmatprep.mubr.bf16.mxu0 %v7767_v26  ;;  %v7470_v52 = vld [vmem:[#allocation14 + $0x114] ss:$8 sps:$4 sm:$0xff]  }
 0x944   :  { %5112 = vmatprep.subr.bf16.mxu0 %v7422_v54  ;;  %v7473_v54 = vld [vmem:[#allocation14 + $0x124] ss:$8 sps:$4 sm:$0xff]  }
 0x947   :  { %5113 = vmatpush1.bf16.msra.mxu0 %v7420_v55  ;;  %v7471_v55 = vld [vmem:[#allocation14 + $0x120] ss:$8 sps:$4 sm:$0xff]  }
 0x948   :  { %5114 = vmatprep.subr.bf16.mxu0 %v7425_v56  ;;  %v7476_v56 = vld [vmem:[#allocation14 + $0x134] ss:$8 sps:$4 sm:$0xff]  }
 0x94b   :  { %5115 = vmatpush1.bf16.msra.mxu0 %v7423_v58  ;;  %v7474_v58 = vld [vmem:[#allocation14 + $0x130] ss:$8 sps:$4 sm:$0xff]  }
 0x94c   :  { %5116 = vmatprep.subr.bf16.mxu0 %v7428_v61  ;;  %v7479_v61 = vld [vmem:[#allocation14 + $0x144] ss:$8 sps:$4 sm:$0xff]  }
 0x94f   :  { %5117 = vmatpush1.bf16.msra.mxu0 %v7426_v62  ;;  %v7477_v62 = vld [vmem:[#allocation14 + $0x140] ss:$8 sps:$4 sm:$0xff]  }
 0x950   :  { %5118 = vmatprep.subr.bf16.mxu0 %v7431_v63  ;;  %v7482_v63 = vld [vmem:[#allocation14 + $0x154] ss:$8 sps:$4 sm:$0xff]  }
 0x953   :  { %5119 = vmatpush1.bf16.msra.mxu0 %v7429_v0  ;;  %v7480_v0 = vld [vmem:[#allocation14 + $0x150] ss:$8 sps:$4 sm:$0xff]  }
 0x954   :  { %5120 = vmatprep.subr.bf16.mxu0 %v7434_v1  ;;  %v7485_v1 = vld [vmem:[#allocation14 + $0x164] ss:$8 sps:$4 sm:$0xff]  }
 0x957   :  { %5121 = vmatpush1.bf16.msra.mxu0 %v7432_v2  ;;  %v7488_v2 = vld [vmem:[#allocation14 + $0x174] ss:$8 sps:$4 sm:$0xff]  }
 0x958   :  { %5122 = vmatprep.subr.bf16.mxu0 %v7437_v4  ;;  %v7486_v4 = vld [vmem:[#allocation14 + $0x170] ss:$8 sps:$4 sm:$0xff]  }
 0x95b   :  { %5123 = vmatpush1.bf16.msra.mxu0 %v7435_v59  ;;  %v4995_v59 = vld [vmem:[%s8294_s16] sm:$0xff] }
 0x95c   :  { %5124 = vmatprep.subr.bf16.mxu0 %v7440_v5  ;;  %v5288_v5 = vpack.c.bf16 %v4995_v59, %v4995_v59 }
 0x95f   :  { %5125 = vmatpush1.bf16.msra.mxu0 %v7438_v3  ;;  %v7489_v3 = vld [vmem:[#allocation16 + $0x40] sm:$0xff]  }
 0x960   :  { %5231 = vmatprep.subr.bf16.mxu0 %v7443_v21  ;;  %v7500_v21 = vld [vmem:[#allocation16 + $0x28] sm:$0xff]  }
 0x962   :  { %5143 = vmatmul.mubr.bf16.vlgmr.msra.gmra.mrb[36].mxu0 %v5029_v9  ;;  %v7491_v9 = vld [vmem:[#allocation16 + $0x48] sm:$0xff]  }
 0x963   :  { %5263 = vmatprep.mubr.bf16.mxu0 %v7767_v26  ;;  %5232 = vmatpush1.bf16.msra.mxu0 %v7441_v20  ;;  %v7499_v20 = vld [vmem:[#allocation16 + $0x68] sm:$0xff]  }
 0x964   :  { %5233 = vmatprep.subr.bf16.mxu0 %v7446_v22  ;;  %v7501_v22 = vld [vmem:[#allocation16 + $0x70] sm:$0xff]  }
 0x967   :  { %5234 = vmatpush1.bf16.msra.mxu0 %v7444_v23  ;;  %v7502_v23 = vld [vmem:[#allocation16 + $0x30] sm:$0xff]  }
 0x968   :  { %5235 = vmatprep.subr.bf16.mxu0 %v7449_v24  ;;  %v7503_v24 = vld [vmem:[#allocation16 + $0x78] sm:$0xff]  }
 0x96b   :  { %5236 = vmatpush1.bf16.msra.mxu0 %v7447_v25  ;;  %v7504_v25 = vld [vmem:[#allocation16 + $0x38] sm:$0xff]  }
 0x96c   :  { %5237 = vmatprep.subr.bf16.mxu0 %v7452_v33  ;;  %v5413_v33 = vld [vmem:[#allocation17 + $0x3] ss:$8 sm:$0x3] }
 0x96f   :  { %5238 = vmatpush1.bf16.msra.mxu0 %v7450_v35  ;;  %v5418_v35 = vrot.slane %v5413_v33, %v8032_v7 }
 0x970   :  { %5239 = vmatprep.subr.bf16.mxu0 %v7455_v36 }
 0x973   :  { %5240 = vmatpush1.bf16.msra.mxu0 %v7453_v37  ;;  %v5422_v37 = vrot.slane %v5413_v33, %v8035_v8 }
 0x974   :  { %5241 = vmatprep.subr.bf16.mxu0 %v7458_v38 }
 0x977   :  { %5242 = vmatpush1.bf16.msra.mxu0 %v7456_v57 }
 0x978   :  { %5243 = vmatprep.subr.bf16.mxu0 %v7461_v40 }
 0x97b   :  { %5244 = vmatpush1.bf16.msra.mxu0 %v7459_v60 }
 0x97c   :  { %5245 = vmatprep.subr.bf16.mxu0 %v7464_v41 }
 0x97f   :  { %5246 = vmatpush1.bf16.msra.mxu0 %v7462_v42 }
 0x980   :  { %5369 = vmatprep.subr.bf16.mxu0 %v7467_v43 }
 0xa15   :  { %v4964_v13 = vpop.f32.mrb[32].mxu0 }
 0xa16   :  { %v4965_v15 = vadd.f32 %v6220_v10, %v4964_v13  ;;  %v6504_v16 = vpop.f32.mrb[33].mxu0  ;;  %v7492_v10 = vld [vmem:[#allocation16 + $0x8] sm:$0xff]   ;;  %v7493_v13 = vld [vmem:[#allocation16 + $0x50] sm:$0xff]  }
 0xa17   :  { %v4967_v17 = vpop.f32.mrb[34].mxu0  ;;  %v7495_v16 = vld [vmem:[#allocation16 + $0x58] sm:$0xff]  }
 0xa18   :  { %v6505_v18 = vpop.f32.mrb[35].mxu0  ;;  %v4970_v19 = vadd.f32 %v4965_v15, %v4863_v44  ;;  %v7494_v15 = vld [vmem:[#allocation16 + $0x10] sm:$0xff]   ;;  %v7496_v17 = vld [vmem:[#allocation16 + $0x18] sm:$0xff]  }
 0xa19   :  { %v7497_v18 = vld [vmem:[#allocation16 + $0x60] sm:$0xff]  }
 0xa1a   :  { %4971 = vadd.xlane.f32.xlu0 %v4970_v19 }
 0xa35   :  { %v8260_v32 = vpop.f32.mrb[36].mxu0 }
 0xa36   :  { %v8262_v27 = vpop.f32.mrb[37].mxu0 }
 0xa37   :  { %v5148_v28 = vpop.f32.mrb[38].mxu0 }
 0xa38   :  { %v5149_v29 = vpop.f32.mrb[39].mxu0 }
 0xaa7   :  { %v4972_v30 = vpop.xlane.xlu0 %4971 }
 0xaa8   :  { %v4974_v12 = vmul.f32 0.0078125, %v4972_v30 }
 0xaaa   :  { %v4975_v14 = vsub.f32 %v4970_v19, %v4974_v12  ;;  %v7498_v19 = vld [vmem:[#allocation16 + $0x20] sm:$0xff]  }
 0xaac   :  { %v4976_v31 = vmul.f32 %v4975_v14, %v4975_v14 }
 0xaae   :  { %4977 = vadd.xlane.f32.xlu0 %v4976_v31 }
 0xb3b   :  { %v4978_v39 = vpop.xlane.xlu0 %4977 }
 0xb3c   :  { %v4979_v44 = vmul.f32 0.0078125, %v4978_v39 }
 0xb3e   :  { %v4980_v45 = vadd.f32 1e-05, %v4979_v44 }
 0xb40   :  { %7515 = vrsqrt.f32 %v4980_v45 }
 0xb4a   :  { %v7516_v46 = vpop.eup %7515 }
 0xb4b   :  { %v4982_v48 = vmul.f32 %v7516_v46, %v4975_v14 }
 0xb4d   :  { %v4987_v49 = vmul.f32 %v6229_v47, %v4982_v48  ;;  %v5467_v47 = vld [vmem:[#allocation17 + $0x4] ss:$0 sm:$0xff] }
 0xb4f   :  { %v4992_v50 = vadd.f32 %v6230_v6, %v4987_v49 }
 0xb51   :  { %4993 = vst [vmem:[%s8292_s14] sm:$0xff] %v4992_v50  ;;  %v5012_v11 = vpack.c.bf16 %v4992_v50, %v4992_v50 }
 0xb53   :  { %5264 = vmatmul.mubr.bf16.vlgmr.msra.gmra.mrb[40].mxu0 %v5012_v11 }
 0xb54   :  { %5370 = vmatpush1.bf16.msra.mxu0 %v7465_v51  ;;  %5401 = vmatprep.mubr.bf16.mxu0 %v7767_v26  ;;  %v7483_v26 = vld [vmem:[#allocation14 + $0x160] ss:$8 sps:$4 sm:$0xff]  }
 0xb55   :  { %5371 = vmatprep.subr.bf16.mxu0 %v7470_v52 }
 0xb58   :  { %5372 = vmatpush1.bf16.msra.mxu0 %v7468_v53 }
 0xb59   :  { %5373 = vmatprep.subr.bf16.mxu0 %v7473_v54 }
 0xb5c   :  { %5374 = vmatpush1.bf16.msra.mxu0 %v7471_v55 }
 0xb5d   :  { %5375 = vmatprep.subr.bf16.mxu0 %v7476_v56 }
 0xb60   :  { %5376 = vmatpush1.bf16.msra.mxu0 %v7474_v58 }
 0xb61   :  { %5377 = vmatprep.subr.bf16.mxu0 %v7479_v61 }
 0xb64   :  { %5378 = vmatpush1.bf16.msra.mxu0 %v7477_v62 }
 0xb65   :  { %5379 = vmatprep.subr.bf16.mxu0 %v7482_v63 }
 0xb68   :  { %5380 = vmatpush1.bf16.msra.mxu0 %v7480_v0 }
 0xb69   :  { %5381 = vmatprep.subr.bf16.mxu0 %v7485_v1 }
 0xb6c   :  { %5382 = vmatpush1.bf16.msra.mxu0 %v7483_v26 }
 0xb6d   :  { %5383 = vmatprep.subr.bf16.mxu0 %v7488_v2 }
 0xb70   :  { %5384 = vmatpush1.bf16.msra.mxu0 %v7486_v4 }
 0xb71   :  { %6384 = vmatprep.subr.bf16.mxu0 %v7489_v3 }
 0xb73   :  { %5402 = vmatmul.mubr.bf16.vlgmr.msra.gmra.mrb[44].mxu0 %v5288_v5 }
 0xb74   :  { %6385 = vmatpush3.bf16.msra.mxu0 %v7490_v34 }
 0xb75   :  { %6386 = vmatprep.subr.bf16.mxu0 %v7491_v9 }
 0xb78   :  { %6387 = vmatpush3.bf16.msra.mxu0 %v7492_v10 }
 0xb79   :  { %6388 = vmatprep.subr.bf16.mxu0 %v7493_v13 }
 0xb7c   :  { %6389 = vmatpush3.bf16.msra.mxu0 %v7494_v15 }
 0xb7d   :  { %6390 = vmatprep.subr.bf16.mxu0 %v7495_v16 }
 0xb80   :  { %6391 = vmatpush3.bf16.msra.mxu0 %v7496_v17 }
 0xb81   :  { %6392 = vmatprep.subr.bf16.mxu0 %v7497_v18 }
 0xb84   :  { %6393 = vmatpush3.bf16.msra.mxu0 %v7498_v19 }
 0xb85   :  { %6394 = vmatprep.subr.bf16.mxu0 %v7499_v20 }
 0xb88   :  { %6395 = vmatpush3.bf16.msra.mxu0 %v7500_v21 }
 0xb89   :  { %6396 = vmatprep.subr.bf16.mxu0 %v7501_v22 }
 0xb8c   :  { %6397 = vmatpush3.bf16.msra.mxu0 %v7502_v23 }
 0xb8d   :  { %6398 = vmatprep.subr.bf16.mxu0 %v7503_v24 }
 0xb90   :  { %6399 = vmatpush3.bf16.msra.mxu0 %v7504_v25 }
 0xc26   :  { %v5265_v28 = vpop.f32.mrb[40].mxu0 }
 0xc27   :  { %v5266_v29 = vadd.f32 %v5265_v28, %v8260_v32  ;;  %v5267_v30 = vpop.f32.mrb[41].mxu0 }
 0xc28   :  { %v5268_v12 = vadd.f32 %v5267_v30, %v8262_v27  ;;  %v5269_v14 = vpop.f32.mrb[42].mxu0 }
 0xc29   :  { %v5270_v31 = vpop.f32.mrb[43].mxu0 }
 0xc46   :  { %v5403_v36 = vpop.f32.mrb[44].mxu0 }
 0xc47   :  { %v5410_v38 = vadd.f32 %v5403_v36, %v5266_v29  ;;  %v5405_v57 = vpop.f32.mrb[45].mxu0 }
 0xc48   :  { %v5411_v40 = vadd.f32 %v5405_v57, %v5268_v12  ;;  %v5407_v60 = vpop.f32.mrb[46].mxu0 }
 0xc49   :  { %v5425_v41 = vadd.f32 %v5418_v35, %v5410_v38  ;;  %v5408_v42 = vpop.f32.mrb[47].mxu0 }
 0xc4a   :  { %v5426_v43 = vadd.f32 %v5422_v37, %v5411_v40 }
 0xc4b   :  { %vm5427_vm5 = vcmp.ge.f32.partialorder %v5425_v41, 0.0  ;;  %v5429_v32 = vmul.f32 0.01, %v5425_v41 }
 0xc4c   :  { %v5430_v39 = vmul.f32 0.01, %v5426_v43  ;;  %vm5428_vm6 = vcmp.ge.f32.partialorder %v5426_v43, 0.0 }
 0xc4d   :  { %v5431_v27 = vsel %vm5427_vm5, %v5425_v41, %v5429_v32 }
 0xc4e   :  { %v5432_v44 = vsel %vm5428_vm6, %v5426_v43, %v5430_v39  ;;  %v5465_v46 = vpack.c.bf16 %v5431_v27, %v5431_v27 }
 0xc4f   :  { %v5466_v45 = vpack.c.bf16 %v5432_v44, %v5432_v44 }
 0xc51   :  { %5596 = vmatprep.mubr.bf16.mxu0 %v5466_v45 }
 0xc52   :  { %5597 = vmatmul.mubr.bf16.vlgmr.msra.gmra.mrb[48].mxu0 %v5465_v46 }
 0xd25   :  { %v6400_v7 = vpop.f32.mrb[48].mxu0 }
 0xd26   :  { %v6401_v8 = vpop.f32.mrb[49].mxu0 }
 0xd27   :  { %v6402_v48 = vadd.f32 %v6401_v8, %v6400_v7  ;;  %v6403_v6 = vpop.f32.mrb[50].mxu0 }
 0xd28   :  { %v6404_v49 = vpop.f32.mrb[51].mxu0 }
 0xd29   :  { %v5599_v50 = vadd.f32 %v6402_v48, %v5467_v47 }
 0xd2b   :  { %5604 = vst [vmem:[%s8295_s17] sm:$0xff] %v5599_v50 }
 0xd2c   :  { %5621 = vsyncpa [#allocation4], 1 }
 0xd2d   :  { %5622 = vsyncpa [#allocation6], 1 }
 0xd2e   :  { %5623 = vsyncpa [#allocation9], 1 }
 0xd2f   :  { %5624 = vsyncpa [#allocation12], 1 }
 0xd30   :  { %5625 = vsyncpa [#allocation15], 1 }
 0xd31   :  { %5626 = vsyncpa [#allocation18], 1 }

</bundles_post_ra>
